<compile_context>
chip_gen: v5e
topology: v5e:2x2
jax: 0.10.0
libtpu: 0.0.40
codegen_flags: <defaults>
</compile_context>

<pallas_src>
import functools
from typing import NamedTuple

import jax
import jax.numpy as jnp
from jax.experimental import pallas as pl
from jax.experimental.pallas import tpu as pltpu

EPS = 1e-5  # nn.BatchNorm2d default eps

_CPARAMS = pltpu.CompilerParams(
    dimension_semantics=("parallel",),   # row/batch grid axis -> split across TCs on v7x
    vmem_limit_bytes=32 * 1024 * 1024,   # explicit scoped-VMEM budget, safe on v5e/v6e/v7x
)


class BottleneckCfg(NamedTuple):
    cin: int
    planes: int
    cout: int
    Ci: int   # padded (lane-dense) channel counts
    P: int
    Co: int
    has_sc: bool


def _pad128(c):
    return ((c + 127) // 128) * 128


def _row_tile(m, cap=1024):
    """Largest multiple-of-8 divisor of m not exceeding cap.

    cap=1024 keeps per-step footprints far below the 32 MiB scoped VMEM limit on
    every generation (v6e's 128 MiB could take 2048; v7x/v5e prefer <=1024).
    """
    for t in range(min(cap, m), 7, -1):
        if m % t == 0 and t % 8 == 0:
            return t
    return m


# ------------------------------- kernels ------------------------------------
def _matmul_stats_kernel(x_ref, w_ref, z_ref, st_ref):
    """z = x @ w (bf16 operands, f32 MXU accumulate) + per-tile BN partial stats."""
    zf = jnp.dot(x_ref[...], w_ref[...], preferred_element_type=jnp.float32)
    z_ref[...] = zf.astype(z_ref.dtype)
    st_ref[0, 0:1, :] = jnp.sum(zf, axis=0, keepdims=True)
    st_ref[0, 1:2, :] = jnp.sum(zf * zf, axis=0, keepdims=True)


def _bn_relu_matmul_stats_kernel(x_ref, sc_ref, sh_ref, w_ref, z_ref, st_ref):
    """h = relu(x*scale+shift) (f32 VPU math); z = h @ w (bf16 MXU); + partial stats."""
    h = jnp.maximum(x_ref[...].astype(jnp.float32) * sc_ref[...] + sh_ref[...], 0.0)
    zf = jnp.dot(h.astype(jnp.bfloat16), w_ref[...], preferred_element_type=jnp.float32)
    z_ref[...] = zf.astype(z_ref.dtype)
    st_ref[0, 0:1, :] = jnp.sum(zf, axis=0, keepdims=True)
    st_ref[0, 1:2, :] = jnp.sum(zf * zf, axis=0, keepdims=True)


def _conv3x3_stats_kernel(stride, Ho, Wo, C, L, *refs):
    """3x3 conv (padding=1, stride=stride) for one image: 9 shifted MXU matmuls.

    Inputs are stride*stride polyphase components of the zero-padded conv input,
    flattened to (R*C, P) so every tap is a *contiguous* row slice kept in VMEM
    (no im2col in HBM, no strided/gathered loads).  Output rows use C columns
    per spatial output row; the (C-Wo) junk columns are zeroed and therefore do
    not pollute the BN2 partial stats; the wrapper drops them with a cheap slice.
    """
    ncomp = stride * stride
    comp_refs = refs[:ncomp]
    w_ref = refs[ncomp]
    z_ref, st_ref = refs[ncomp + 1], refs[ncomp + 2]
    P = w_ref.shape[-1]

    acc = jnp.zeros((L, P), jnp.float32)
    t = 0
    for ky in range(3):
        for kx in range(3):
            ci = (ky % stride) * stride + (kx % stride)
            off = (ky // stride) * C + (kx // stride)
            lhs = comp_refs[ci][0, off:off + L, :]              # (L, P) bf16, contiguous
            acc = acc + jnp.dot(lhs, w_ref[t], preferred_element_type=jnp.float32)
            t += 1

    col = jax.lax.broadcasted_iota(jnp.int32, (L, 1), 0) % C
    acc = acc * (col < Wo).astype(jnp.float32)                  # zero junk rows
    z_ref[0] = acc.astype(z_ref.dtype)
    st_ref[0, 0:1, :] = jnp.sum(acc, axis=0, keepdims=True)
    st_ref[0, 1:2, :] = jnp.sum(acc * acc, axis=0, keepdims=True)


def _final_kernel(has_sc_conv, *refs):
    """out = relu(bn3(conv3 out) + shortcut); BN folded to per-channel affine (f32)."""
    if has_sc_conv:
        z3_ref, sc3_ref, sh3_ref, zs_ref, scs_ref, shs_ref, o_ref = refs
        sc = zs_ref[...].astype(jnp.float32) * scs_ref[...] + shs_ref[...]
    else:
        z3_ref, sc3_ref, sh3_ref, x_ref, o_ref = refs
        sc = x_ref[...]
    h3 = z3_ref[...].astype(jnp.float32) * sc3_ref[...] + sh3_ref[...]
    o_ref[...] = jnp.maximum(h3 + sc, 0.0)


# ------------------------------ wrapper --------------------------------------
def _bn_affine(stats, count, gamma, beta):
    """Fold training-mode BatchNorm into a per-channel affine from partial stats.

    stats: (G, 2, C) per-tile [sum, sum_of_squares]; var = E[z^2] - mu^2 (one pass).
    """
    tot = jnp.sum(stats, axis=0)
    mu = tot[0] / count
    var = jnp.maximum(tot[1] / count - mu * mu, 0.0)
    scale = gamma * jax.lax.rsqrt(var + EPS)
    shift = beta - mu * scale
    return scale.reshape(1, -1), shift.reshape(1, -1)


def prepare_params(p):
    """One-time (init-time) parameter prep: matmul layouts, channel padding to a
    multiple of 128 lanes, bf16 weights.  Conv biases are dropped (cancelled by
    the training-mode BN mean subtraction)."""
    planes, cin = p["w1"].shape[0], p["w1"].shape[1]
    cout = p["w3"].shape[0]
    Ci, P, Co = _pad128(cin), _pad128(planes), _pad128(cout)
    has_sc = "ws" in p

    def pad2(m, r, c):
        return jnp.pad(m, ((0, r - m.shape[0]), (0, c - m.shape[1])))

    def padv(v, c):
        return jnp.pad(v.astype(jnp.float32), (0, c - v.shape[0]))

    w = {
        "w1": pad2(p["w1"].reshape(planes, cin).T, Ci, P).astype(jnp.bfloat16),
        "w3": pad2(p["w3"].reshape(cout, planes).T, P, Co).astype(jnp.bfloat16),
        "g1": padv(p["g1"], P), "be1": padv(p["be1"], P),
        "g2": padv(p["g2"], P), "be2": padv(p["be2"], P),
        "g3": padv(p["g3"], Co), "be3": padv(p["be3"], Co),
    }
    # (out, in, ky, kx) -> (ky, kx, in, out) -> pad -> (9, P, P); tap index t = ky*3+kx.
    w2 = jnp.transpose(p["w2"], (2, 3, 1, 0))
    w2 = jnp.pad(w2, ((0, 0), (0, 0), (0, P - planes), (0, P - planes)))
    w["w2"] = w2.reshape(9, P, P).astype(jnp.bfloat16)
    if has_sc:
        w["ws"] = pad2(p["ws"].reshape(cout, cin).T, Ci, Co).astype(jnp.bfloat16)
        w["gs"] = padv(p["gs"], Co)
        w["bes"] = padv(p["bes"], Co)
    cfg = BottleneckCfg(cin=cin, planes=planes, cout=cout, Ci=Ci, P=P, Co=Co,
                        has_sc=has_sc)
    return cfg, w


def bottleneck_forward(x_nchw, w, cfg, stride=1, tile_cap=1024):
    """Pallas Bottleneck.forward.  x_nchw: (N, Cin, H, W) f32 (PyTorch layout)."""
    N, cin, H, W = x_nchw.shape
    Ci, P, Co = cfg.Ci, cfg.P, cfg.Co
    s = int(stride)
    has_sc_conv = (s != 1) or (cfg.cin != cfg.cout)
    if has_sc_conv and not cfg.has_sc:
        raise ValueError("params are missing the shortcut conv/bn")

    # ---- input prep (XLA): NCHW->NHWC (channels on lanes), lane-pad, bf16.
    # TODO(synk): accept NHWC at the module boundary to drop this transpose.
    x_nhwc = jnp.transpose(x_nchw, (0, 2, 3, 1))
    x_p = jnp.pad(x_nhwc, ((0, 0), (0, 0), (0, 0), (0, Ci - cin)))
    M = N * H * W
    x2d = x_p.reshape(M, Ci)
    x2d_bf = x2d.astype(jnp.bfloat16)

    TM = _row_tile(M, tile_cap)
    G1 = M // TM

    # ---- phase 1: conv1 (1x1) as a row-tiled bf16 MXU matmul + BN1 partial stats
    z1, st1 = pl.pallas_call(
        _matmul_stats_kernel,
        grid=(G1,),
        in_specs=[pl.BlockSpec((TM, Ci), lambda i: (i, 0)),
                  pl.BlockSpec((Ci, P), lambda i: (0, 0))],
        out_specs=(pl.BlockSpec((TM, P), lambda i: (i, 0)),
                   pl.BlockSpec((1, 2, P), lambda i: (i, 0, 0))),
        out_shape=(jax.ShapeDtypeStruct((M, P), jnp.bfloat16),
                   jax.ShapeDtypeStruct((G1, 2, P), jnp.float32)),
        compiler_params=_CPARAMS,
    )(x2d_bf, w["w1"])
    sc1, sh1 = _bn_affine(st1, M, w["g1"], w["be1"])

    # ---- glue (one fused XLA elementwise/pad/slice pass over z1, ~P channels):
    # BN1 affine + ReLU, zero-pad for the 3x3 conv, polyphase split for stride.
    Ho = (H + 2 - 3) // s + 1
    Wo = (W + 2 - 3) // s + 1
    e = 2 // s                      # halo extent inside each polyphase component
    R, C = Ho + e, Wo + e
    L = (Ho - 1) * C + Wo
    out1 = jnp.maximum(z1.astype(jnp.float32) * sc1 + sh1, 0.0).astype(jnp.bfloat16)
    out1 = out1.reshape(N, H, W, P)
    out1p = jnp.pad(out1, ((0, 0), (1, s), (1, s), (0, 0)))
    comps = []
    for py in range(s):
        for px in range(s):
            comp = out1p[:, py::s, px::s, :][:, :R, :C, :]
            comps.append(comp.reshape(N, R * C, P))

    # ---- phase 2: 3x3 conv (stride s) as 9 shifted accumulated MXU matmuls over
    # the in-VMEM polyphase components (no im2col in HBM) + BN2 partial stats.
    # TODO(synk): for very large images, additionally tile the H axis here.
    k2 = functools.partial(_conv3x3_stats_kernel, s, Ho, Wo, C, L)
    z2raw, st2 = pl.pallas_call(
        k2,
        grid=(N,),
        in_specs=([pl.BlockSpec((1, R * C, P), lambda n: (n, 0, 0))] * (s * s)
                  + [pl.BlockSpec((9, P, P), lambda n: (0, 0, 0))]),
        out_specs=(pl.BlockSpec((1, L, P), lambda n: (n, 0, 0)),
                   pl.BlockSpec((1, 2, P), lambda n: (n, 0, 0))),
        out_shape=(jax.ShapeDtypeStruct((N, L, P), jnp.bfloat16),
                   jax.ShapeDtypeStruct((N, 2, P), jnp.float32)),
        compiler_params=_CPARAMS,
    )(*comps, w["w2"])
    M2 = N * Ho * Wo
    sc2, sh2 = _bn_affine(st2, M2, w["g2"], w["be2"])

    # compact: drop the (C-Wo) junk columns per output row (cheap XLA reshape/slice)
    z2 = jnp.pad(z2raw, ((0, 0), (0, Ho * C - L), (0, 0)))
    z2 = z2.reshape(N, Ho, C, P)[:, :, :Wo, :].reshape(M2, P)

    TM2 = _row_tile(M2, tile_cap)
    G2 = M2 // TM2

    # ---- phase 3: BN2 affine + ReLU + conv3 (1x1) + BN3 partial stats
    z3, st3 = pl.pallas_call(
        _bn_relu_matmul_stats_kernel,
        grid=(G2,),
        in_specs=[pl.BlockSpec((TM2, P), lambda i: (i, 0)),
                  pl.BlockSpec((1, P), lambda i: (0, 0)),
                  pl.BlockSpec((1, P), lambda i: (0, 0)),
                  pl.BlockSpec((P, Co), lambda i: (0, 0))],
        out_specs=(pl.BlockSpec((TM2, Co), lambda i: (i, 0)),
                   pl.BlockSpec((1, 2, Co), lambda i: (i, 0, 0))),
        out_shape=(jax.ShapeDtypeStruct((M2, Co), jnp.bfloat16),
                   jax.ShapeDtypeStruct((G2, 2, Co), jnp.float32)),
        compiler_params=_CPARAMS,
    )(z2, sc2, sh2, w["w3"])
    sc3, sh3 = _bn_affine(st3, M2, w["g3"], w["be3"])

    # ---- shortcut branch
    if has_sc_conv:
        # TODO(synk): fold this strided read into the shortcut kernel's BlockSpec
        # (pl.ds stride) instead of an XLA slice.
        xs2d = x_p[:, ::s, ::s, :].reshape(M2, Ci).astype(jnp.bfloat16)
        zs, sts = pl.pallas_call(
            _matmul_stats_kernel,
            grid=(G2,),
            in_specs=[pl.BlockSpec((TM2, Ci), lambda i: (i, 0)),
                      pl.BlockSpec((Ci, Co), lambda i: (0, 0))],
            out_specs=(pl.BlockSpec((TM2, Co), lambda i: (i, 0)),
                       pl.BlockSpec((1, 2, Co), lambda i: (i, 0, 0))),
            out_shape=(jax.ShapeDtypeStruct((M2, Co), jnp.bfloat16),
                       jax.ShapeDtypeStruct((G2, 2, Co), jnp.float32)),
            compiler_params=_CPARAMS,
        )(xs2d, w["ws"])
        scs, shs = _bn_affine(sts, M2, w["gs"], w["bes"])
        final_args = (z3, sc3, sh3, zs, scs, shs)
        final_specs = [pl.BlockSpec((TM2, Co), lambda i: (i, 0)),
                       pl.BlockSpec((1, Co), lambda i: (0, 0)),
                       pl.BlockSpec((1, Co), lambda i: (0, 0)),
                       pl.BlockSpec((TM2, Co), lambda i: (i, 0)),
                       pl.BlockSpec((1, Co), lambda i: (0, 0)),
                       pl.BlockSpec((1, Co), lambda i: (0, 0))]
    else:
        # identity shortcut (stride == 1, cin == cout): keep the residual in f32.
        final_args = (z3, sc3, sh3, x2d)
        final_specs = [pl.BlockSpec((TM2, Co), lambda i: (i, 0)),
                       pl.BlockSpec((1, Co), lambda i: (0, 0)),
                       pl.BlockSpec((1, Co), lambda i: (0, 0)),
                       pl.BlockSpec((TM2, Co), lambda i: (i, 0))]

    # ---- phase 4: BN3 affine + shortcut BN affine + add + final ReLU
    out2d = pl.pallas_call(
        functools.partial(_final_kernel, has_sc_conv),
        grid=(G2,),
        in_specs=final_specs,
        out_specs=pl.BlockSpec((TM2, Co), lambda i: (i, 0)),
        out_shape=jax.ShapeDtypeStruct((M2, Co), jnp.float32),
        compiler_params=_CPARAMS,
    )(*final_args)

    out = out2d.reshape(N, Ho, Wo, Co)[..., :cfg.cout]
    return jnp.transpose(out, (0, 3, 1, 2))  # back to NCHW


# ---------------- pure-JAX reference (no Pallas) for verification -------------
def _ref_forward(x, p, stride=1):
    def conv(x, w, b, s=1, pad=0):
        y = jax.lax.conv_general_dilated(
            x, w, (s, s), [(pad, pad), (pad, pad)],
            dimension_numbers=("NCHW", "OIHW", "NCHW"))
        return y + b.reshape(1, -1, 1, 1)

    def bn(x, g, b):
        mu = jnp.mean(x, axis=(0, 2, 3), keepdims=True)
        var = jnp.mean((x - mu) ** 2, axis=(0, 2, 3), keepdims=True)
        return (x - mu) * jax.lax.rsqrt(var + EPS) * g.reshape(1, -1, 1, 1) + b.reshape(1, -1, 1, 1)

    out = jax.nn.relu(bn(conv(x, p["w1"], p["b1"]), p["g1"], p["be1"]))
    out = jax.nn.relu(bn(conv(out, p["w2"], p["b2"], s=stride, pad=1), p["g2"], p["be2"]))
    out = bn(conv(out, p["w3"], p["b3"]), p["g3"], p["be3"])
    Cin, Cout = x.shape[1], p["w3"].shape[0]
    if stride != 1 or Cin != Cout:
        sc = bn(conv(x, p["ws"], p["bs"], s=stride), p["gs"], p["bes"])
    else:
        sc = x
    return jax.nn.relu(out + sc)


if __name__ == "__main__":
    key = jax.random.PRNGKey(0)

    def rn(k, shape, scale=0.1):
        return scale * jax.random.normal(k, shape, jnp.float32)

    def make_raw_params(k, in_planes, planes, with_sc):
        cout = 4 * planes
        ks = jax.random.split(k, 8)
        ones = lambda c: jnp.ones((c,), jnp.float32)
        zeros = lambda c: jnp.zeros((c,), jnp.float32)
        p = {
            "w1": rn(ks[0], (planes, in_planes, 1, 1)), "b1": rn(ks[1], (planes,)),
            "g1": ones(planes), "be1": zeros(planes),
            "w2": rn(ks[2], (planes, planes, 3, 3)), "b2": rn(ks[3], (planes,)),
            "g2": ones(planes), "be2": zeros(planes),
            "w3": rn(ks[4], (cout, planes, 1, 1)), "b3": rn(ks[5], (cout,)),
            "g3": ones(cout), "be3": zeros(cout),
        }
        if with_sc:
            p.update({
                "ws": rn(ks[6], (cout, in_planes, 1, 1)), "bs": rn(ks[7], (cout,)),
                "gs": ones(cout), "bes": zeros(cout),
            })
        return p

    fwd = jax.jit(bottleneck_forward, static_argnames=("cfg", "stride", "tile_cap"))

    k_p1, k_p2, k_x1, k_x2 = jax.random.split(key, 4)

    # Case A: in_planes != 4*planes -> conv+BN shortcut; exercise stride 1 and 2.
    rawA = make_raw_params(k_p1, in_planes=4, planes=4, with_sc=True)
    cfgA, wA = prepare_params(rawA)
    xA = jax.random.normal(k_x1, (2, 4, 16, 16), jnp.float32)
    # Case B: identity shortcut (in_planes == 4*planes, stride == 1).
    rawB = make_raw_params(k_p2, in_planes=16, planes=4, with_sc=False)
    cfgB, wB = prepare_params(rawB)
    xB = jax.random.normal(k_x2, (2, 16, 16, 16), jnp.float32)

    cases = [(xA, rawA, cfgA, wA, 1), (xA, rawA, cfgA, wA, 2), (xB, rawB, cfgB, wB, 1)]

    ok = True
    for x, raw, cfg, w, stride in cases:
        # tile_cap=128 forces multi-tile grids at these toy sizes so the
        # cross-tile BN-stats reduction path is exercised.
        out = jax.block_until_ready(fwd(x, w, cfg=cfg, stride=stride, tile_cap=128))
        ref = _ref_forward(x, raw, stride=stride)
        if out.shape != ref.shape:
            ok = False
            print("SHAPE_MISMATCH", out.shape, ref.shape, "stride", stride)
            continue
        diff = jnp.abs(out - ref)
        max_err = float(jnp.max(diff))
        mean_err = float(jnp.mean(diff))
        # bf16 MXU path vs a pure-f32 reference.
        if max_err > 1e-1 or mean_err > 2e-2:
            ok = False
            print("ERR_TOO_LARGE stride", stride, "max", max_err, "mean", mean_err)

    if ok:
        print("KERNEL_OK")
</pallas_src>

<mosaic_0001>
module attributes {stable_mosaic.version = 11 : i64} {
  func.func @_matmul_stats_kernel(%arg0: i32, %arg1: memref<128x128xbf16, #tpu.memory_space<vmem>>, %arg2: memref<128x128xbf16, #tpu.memory_space<vmem>>, %arg3: memref<128x128xbf16, #tpu.memory_space<vmem>>, %arg4: memref<1x2x128xf32, #tpu.memory_space<vmem>>) attributes {dimension_semantics = [#tpu.dimension_semantics<parallel>], iteration_bounds = array<i64: 4>, scalar_prefetch = 0 : i64, scratch_operands = 0 : i64, tpu.core_type = #tpu.core_type<tc>, window_params = [{transform_indices = @transform_0, window_bounds = array<i64: 128, 128>}, {pipeline_mode = #tpu.pipeline_mode<synchronous>, transform_indices = @transform_1, window_bounds = array<i64: 128, 128>}, {transform_indices = @transform_2, window_bounds = array<i64: 128, 128>}, {transform_indices = @transform_3, window_bounds = array<i64: 1, 2, 128>}]} {
    %c0 = arith.constant 0 : index
    %c0_0 = arith.constant 0 : index
    %0 = vector.load %arg1[%c0, %c0_0] : memref<128x128xbf16, #tpu.memory_space<vmem>>, vector<128x128xbf16>
    %c0_1 = arith.constant 0 : index
    %c0_2 = arith.constant 0 : index
    %1 = vector.load %arg2[%c0_1, %c0_2] : memref<128x128xbf16, #tpu.memory_space<vmem>>, vector<128x128xbf16>
    %cst = arith.constant dense<0.000000e+00> : vector<128x128xf32>
    %2 = tpu.matmul %0, %1, %cst {dimension_numbers = #tpu.dot_dimension_numbers<[1], [0], [0], [1], [0, 0, 1, 1], [], []>} : vector<128x128xbf16>, vector<128x128xbf16>, vector<128x128xf32> -> vector<128x128xf32>
    %3 = arith.truncf %2 : vector<128x128xf32> to vector<128x128xbf16>
    %c0_3 = arith.constant 0 : index
    %c0_4 = arith.constant 0 : index
    %4 = vector.load %arg3[%c0_3, %c0_4] : memref<128x128xbf16, #tpu.memory_space<vmem>>, vector<128x128xbf16>
    tpu.vector_store %arg3[%c0_3, %c0_4], %3 {strides = array<i32>} : memref<128x128xbf16, #tpu.memory_space<vmem>>, vector<128x128xbf16>,
    %cst_5 = arith.constant dense<0.000000e+00> : vector<128xf32>
    %5 = vector.multi_reduction <add>, %2, %cst_5 [0] : vector<128x128xf32> to vector<128xf32>
    %6 = vector.shape_cast %5 : vector<128xf32> to vector<1x128xf32>
    %c0_6 = arith.constant 0 : index
    %c0_7 = arith.constant 0 : index
    %c0_8 = arith.constant 0 : index
    %7 = vector.load %arg4[%c0_6, %c0_7, %c0_8] : memref<1x2x128xf32, #tpu.memory_space<vmem>>, vector<1x1x128xf32>
    %8 = vector.shape_cast %7 : vector<1x1x128xf32> to vector<1x128xf32>
    %9 = vector.shape_cast %6 : vector<1x128xf32> to vector<1x1x128xf32>
    tpu.vector_store %arg4[%c0_6, %c0_7, %c0_8], %9 {strides = array<i32>} : memref<1x2x128xf32, #tpu.memory_space<vmem>>, vector<1x1x128xf32>,
    %10 = arith.mulf %2, %2 : vector<128x128xf32>
    %cst_9 = arith.constant dense<0.000000e+00> : vector<128xf32>
    %11 = vector.multi_reduction <add>, %10, %cst_9 [0] : vector<128x128xf32> to vector<128xf32>
    %12 = vector.shape_cast %11 : vector<128xf32> to vector<1x128xf32>
    %c0_10 = arith.constant 0 : index
    %c1 = arith.constant 1 : index
    %c0_11 = arith.constant 0 : index
    %13 = vector.load %arg4[%c0_10, %c1, %c0_11] : memref<1x2x128xf32, #tpu.memory_space<vmem>>, vector<1x1x128xf32>
    %14 = vector.shape_cast %13 : vector<1x1x128xf32> to vector<1x128xf32>
    %15 = vector.shape_cast %12 : vector<1x128xf32> to vector<1x1x128xf32>
    tpu.vector_store %arg4[%c0_10, %c1, %c0_11], %15 {strides = array<i32>} : memref<1x2x128xf32, #tpu.memory_space<vmem>>, vector<1x1x128xf32>,
    return
  }
  func.func @transform_0(%arg0: i32) -> (i32, i32) {
    %c0_i32 = arith.constant 0 : i32
    %c0_i32_0 = arith.constant 0 : i32
    return %arg0, %c0_i32 : i32, i32
  }
  func.func @transform_1(%arg0: i32) -> (i32, i32) {
    %c0_i32 = arith.constant 0 : i32
    %c0_i32_0 = arith.constant 0 : i32
    %c0_i32_1 = arith.constant 0 : i32
    return %c0_i32, %c0_i32_0 : i32, i32
  }
  func.func @transform_2(%arg0: i32) -> (i32, i32) {
    %c0_i32 = arith.constant 0 : i32
    %c0_i32_0 = arith.constant 0 : i32
    return %arg0, %c0_i32 : i32, i32
  }
  func.func @transform_3(%arg0: i32) -> (i32, i32, i32) {
    %c0_i32 = arith.constant 0 : i32
    %c0_i32_0 = arith.constant 0 : i32
    %c0_i32_1 = arith.constant 0 : i32
    return %arg0, %c0_i32, %c0_i32_0 : i32, i32, i32
  }
}

module attributes {stable_mosaic.version = 11 : i64} {
  func.func @_conv3x3_stats_kernel(%arg0: i32, %arg1: memref<1x324x128xbf16, #tpu.memory_space<vmem>>, %arg2: memref<9x128x128xbf16, #tpu.memory_space<vmem>>, %arg3: memref<1x286x128xbf16, #tpu.memory_space<vmem>>, %arg4: memref<1x2x128xf32, #tpu.memory_space<vmem>>) attributes {dimension_semantics = [#tpu.dimension_semantics<parallel>], iteration_bounds = array<i64: 2>, scalar_prefetch = 0 : i64, scratch_operands = 0 : i64, tpu.core_type = #tpu.core_type<tc>, window_params = [{transform_indices = @transform_0, window_bounds = array<i64: 1, 324, 128>}, {pipeline_mode = #tpu.pipeline_mode<synchronous>, transform_indices = @transform_1, window_bounds = array<i64: 9, 128, 128>}, {transform_indices = @transform_2, window_bounds = array<i64: 1, 286, 128>}, {transform_indices = @transform_3, window_bounds = array<i64: 1, 2, 128>}]} {
    %cst = arith.constant 0.000000e+00 : f32
    %0 = vector.broadcast %cst : f32 to vector<286x128xf32>
    %c0 = arith.constant 0 : index
    %c0_0 = arith.constant 0 : index
    %c0_1 = arith.constant 0 : index
    %1 = vector.load %arg1[%c0, %c0_0, %c0_1] : memref<1x324x128xbf16, #tpu.memory_space<vmem>>, vector<1x286x128xbf16>
    %2 = vector.shape_cast %1 : vector<1x286x128xbf16> to vector<286x128xbf16>
    %c0_2 = arith.constant 0 : index
    %c0_3 = arith.constant 0 : index
    %c0_4 = arith.constant 0 : index
    %3 = vector.load %arg2[%c0_2, %c0_3, %c0_4] : memref<9x128x128xbf16, #tpu.memory_space<vmem>>, vector<1x128x128xbf16>
    %4 = vector.shape_cast %3 : vector<1x128x128xbf16> to vector<128x128xbf16>
    %cst_5 = arith.constant dense<0.000000e+00> : vector<286x128xf32>
    %5 = tpu.matmul %2, %4, %cst_5 {dimension_numbers = #tpu.dot_dimension_numbers<[1], [0], [0], [1], [0, 0, 1, 1], [], []>} : vector<286x128xbf16>, vector<128x128xbf16>, vector<286x128xf32> -> vector<286x128xf32>
    %6 = arith.addf %0, %5 : vector<286x128xf32>
    %c0_6 = arith.constant 0 : index
    %c1 = arith.constant 1 : index
    %c0_7 = arith.constant 0 : index
    %7 = vector.load %arg1[%c0_6, %c1, %c0_7] : memref<1x324x128xbf16, #tpu.memory_space<vmem>>, vector<1x286x128xbf16>
    %8 = vector.shape_cast %7 : vector<1x286x128xbf16> to vector<286x128xbf16>
    %c1_8 = arith.constant 1 : index
    %c0_9 = arith.constant 0 : index
    %c0_10 = arith.constant 0 : index
    %9 = vector.load %arg2[%c1_8, %c0_9, %c0_10] : memref<9x128x128xbf16, #tpu.memory_space<vmem>>, vector<1x128x128xbf16>
    %10 = vector.shape_cast %9 : vector<1x128x128xbf16> to vector<128x128xbf16>
    %cst_11 = arith.constant dense<0.000000e+00> : vector<286x128xf32>
    %11 = tpu.matmul %8, %10, %cst_11 {dimension_numbers = #tpu.dot_dimension_numbers<[1], [0], [0], [1], [0, 0, 1, 1], [], []>} : vector<286x128xbf16>, vector<128x128xbf16>, vector<286x128xf32> -> vector<286x128xf32>
    %12 = arith.addf %6, %11 : vector<286x128xf32>
    %c0_12 = arith.constant 0 : index
    %c2 = arith.constant 2 : index
    %c0_13 = arith.constant 0 : index
    %13 = vector.load %arg1[%c0_12, %c2, %c0_13] : memref<1x324x128xbf16, #tpu.memory_space<vmem>>, vector<1x286x128xbf16>
    %14 = vector.shape_cast %13 : vector<1x286x128xbf16> to vector<286x128xbf16>
    %c2_14 = arith.constant 2 : index
    %c0_15 = arith.constant 0 : index
    %c0_16 = arith.constant 0 : index
    %15 = vector.load %arg2[%c2_14, %c0_15, %c0_16] : memref<9x128x128xbf16, #tpu.memory_space<vmem>>, vector<1x128x128xbf16>
    %16 = vector.shape_cast %15 : vector<1x128x128xbf16> to vector<128x128xbf16>
    %cst_17 = arith.constant dense<0.000000e+00> : vector<286x128xf32>
    %17 = tpu.matmul %14, %16, %cst_17 {dimension_numbers = #tpu.dot_dimension_numbers<[1], [0], [0], [1], [0, 0, 1, 1], [], []>} : vector<286x128xbf16>, vector<128x128xbf16>, vector<286x128xf32> -> vector<286x128xf32>
    %18 = arith.addf %12, %17 : vector<286x128xf32>
    %c0_18 = arith.constant 0 : index
    %c18 = arith.constant 18 : index
    %c0_19 = arith.constant 0 : index
    %19 = vector.load %arg1[%c0_18, %c18, %c0_19] : memref<1x324x128xbf16, #tpu.memory_space<vmem>>, vector<1x286x128xbf16>
    %20 = vector.shape_cast %19 : vector<1x286x128xbf16> to vector<286x128xbf16>
    %c3 = arith.constant 3 : index
    %c0_20 = arith.constant 0 : index
    %c0_21 = arith.constant 0 : index
    %21 = vector.load %arg2[%c3, %c0_20, %c0_21] : memref<9x128x128xbf16, #tpu.memory_space<vmem>>, vector<1x128x128xbf16>
    %22 = vector.shape_cast %21 : vector<1x128x128xbf16> to vector<128x128xbf16>
    %cst_22 = arith.constant dense<0.000000e+00> : vector<286x128xf32>
    %23 = tpu.matmul %20, %22, %cst_22 {dimension_numbers = #tpu.dot_dimension_numbers<[1], [0], [0], [1], [0, 0, 1, 1], [], []>} : vector<286x128xbf16>, vector<128x128xbf16>, vector<286x128xf32> -> vector<286x128xf32>
    %24 = arith.addf %18, %23 : vector<286x128xf32>
    %c0_23 = arith.constant 0 : index
    %c19 = arith.constant 19 : index
    %c0_24 = arith.constant 0 : index
    %25 = vector.load %arg1[%c0_23, %c19, %c0_24] : memref<1x324x128xbf16, #tpu.memory_space<vmem>>, vector<1x286x128xbf16>
    %26 = vector.shape_cast %25 : vector<1x286x128xbf16> to vector<286x128xbf16>
    %c4 = arith.constant 4 : index
    %c0_25 = arith.constant 0 : index
    %c0_26 = arith.constant 0 : index
    %27 = vector.load %arg2[%c4, %c0_25, %c0_26] : memref<9x128x128xbf16, #tpu.memory_space<vmem>>, vector<1x128x128xbf16>
    %28 = vector.shape_cast %27 : vector<1x128x128xbf16> to vector<128x128xbf16>
    %cst_27 = arith.constant dense<0.000000e+00> : vector<286x128xf32>
    %29 = tpu.matmul %26, %28, %cst_27 {dimension_numbers = #tpu.dot_dimension_numbers<[1], [0], [0], [1], [0, 0, 1, 1], [], []>} : vector<286x128xbf16>, vector<128x128xbf16>, vector<286x128xf32> -> vector<286x128xf32>
    %30 = arith.addf %24, %29 : vector<286x128xf32>
    %c0_28 = arith.constant 0 : index
    %c20 = arith.constant 20 : index
    %c0_29 = arith.constant 0 : index
    %31 = vector.load %arg1[%c0_28, %c20, %c0_29] : memref<1x324x128xbf16, #tpu.memory_space<vmem>>, vector<1x286x128xbf16>
    %32 = vector.shape_cast %31 : vector<1x286x128xbf16> to vector<286x128xbf16>
    %c5 = arith.constant 5 : index
    %c0_30 = arith.constant 0 : index
    %c0_31 = arith.constant 0 : index
    %33 = vector.load %arg2[%c5, %c0_30, %c0_31] : memref<9x128x128xbf16, #tpu.memory_space<vmem>>, vector<1x128x128xbf16>
    %34 = vector.shape_cast %33 : vector<1x128x128xbf16> to vector<128x128xbf16>
    %cst_32 = arith.constant dense<0.000000e+00> : vector<286x128xf32>
    %35 = tpu.matmul %32, %34, %cst_32 {dimension_numbers = #tpu.dot_dimension_numbers<[1], [0], [0], [1], [0, 0, 1, 1], [], []>} : vector<286x128xbf16>, vector<128x128xbf16>, vector<286x128xf32> -> vector<286x128xf32>
    %36 = arith.addf %30, %35 : vector<286x128xf32>
    %c0_33 = arith.constant 0 : index
    %c36 = arith.constant 36 : index
    %c0_34 = arith.constant 0 : index
    %37 = vector.load %arg1[%c0_33, %c36, %c0_34] : memref<1x324x128xbf16, #tpu.memory_space<vmem>>, vector<1x286x128xbf16>
    %38 = vector.shape_cast %37 : vector<1x286x128xbf16> to vector<286x128xbf16>
    %c6 = arith.constant 6 : index
    %c0_35 = arith.constant 0 : index
    %c0_36 = arith.constant 0 : index
    %39 = vector.load %arg2[%c6, %c0_35, %c0_36] : memref<9x128x128xbf16, #tpu.memory_space<vmem>>, vector<1x128x128xbf16>
    %40 = vector.shape_cast %39 : vector<1x128x128xbf16> to vector<128x128xbf16>
    %cst_37 = arith.constant dense<0.000000e+00> : vector<286x128xf32>
    %41 = tpu.matmul %38, %40, %cst_37 {dimension_numbers = #tpu.dot_dimension_numbers<[1], [0], [0], [1], [0, 0, 1, 1], [], []>} : vector<286x128xbf16>, vector<128x128xbf16>, vector<286x128xf32> -> vector<286x128xf32>
    %42 = arith.addf %36, %41 : vector<286x128xf32>
    %c0_38 = arith.constant 0 : index
    %c37 = arith.constant 37 : index
    %c0_39 = arith.constant 0 : index
    %43 = vector.load %arg1[%c0_38, %c37, %c0_39] : memref<1x324x128xbf16, #tpu.memory_space<vmem>>, vector<1x286x128xbf16>
    %44 = vector.shape_cast %43 : vector<1x286x128xbf16> to vector<286x128xbf16>
    %c7 = arith.constant 7 : index
    %c0_40 = arith.constant 0 : index
    %c0_41 = arith.constant 0 : index
    %45 = vector.load %arg2[%c7, %c0_40, %c0_41] : memref<9x128x128xbf16, #tpu.memory_space<vmem>>, vector<1x128x128xbf16>
    %46 = vector.shape_cast %45 : vector<1x128x128xbf16> to vector<128x128xbf16>
    %cst_42 = arith.constant dense<0.000000e+00> : vector<286x128xf32>
    %47 = tpu.matmul %44, %46, %cst_42 {dimension_numbers = #tpu.dot_dimension_numbers<[1], [0], [0], [1], [0, 0, 1, 1], [], []>} : vector<286x128xbf16>, vector<128x128xbf16>, vector<286x128xf32> -> vector<286x128xf32>
    %48 = arith.addf %42, %47 : vector<286x128xf32>
    %c0_43 = arith.constant 0 : index
    %c38 = arith.constant 38 : index
    %c0_44 = arith.constant 0 : index
    %49 = vector.load %arg1[%c0_43, %c38, %c0_44] : memref<1x324x128xbf16, #tpu.memory_space<vmem>>, vector<1x286x128xbf16>
    %50 = vector.shape_cast %49 : vector<1x286x128xbf16> to vector<286x128xbf16>
    %c8 = arith.constant 8 : index
    %c0_45 = arith.constant 0 : index
    %c0_46 = arith.constant 0 : index
    %51 = vector.load %arg2[%c8, %c0_45, %c0_46] : memref<9x128x128xbf16, #tpu.memory_space<vmem>>, vector<1x128x128xbf16>
    %52 = vector.shape_cast %51 : vector<1x128x128xbf16> to vector<128x128xbf16>
    %cst_47 = arith.constant dense<0.000000e+00> : vector<286x128xf32>
    %53 = tpu.matmul %50, %52, %cst_47 {dimension_numbers = #tpu.dot_dimension_numbers<[1], [0], [0], [1], [0, 0, 1, 1], [], []>} : vector<286x128xbf16>, vector<128x128xbf16>, vector<286x128xf32> -> vector<286x128xf32>
    %54 = arith.addf %48, %53 : vector<286x128xf32>
    %55 = tpu.iota {dimensions = array<i32: 0>} : vector<286x1xi32>
    %c18_i32 = arith.constant 18 : i32
    %c0_i32 = arith.constant 0 : i32
    %56 = arith.cmpi eq, %c18_i32, %c0_i32 : i32
    %c1_i32 = arith.constant 1 : i32
    %57 = arith.select %56, %c1_i32, %c18_i32 : i32
    %58 = vector.broadcast %57 : i32 to vector<286x1xi32>
    %59 = arith.remsi %55, %58 : vector<286x1xi32>
    %c0_i32_48 = arith.constant 0 : i32
    %60 = vector.broadcast %c0_i32_48 : i32 to vector<286x1xi32>
    %61 = arith.cmpi ne, %59, %60 : vector<286x1xi32>
    %c0_i32_49 = arith.constant 0 : i32
    %62 = vector.broadcast %c0_i32_49 : i32 to vector<286x1xi32>
    %63 = arith.cmpi slt, %59, %62 : vector<286x1xi32>
    %c0_i32_50 = arith.constant 0 : i32
    %64 = arith.cmpi slt, %57, %c0_i32_50 : i32
    %65 = vector.broadcast %64 : i1 to vector<286x1xi1>
    %66 = vector.broadcast %65 : vector<286x1xi1> to vector<286x1xi1>
    %67 = arith.xori %63, %66 : vector<286x1xi1>
    %68 = arith.andi %67, %61 : vector<286x1xi1>
    %69 = vector.broadcast %57 : i32 to vector<286x1xi32>
    %70 = arith.addi %59, %69 : vector<286x1xi32>
    %71 = arith.select %68, %70, %59 : vector<286x1xi1>, vector<286x1xi32>
    %c16_i32 = arith.constant 16 : i32
    %72 = vector.broadcast %c16_i32 : i32 to vector<286x1xi32>
    %73 = arith.cmpi slt, %71, %72 : vector<286x1xi32>
    %74 = arith.extui %73 : vector<286x1xi1> to vector<286x1xi32>
    %75 = arith.sitofp %74 : vector<286x1xi32> to vector<286x1xf32>
    %76 = vector.broadcast %75 : vector<286x1xf32> to vector<286x128xf32>
    %77 = arith.mulf %54, %76 : vector<286x128xf32>
    %78 = arith.truncf %77 : vector<286x128xf32> to vector<286x128xbf16>
    %c0_51 = arith.constant 0 : index
    %c0_52 = arith.constant 0 : index
    %c0_53 = arith.constant 0 : index
    %79 = vector.load %arg3[%c0_51, %c0_52, %c0_53] : memref<1x286x128xbf16, #tpu.memory_space<vmem>>, vector<1x286x128xbf16>
    %80 = vector.shape_cast %79 : vector<1x286x128xbf16> to vector<286x128xbf16>
    %81 = vector.shape_cast %78 : vector<286x128xbf16> to vector<1x286x128xbf16>
    tpu.vector_store %arg3[%c0_51, %c0_52, %c0_53], %81 {strides = array<i32>} : memref<1x286x128xbf16, #tpu.memory_space<vmem>>, vector<1x286x128xbf16>,
    %cst_54 = arith.constant dense<0.000000e+00> : vector<128xf32>
    %82 = vector.multi_reduction <add>, %77, %cst_54 [0] : vector<286x128xf32> to vector<128xf32>
    %83 = vector.shape_cast %82 : vector<128xf32> to vector<1x128xf32>
    %c0_55 = arith.constant 0 : index
    %c0_56 = arith.constant 0 : index
    %c0_57 = arith.constant 0 : index
    %84 = vector.load %arg4[%c0_55, %c0_56, %c0_57] : memref<1x2x128xf32, #tpu.memory_space<vmem>>, vector<1x1x128xf32>
    %85 = vector.shape_cast %84 : vector<1x1x128xf32> to vector<1x128xf32>
    %86 = vector.shape_cast %83 : vector<1x128xf32> to vector<1x1x128xf32>
    tpu.vector_store %arg4[%c0_55, %c0_56, %c0_57], %86 {strides = array<i32>} : memref<1x2x128xf32, #tpu.memory_space<vmem>>, vector<1x1x128xf32>,
    %87 = arith.mulf %77, %77 : vector<286x128xf32>
    %cst_58 = arith.constant dense<0.000000e+00> : vector<128xf32>
    %88 = vector.multi_reduction <add>, %87, %cst_58 [0] : vector<286x128xf32> to vector<128xf32>
    %89 = vector.shape_cast %88 : vector<128xf32> to vector<1x128xf32>
    %c0_59 = arith.constant 0 : index
    %c1_60 = arith.constant 1 : index
    %c0_61 = arith.constant 0 : index
    %90 = vector.load %arg4[%c0_59, %c1_60, %c0_61] : memref<1x2x128xf32, #tpu.memory_space<vmem>>, vector<1x1x128xf32>
    %91 = vector.shape_cast %90 : vector<1x1x128xf32> to vector<1x128xf32>
    %92 = vector.shape_cast %89 : vector<1x128xf32> to vector<1x1x128xf32>
    tpu.vector_store %arg4[%c0_59, %c1_60, %c0_61], %92 {strides = array<i32>} : memref<1x2x128xf32, #tpu.memory_space<vmem>>, vector<1x1x128xf32>,
    return
  }
  func.func @transform_0(%arg0: i32) -> (i32, i32, i32) {
    %c0_i32 = arith.constant 0 : i32
    %c0_i32_0 = arith.constant 0 : i32
    %c0_i32_1 = arith.constant 0 : i32
    return %arg0, %c0_i32, %c0_i32_0 : i32, i32, i32
  }
  func.func @transform_1(%arg0: i32) -> (i32, i32, i32) {
    %c0_i32 = arith.constant 0 : i32
    %c0_i32_0 = arith.constant 0 : i32
    %c0_i32_1 = arith.constant 0 : i32
    %c0_i32_2 = arith.constant 0 : i32
    return %c0_i32, %c0_i32_0, %c0_i32_1 : i32, i32, i32
  }
  func.func @transform_2(%arg0: i32) -> (i32, i32, i32) {
    %c0_i32 = arith.constant 0 : i32
    %c0_i32_0 = arith.constant 0 : i32
    %c0_i32_1 = arith.constant 0 : i32
    return %arg0, %c0_i32, %c0_i32_0 : i32, i32, i32
  }
  func.func @transform_3(%arg0: i32) -> (i32, i32, i32) {
    %c0_i32 = arith.constant 0 : i32
    %c0_i32_0 = arith.constant 0 : i32
    %c0_i32_1 = arith.constant 0 : i32
    return %arg0, %c0_i32, %c0_i32_0 : i32, i32, i32
  }
}

module attributes {stable_mosaic.version = 11 : i64} {
  func.func @_final_kernel(%arg0: i32, %arg1: memref<128x128xbf16, #tpu.memory_space<vmem>>, %arg2: memref<1x128xf32, #tpu.memory_space<vmem>>, %arg3: memref<1x128xf32, #tpu.memory_space<vmem>>, %arg4: memref<128x128xbf16, #tpu.memory_space<vmem>>, %arg5: memref<1x128xf32, #tpu.memory_space<vmem>>, %arg6: memref<1x128xf32, #tpu.memory_space<vmem>>, %arg7: memref<128x128xf32, #tpu.memory_space<vmem>>) attributes {dimension_semantics = [#tpu.dimension_semantics<parallel>], iteration_bounds = array<i64: 4>, scalar_prefetch = 0 : i64, scratch_operands = 0 : i64, tpu.core_type = #tpu.core_type<tc>, window_params = [{transform_indices = @transform_0, window_bounds = array<i64: 128, 128>}, {pipeline_mode = #tpu.pipeline_mode<synchronous>, transform_indices = @transform_1, window_bounds = array<i64: 1, 128>}, {pipeline_mode = #tpu.pipeline_mode<synchronous>, transform_indices = @transform_2, window_bounds = array<i64: 1, 128>}, {transform_indices = @transform_3, window_bounds = array<i64: 128, 128>}, {pipeline_mode = #tpu.pipeline_mode<synchronous>, transform_indices = @transform_4, window_bounds = array<i64: 1, 128>}, {pipeline_mode = #tpu.pipeline_mode<synchronous>, transform_indices = @transform_5, window_bounds = array<i64: 1, 128>}, {transform_indices = @transform_6, window_bounds = array<i64: 128, 128>}]} {
    %c0 = arith.constant 0 : index
    %c0_0 = arith.constant 0 : index
    %0 = vector.load %arg4[%c0, %c0_0] : memref<128x128xbf16, #tpu.memory_space<vmem>>, vector<128x128xbf16>
    %1 = arith.extf %0 : vector<128x128xbf16> to vector<128x128xf32>
    %c0_1 = arith.constant 0 : index
    %c0_2 = arith.constant 0 : index
    %2 = vector.load %arg5[%c0_1, %c0_2] : memref<1x128xf32, #tpu.memory_space<vmem>>, vector<1x128xf32>
    %3 = vector.broadcast %2 : vector<1x128xf32> to vector<128x128xf32>
    %4 = arith.mulf %1, %3 : vector<128x128xf32>
    %c0_3 = arith.constant 0 : index
    %c0_4 = arith.constant 0 : index
    %5 = vector.load %arg6[%c0_3, %c0_4] : memref<1x128xf32, #tpu.memory_space<vmem>>, vector<1x128xf32>
    %6 = vector.broadcast %5 : vector<1x128xf32> to vector<128x128xf32>
    %7 = arith.addf %4, %6 : vector<128x128xf32>
    %c0_5 = arith.constant 0 : index
    %c0_6 = arith.constant 0 : index
    %8 = vector.load %arg1[%c0_5, %c0_6] : memref<128x128xbf16, #tpu.memory_space<vmem>>, vector<128x128xbf16>
    %9 = arith.extf %8 : vector<128x128xbf16> to vector<128x128xf32>
    %c0_7 = arith.constant 0 : index
    %c0_8 = arith.constant 0 : index
    %10 = vector.load %arg2[%c0_7, %c0_8] : memref<1x128xf32, #tpu.memory_space<vmem>>, vector<1x128xf32>
    %11 = vector.broadcast %10 : vector<1x128xf32> to vector<128x128xf32>
    %12 = arith.mulf %9, %11 : vector<128x128xf32>
    %c0_9 = arith.constant 0 : index
    %c0_10 = arith.constant 0 : index
    %13 = vector.load %arg3[%c0_9, %c0_10] : memref<1x128xf32, #tpu.memory_space<vmem>>, vector<1x128xf32>
    %14 = vector.broadcast %13 : vector<1x128xf32> to vector<128x128xf32>
    %15 = arith.addf %12, %14 : vector<128x128xf32>
    %16 = arith.addf %15, %7 : vector<128x128xf32>
    %cst = arith.constant 0.000000e+00 : f32
    %17 = vector.broadcast %cst : f32 to vector<128x128xf32>
    %18 = arith.maximumf %16, %17 : vector<128x128xf32>
    %c0_11 = arith.constant 0 : index
    %c0_12 = arith.constant 0 : index
    %19 = vector.load %arg7[%c0_11, %c0_12] : memref<128x128xf32, #tpu.memory_space<vmem>>, vector<128x128xf32>
    tpu.vector_store %arg7[%c0_11, %c0_12], %18 {strides = array<i32>} : memref<128x128xf32, #tpu.memory_space<vmem>>, vector<128x128xf32>,
    return
  }
  func.func @transform_0(%arg0: i32) -> (i32, i32) {
    %c0_i32 = arith.constant 0 : i32
    %c0_i32_0 = arith.constant 0 : i32
    return %arg0, %c0_i32 : i32, i32
  }
  func.func @transform_1(%arg0: i32) -> (i32, i32) {
    %c0_i32 = arith.constant 0 : i32
    %c0_i32_0 = arith.constant 0 : i32
    %c0_i32_1 = arith.constant 0 : i32
    return %c0_i32, %c0_i32_0 : i32, i32
  }
  func.func @transform_2(%arg0: i32) -> (i32, i32) {
    %c0_i32 = arith.constant 0 : i32
    %c0_i32_0 = arith.constant 0 : i32
    %c0_i32_1 = arith.constant 0 : i32
    return %c0_i32, %c0_i32_0 : i32, i32
  }
  func.func @transform_3(%arg0: i32) -> (i32, i32) {
    %c0_i32 = arith.constant 0 : i32
    %c0_i32_0 = arith.constant 0 : i32
    return %arg0, %c0_i32 : i32, i32
  }
  func.func @transform_4(%arg0: i32) -> (i32, i32) {
    %c0_i32 = arith.constant 0 : i32
    %c0_i32_0 = arith.constant 0 : i32
    %c0_i32_1 = arith.constant 0 : i32
    return %c0_i32, %c0_i32_0 : i32, i32
  }
  func.func @transform_5(%arg0: i32) -> (i32, i32) {
    %c0_i32 = arith.constant 0 : i32
    %c0_i32_0 = arith.constant 0 : i32
    %c0_i32_1 = arith.constant 0 : i32
    return %c0_i32, %c0_i32_0 : i32, i32
  }
  func.func @transform_6(%arg0: i32) -> (i32, i32) {
    %c0_i32 = arith.constant 0 : i32
    %c0_i32_0 = arith.constant 0 : i32
    return %arg0, %c0_i32 : i32, i32
  }
}

module attributes {stable_mosaic.version = 11 : i64} {
  func.func @_bn_relu_matmul_stats_kernel(%arg0: i32, %arg1: memref<128x128xbf16, #tpu.memory_space<vmem>>, %arg2: memref<1x128xf32, #tpu.memory_space<vmem>>, %arg3: memref<1x128xf32, #tpu.memory_space<vmem>>, %arg4: memref<128x128xbf16, #tpu.memory_space<vmem>>, %arg5: memref<128x128xbf16, #tpu.memory_space<vmem>>, %arg6: memref<1x2x128xf32, #tpu.memory_space<vmem>>) attributes {dimension_semantics = [#tpu.dimension_semantics<parallel>], iteration_bounds = array<i64: 4>, scalar_prefetch = 0 : i64, scratch_operands = 0 : i64, tpu.core_type = #tpu.core_type<tc>, window_params = [{transform_indices = @transform_0, window_bounds = array<i64: 128, 128>}, {pipeline_mode = #tpu.pipeline_mode<synchronous>, transform_indices = @transform_1, window_bounds = array<i64: 1, 128>}, {pipeline_mode = #tpu.pipeline_mode<synchronous>, transform_indices = @transform_2, window_bounds = array<i64: 1, 128>}, {pipeline_mode = #tpu.pipeline_mode<synchronous>, transform_indices = @transform_3, window_bounds = array<i64: 128, 128>}, {transform_indices = @transform_4, window_bounds = array<i64: 128, 128>}, {transform_indices = @transform_5, window_bounds = array<i64: 1, 2, 128>}]} {
    %c0 = arith.constant 0 : index
    %c0_0 = arith.constant 0 : index
    %0 = vector.load %arg1[%c0, %c0_0] : memref<128x128xbf16, #tpu.memory_space<vmem>>, vector<128x128xbf16>
    %1 = arith.extf %0 : vector<128x128xbf16> to vector<128x128xf32>
    %c0_1 = arith.constant 0 : index
    %c0_2 = arith.constant 0 : index
    %2 = vector.load %arg2[%c0_1, %c0_2] : memref<1x128xf32, #tpu.memory_space<vmem>>, vector<1x128xf32>
    %3 = vector.broadcast %2 : vector<1x128xf32> to vector<128x128xf32>
    %4 = arith.mulf %1, %3 : vector<128x128xf32>
    %c0_3 = arith.constant 0 : index
    %c0_4 = arith.constant 0 : index
    %5 = vector.load %arg3[%c0_3, %c0_4] : memref<1x128xf32, #tpu.memory_space<vmem>>, vector<1x128xf32>
    %6 = vector.broadcast %5 : vector<1x128xf32> to vector<128x128xf32>
    %7 = arith.addf %4, %6 : vector<128x128xf32>
    %cst = arith.constant 0.000000e+00 : f32
    %8 = vector.broadcast %cst : f32 to vector<128x128xf32>
    %9 = arith.maximumf %7, %8 : vector<128x128xf32>
    %10 = arith.truncf %9 : vector<128x128xf32> to vector<128x128xbf16>
    %c0_5 = arith.constant 0 : index
    %c0_6 = arith.constant 0 : index
    %11 = vector.load %arg4[%c0_5, %c0_6] : memref<128x128xbf16, #tpu.memory_space<vmem>>, vector<128x128xbf16>
    %cst_7 = arith.constant dense<0.000000e+00> : vector<128x128xf32>
    %12 = tpu.matmul %10, %11, %cst_7 {dimension_numbers = #tpu.dot_dimension_numbers<[1], [0], [0], [1], [0, 0, 1, 1], [], []>} : vector<128x128xbf16>, vector<128x128xbf16>, vector<128x128xf32> -> vector<128x128xf32>
    %13 = arith.truncf %12 : vector<128x128xf32> to vector<128x128xbf16>
    %c0_8 = arith.constant 0 : index
    %c0_9 = arith.constant 0 : index
    %14 = vector.load %arg5[%c0_8, %c0_9] : memref<128x128xbf16, #tpu.memory_space<vmem>>, vector<128x128xbf16>
    tpu.vector_store %arg5[%c0_8, %c0_9], %13 {strides = array<i32>} : memref<128x128xbf16, #tpu.memory_space<vmem>>, vector<128x128xbf16>,
    %cst_10 = arith.constant dense<0.000000e+00> : vector<128xf32>
    %15 = vector.multi_reduction <add>, %12, %cst_10 [0] : vector<128x128xf32> to vector<128xf32>
    %16 = vector.shape_cast %15 : vector<128xf32> to vector<1x128xf32>
    %c0_11 = arith.constant 0 : index
    %c0_12 = arith.constant 0 : index
    %c0_13 = arith.constant 0 : index
    %17 = vector.load %arg6[%c0_11, %c0_12, %c0_13] : memref<1x2x128xf32, #tpu.memory_space<vmem>>, vector<1x1x128xf32>
    %18 = vector.shape_cast %17 : vector<1x1x128xf32> to vector<1x128xf32>
    %19 = vector.shape_cast %16 : vector<1x128xf32> to vector<1x1x128xf32>
    tpu.vector_store %arg6[%c0_11, %c0_12, %c0_13], %19 {strides = array<i32>} : memref<1x2x128xf32, #tpu.memory_space<vmem>>, vector<1x1x128xf32>,
    %20 = arith.mulf %12, %12 : vector<128x128xf32>
    %cst_14 = arith.constant dense<0.000000e+00> : vector<128xf32>
    %21 = vector.multi_reduction <add>, %20, %cst_14 [0] : vector<128x128xf32> to vector<128xf32>
    %22 = vector.shape_cast %21 : vector<128xf32> to vector<1x128xf32>
    %c0_15 = arith.constant 0 : index
    %c1 = arith.constant 1 : index
    %c0_16 = arith.constant 0 : index
    %23 = vector.load %arg6[%c0_15, %c1, %c0_16] : memref<1x2x128xf32, #tpu.memory_space<vmem>>, vector<1x1x128xf32>
    %24 = vector.shape_cast %23 : vector<1x1x128xf32> to vector<1x128xf32>
    %25 = vector.shape_cast %22 : vector<1x128xf32> to vector<1x1x128xf32>
    tpu.vector_store %arg6[%c0_15, %c1, %c0_16], %25 {strides = array<i32>} : memref<1x2x128xf32, #tpu.memory_space<vmem>>, vector<1x1x128xf32>,
    return
  }
  func.func @transform_0(%arg0: i32) -> (i32, i32) {
    %c0_i32 = arith.constant 0 : i32
    %c0_i32_0 = arith.constant 0 : i32
    return %arg0, %c0_i32 : i32, i32
  }
  func.func @transform_1(%arg0: i32) -> (i32, i32) {
    %c0_i32 = arith.constant 0 : i32
    %c0_i32_0 = arith.constant 0 : i32
    %c0_i32_1 = arith.constant 0 : i32
    return %c0_i32, %c0_i32_0 : i32, i32
  }
  func.func @transform_2(%arg0: i32) -> (i32, i32) {
    %c0_i32 = arith.constant 0 : i32
    %c0_i32_0 = arith.constant 0 : i32
    %c0_i32_1 = arith.constant 0 : i32
    return %c0_i32, %c0_i32_0 : i32, i32
  }
  func.func @transform_3(%arg0: i32) -> (i32, i32) {
    %c0_i32 = arith.constant 0 : i32
    %c0_i32_0 = arith.constant 0 : i32
    %c0_i32_1 = arith.constant 0 : i32
    return %c0_i32, %c0_i32_0 : i32, i32
  }
  func.func @transform_4(%arg0: i32) -> (i32, i32) {
    %c0_i32 = arith.constant 0 : i32
    %c0_i32_0 = arith.constant 0 : i32
    return %arg0, %c0_i32 : i32, i32
  }
  func.func @transform_5(%arg0: i32) -> (i32, i32, i32) {
    %c0_i32 = arith.constant 0 : i32
    %c0_i32_0 = arith.constant 0 : i32
    %c0_i32_1 = arith.constant 0 : i32
    return %arg0, %c0_i32, %c0_i32_0 : i32, i32, i32
  }
}

</mosaic_0001>

<bundles_post_ra>
// kernel: bottleneck_forward.8
= control target key start
LH: loop header
LB: loop body
LE: loop exit
PB: predicated region body
PF: predicated region fallthrough
CT: control target
= control target key end

     0   :  { %s740_s12 = smov 0   ;;  %s812_s0 = inlined_call_operand.vmem [shape: bf16[512,128], index: 0, kind: input, shape index: {}]   ;;  %s813_s1 = inlined_call_operand.vmem [shape: bf16[128,128], index: 1, kind: input, shape index: {}]   ;;  %s814_s2 = inlined_call_operand.vmem [shape: bf16[512,128], index: 2, kind: output, shape index: {0}]   ;;  %s815_s3 = inlined_call_operand.vmem [shape: f32[4,2,128], index: 3, kind: output, shape index: {1}]  }
   0x1 LB: > { %s746_s13 = sadd.s32 4294967295, %s718_s12   ;;  %p545_p0 = scmp.ge.s32.totalorder %s718_s12, 1  ;;  %s718_s12 = sphi %s740_s12, %s14_s12  }
   0x2   : > { %p141_p1 = scmp.lt.s32.totalorder %s718_s12, 5 }
   0x4   : > { %p142_p2 = pnand %p545_p0, %p141_p1 }
   0x5   : > { %s546_s22 = sshll.u32 (!%p142_p2), %s746_s13, 4  ;;  %p181_p4 = scmp.lt.s32.totalorder (!%p142_p2), %s746_s13, 3 }
   0x6   : > { %145 = sbr.rel (%p142_p2) target bundleno = 234 (0xea), region = 28  ;;  %p170_p3 = scmp.lt.s32.totalorder (!%p142_p2), %s546_s22, 63 }
   0xb   : > { %v632_v0 = vld [vmem:[%s813_s1 + $0x38] sm:$0xff]  ;;  %v631_v1 = vld [vmem:[%s813_s1 + $0x30] sm:$0xff]  ;;  %v630_v2 = vld [vmem:[%s813_s1 + $0x28] sm:$0xff]  ;;  %s817_s22 = smov (!%p170_p3, %s546_s22), 63  ;;  %s819_s13 = smov (!%p181_p4, %s746_s13), 3 }
   0xc   : > { %313 = vmatpush.bf16.msra.mxu0 %v632_v0  ;;  %680 = vmatpush.bf16.msra.mxu1 %v632_v0  ;;  %v629_v3 = vld [vmem:[%s813_s1 + $0x20] sm:$0xff]  ;;  %v628_v4 = vld [vmem:[%s813_s1 + $0x18] sm:$0xff]  ;;  %v627_v5 = vld [vmem:[%s813_s1 + $0x10] sm:$0xff]  ;;  %s547_s29 = sshll.u32 %s817_s22, 2  ;;  %s550_s11 = sshll.u32 %s819_s13, 1 }
   0xd   : > { %681 = vmatpush.bf16.msra.mxu2 %v632_v0  ;;  %682 = vmatpush.bf16.msra.mxu3 %v632_v0  ;;  %v626_v6 = vld [vmem:[%s813_s1 + $0x8] sm:$0xff]  ;;  %v625_v7 = vld [vmem:[%s813_s1] sm:$0xff]  ;;  %s173_s7 = scalar_lea.vmem %s812_s0, %s547_s29  ;;  %s790_s10 = scalar_lea.vmem %s814_s2, %s547_s29 }
   0xe   : > { %v617_v8 = vld [vmem:[%s173_s7] sm:$0xff]  ;;  %v619_v9 = vld [vmem:[%s173_s7 + $0x10] sm:$0xff]  ;;  %v618_v12 = vld [vmem:[%s173_s7 + $0x8] sm:$0xff]  ;;  %s184_s16 = scalar_lea.vmem %s815_s3, %s550_s11 }
   0xf   : > { %v621_v10 = vld [vmem:[%s173_s7 + $0x20] sm:$0xff]  ;;  %v623_v11 = vld [vmem:[%s173_s7 + $0x30] sm:$0xff]  ;;  %v620_v13 = vld [vmem:[%s173_s7 + $0x18] sm:$0xff] }
  0x10   : > { %314 = vmatpush.bf16.msra.mxu0 %v631_v1  ;;  %683 = vmatpush.bf16.msra.mxu1 %v631_v1  ;;  %v622_v14 = vld [vmem:[%s173_s7 + $0x28] sm:$0xff]  ;;  %v624_v15 = vld [vmem:[%s173_s7 + $0x38] sm:$0xff] }
  0x11   : > { %684 = vmatpush.bf16.msra.mxu2 %v631_v1  ;;  %685 = vmatpush.bf16.msra.mxu3 %v631_v1 }
  0x14   : > { %315 = vmatpush.bf16.msra.mxu0 %v630_v2  ;;  %686 = vmatpush.bf16.msra.mxu1 %v630_v2 }
  0x15   : > { %687 = vmatpush.bf16.msra.mxu2 %v630_v2  ;;  %688 = vmatpush.bf16.msra.mxu3 %v630_v2 }
  0x18   : > { %316 = vmatpush.bf16.msra.mxu0 %v629_v3  ;;  %689 = vmatpush.bf16.msra.mxu1 %v629_v3 }
  0x19   : > { %690 = vmatpush.bf16.msra.mxu2 %v629_v3  ;;  %691 = vmatpush.bf16.msra.mxu3 %v629_v3 }
  0x1c   : > { %317 = vmatpush.bf16.msra.mxu0 %v628_v4  ;;  %692 = vmatpush.bf16.msra.mxu1 %v628_v4 }
  0x1d   : > { %693 = vmatpush.bf16.msra.mxu2 %v628_v4  ;;  %694 = vmatpush.bf16.msra.mxu3 %v628_v4 }
  0x20   : > { %318 = vmatpush.bf16.msra.mxu0 %v627_v5  ;;  %695 = vmatpush.bf16.msra.mxu1 %v627_v5 }
  0x21   : > { %696 = vmatpush.bf16.msra.mxu2 %v627_v5  ;;  %697 = vmatpush.bf16.msra.mxu3 %v627_v5 }
  0x24   : > { %319 = vmatpush.bf16.msra.mxu0 %v626_v6  ;;  %698 = vmatpush.bf16.msra.mxu1 %v626_v6 }
  0x25   : > { %699 = vmatpush.bf16.msra.mxu2 %v626_v6  ;;  %700 = vmatpush.bf16.msra.mxu3 %v626_v6 }
  0x28   : > { %320 = vmatpush.bf16.msra.mxu0 %v625_v7  ;;  %701 = vmatpush.bf16.msra.mxu1 %v625_v7 }
  0x29   : > { %702 = vmatpush.bf16.msra.mxu2 %v625_v7  ;;  %703 = vmatpush.bf16.msra.mxu3 %v625_v7 }
  0x2b   : > { %321 = vmatmul.bf16.vlgmr.msra.gmra.mxu0 %v617_v8  ;;  %331 = vmatmul.bf16.vlgmr.msra.gmra.mxu1 %v619_v9 }
  0x2c   : > { %341 = vmatmul.bf16.vlgmr.msra.gmra.mxu2 %v621_v10  ;;  %351 = vmatmul.bf16.vlgmr.msra.gmra.mxu3 %v623_v11 }
  0x3b   : > { %326 = vmatmul.bf16.gmra.mxu0 %v618_v12  ;;  %336 = vmatmul.bf16.gmra.mxu1 %v620_v13 }
  0x3c   : > { %346 = vmatmul.bf16.gmra.mxu2 %v622_v14  ;;  %356 = vmatmul.bf16.gmra.mxu3 %v624_v15 }
  0xa8   : > { %v322_v16 = vpop.f32.mrf.mxu0  ;;  %v332_v17 = vpop.f32.mrf.mxu1 }
  0xa9   : > { %v416_v31 = vmul.f32 %v322_v16, %v322_v16  ;;  %v420_v45 = vmul.f32 %v332_v17, %v332_v17 }
  0xaf   : > { %v342_v18 = vpop.f32.mrf.mxu2  ;;  %v783_v19 = vpop.f32.mrf.mxu3 }
  0xb0   : > { %v324_v20 = vpop.f32.mrf.mxu0  ;;  %v334_v21 = vpop.f32.mrf.mxu1  ;;  %v424_v61 = vmul.f32 %v342_v18, %v342_v18  ;;  %v428_v9 = vmul.f32 %v783_v19, %v783_v19 }
  0xb1   : > { %v636_v22 = vpack.c.bf16 %v324_v20, %v322_v16  ;;  %v646_v23 = vpack.c.bf16 %v334_v21, %v332_v17  ;;  %v417_v30 = vmul.f32 %v324_v20, %v324_v20  ;;  %v394_v33 = vadd.f32 %v324_v20, %v322_v16 }
  0xb2   : > { %v421_v48 = vmul.f32 %v334_v21, %v334_v21 }
  0xb3   : > { %637 = vst [vmem:[%s790_s10] sm:$0xff] %v636_v22   ;;  %v432_v34 = vadd.f32 %v417_v30, %v416_v31 }
  0xb4   : > { %674 = vst [vmem:[%s790_s10 + $0x10] sm:$0xff] %v646_v23  }
  0xb7   : > { %v344_v24 = vpop.f32.mrf.mxu2  ;;  %v354_v25 = vpop.f32.mrf.mxu3 }
  0xb8   : > { %v327_v26 = vpop.f32.mrf.mxu0  ;;  %v337_v27 = vpop.f32.mrf.mxu1  ;;  %v656_v28 = vpack.c.bf16 %v344_v24, %v342_v18  ;;  %v666_v29 = vpack.c.bf16 %v354_v25, %v783_v19  ;;  %v425_v0 = vmul.f32 %v344_v24, %v344_v24  ;;  %v429_v12 = vmul.f32 %v354_v25, %v354_v25 }
  0xb9   : > { %v418_v32 = vmul.f32 %v327_v26, %v327_v26  ;;  %v395_v35 = vadd.f32 %v394_v33, %v327_v26  ;;  %v422_v51 = vmul.f32 %v337_v27, %v337_v27 }
  0xba   : > { %676 = vst [vmem:[%s790_s10 + $0x20] sm:$0xff] %v656_v28  }
  0xbb   : > { %678 = vst [vmem:[%s790_s10 + $0x30] sm:$0xff] %v666_v29   ;;  %v433_v38 = vadd.f32 %v432_v34, %v418_v32 }
  0xbf   : > { %v347_v36 = vpop.f32.mrf.mxu2  ;;  %v357_v37 = vpop.f32.mrf.mxu3 }
  0xc0   : > { %v329_v39 = vpop.f32.mrf.mxu0  ;;  %v339_v40 = vpop.f32.mrf.mxu1  ;;  %v426_v4 = vmul.f32 %v347_v36, %v347_v36  ;;  %v430_v16 = vmul.f32 %v357_v37, %v357_v37 }
  0xc1   : > { %v641_v41 = vpack.c.bf16 %v329_v39, %v327_v26  ;;  %v396_v42 = vadd.f32 %v395_v35, %v329_v39  ;;  %v419_v43 = vmul.f32 %v329_v39, %v329_v39  ;;  %v651_v44 = vpack.c.bf16 %v339_v40, %v337_v27 }
  0xc2   : > { %v423_v59 = vmul.f32 %v339_v40, %v339_v40 }
  0xc3   : > { %673 = vst [vmem:[%s790_s10 + $0x8] sm:$0xff] %v641_v41   ;;  %v397_v46 = vadd.f32 %v396_v42, %v332_v17  ;;  %v434_v47 = vadd.f32 %v433_v38, %v419_v43 }
  0xc4   : > { %675 = vst [vmem:[%s790_s10 + $0x18] sm:$0xff] %v651_v44  }
  0xc5   : > { %v435_v49 = vadd.f32 %v434_v47, %v420_v45  ;;  %v398_v50 = vadd.f32 %v397_v46, %v334_v21 }
  0xc7   : > { %v399_v52 = vadd.f32 %v398_v50, %v337_v27  ;;  %v436_v53 = vadd.f32 %v435_v49, %v421_v48  ;;  %v349_v54 = vpop.f32.mrf.mxu2  ;;  %v359_v55 = vpop.f32.mrf.mxu3 }
  0xc8   : > { %v661_v56 = vpack.c.bf16 %v349_v54, %v347_v36  ;;  %v671_v57 = vpack.c.bf16 %v359_v55, %v357_v37  ;;  %v427_v8 = vmul.f32 %v349_v54, %v349_v54  ;;  %v431_v21 = vmul.f32 %v359_v55, %v359_v55 }
  0xc9   : > { %v400_v58 = vadd.f32 %v399_v52, %v339_v40  ;;  %v437_v60 = vadd.f32 %v436_v53, %v422_v51 }
  0xca   : > { %677 = vst [vmem:[%s790_s10 + $0x28] sm:$0xff] %v661_v56  }
  0xcb   : > { %v401_v62 = vadd.f32 %v400_v58, %v342_v18  ;;  %v438_v63 = vadd.f32 %v437_v60, %v423_v59  ;;  %679 = vst [vmem:[%s790_s10 + $0x38] sm:$0xff] %v671_v57  }
  0xcd   : > { %v439_v1 = vadd.f32 %v438_v63, %v424_v61  ;;  %v402_v2 = vadd.f32 %v401_v62, %v344_v24 }
  0xcf   : > { %v403_v3 = vadd.f32 %v402_v2, %v347_v36  ;;  %v440_v5 = vadd.f32 %v439_v1, %v425_v0 }
  0xd1   : > { %v441_v6 = vadd.f32 %v440_v5, %v426_v4  ;;  %v404_v7 = vadd.f32 %v403_v3, %v349_v54 }
  0xd3   : > { %v405_v10 = vadd.f32 %v404_v7, %v783_v19  ;;  %v442_v11 = vadd.f32 %v441_v6, %v427_v8 }
  0xd5   : > { %v443_v13 = vadd.f32 %v442_v11, %v428_v9  ;;  %v406_v14 = vadd.f32 %v405_v10, %v354_v25 }
  0xd7   : > { %v407_v15 = vadd.f32 %v406_v14, %v357_v37  ;;  %v444_v17 = vadd.f32 %v443_v13, %v429_v12 }
  0xd9   : > { %v445_v18 = vadd.f32 %v444_v17, %v430_v16  ;;  %v408_v20 = vadd.f32 %v407_v15, %v359_v55 }
  0xdb   : > { %v409_v22 = vrot.slane %v408_v20, 4  ;;  %v446_v23 = vadd.f32 %v445_v18, %v431_v21 }
  0xdd   : > { %v410_v24 = vadd.f32 %v409_v22, %v408_v20  ;;  %v447_v26 = vrot.slane %v446_v23, 4 }
  0xdf   : > { %v411_v27 = vrot.slane %v410_v24, 2  ;;  %v448_v28 = vadd.f32 %v447_v26, %v446_v23 }
  0xe1   : > { %v412_v19 = vadd.f32 %v411_v27, %v410_v24  ;;  %v449_v29 = vrot.slane %v448_v28, 2 }
  0xe3   : > { %v413_v30 = vrot.slane %v412_v19, 1  ;;  %v450_v31 = vadd.f32 %v449_v29, %v448_v28 }
  0xe5   : > { %v414_v25 = vadd.f32 %v413_v30, %v412_v19  ;;  %v451_v32 = vrot.slane %v450_v31, 1 }
  0xe7   : > { %415 = vst [vmem:[%s184_s16] sm:$0x1] %v414_v25  ;;  %v452_v33 = vadd.f32 %v451_v32, %v450_v31 }
  0xe9   : > { %453 = vst [vmem:[%s184_s16 + $0x1] sm:$0x1] %v452_v33 }
  0xea PF: > { %s14_s12 = sadd.s32 1, %s718_s12  }
  0xeb   : > { %p11_p5 = scmp.ge.s32.totalorder %s14_s12, 6  }
  0xed   :  { %13 = sbr.rel (!%p11_p5) target bundleno = 1 (0x1), region = 70 }

// kernel: bottleneck_forward.9
= control target key start
LH: loop header
LB: loop body
LE: loop exit
PB: predicated region body
PF: predicated region fallthrough
CT: control target
= control target key end

     0   :  { %s683_s21 = smov 0   ;;  %s829_s0 = inlined_call_operand.vmem [shape: bf16[512,128], index: 0, kind: input, shape index: {}]   ;;  %s830_s1 = inlined_call_operand.vmem [shape: f32[1,128], index: 1, kind: input, shape index: {}]   ;;  %s831_s2 = inlined_call_operand.vmem [shape: f32[1,128], index: 2, kind: input, shape index: {}]   ;;  %s832_s3 = inlined_call_operand.vmem [shape: bf16[512,128], index: 3, kind: input, shape index: {}]   ;;  %s833_s4 = inlined_call_operand.vmem [shape: f32[1,128], index: 4, kind: input, shape index: {}]   ;;  %s834_s5 = inlined_call_operand.vmem [shape: f32[1,128], index: 5, kind: input, shape index: {}]   ;;  %s835_s6 = inlined_call_operand.vmem [shape: f32[512,128], index: 6, kind: output, shape index: {}]  }
   0x1 LB: > { %s537_s22 = sadd.s32 4294967295, %s646_s21   ;;  %p541_p0 = scmp.ge.s32.totalorder %s646_s21, 1  ;;  %s646_s21 = sphi %s683_s21, %s16_s21  }
   0x2   : > { %p224_p1 = scmp.lt.s32.totalorder %s646_s21, 5 }
   0x4   : > { %p225_p2 = pnand %p541_p0, %p224_p1 }
   0x5   : > { %s542_s23 = sshll.u32 (!%p225_p2), %s537_s22, 4 }
   0x6   : > { %228 = sbr.rel (%p225_p2) target bundleno = 53 (0x35), region = 44  ;;  %p260_p3 = scmp.lt.s32.totalorder (!%p225_p2), %s542_s23, 63 }
   0xb   : > { %s837_s23 = smov (!%p260_p3, %s542_s23), 63  ;;  %v707_v0 = vld [vmem:[%s833_s4] ss:$0 sm:$0xff] }
   0xc   : > { %s543_s24 = sshll.u32 %s837_s23, 2  ;;  %v712_v1 = vld [vmem:[%s830_s1] ss:$0 sm:$0xff]  ;;  %s547_s15 = sshll.u32 %s837_s23, 3 }
   0xd   : > { %s697_s27 = scalar_lea.vmem %s829_s0, %s543_s24  ;;  %s702_s30 = scalar_lea.vmem %s832_s3, %s543_s24  ;;  %v720_v6 = vld [vmem:[%s834_s5] ss:$0 sm:$0xff] }
   0xe   : > { %v551_v2 = vld [vmem:[%s702_s30] sm:$0xff]   ;;  %v614_v4 = vld [vmem:[%s702_s30 + $0x8] sm:$0xff]   ;;  %v615_v24 = vld [vmem:[%s702_s30 + $0x10] sm:$0xff]   ;;  %s750_s18 = scalar_lea.vmem %s835_s6, %s547_s15 }
   0xf   : > { %v583_v3 = vld [vmem:[%s697_s27] sm:$0xff]   ;;  %v552_v5 = vunpack.c.l.bf16 %v551_v2  ;;  %v553_v9 = vunpack.c.h.bf16 %v551_v2  ;;  %v621_v11 = vld [vmem:[%s697_s27 + $0x8] sm:$0xff]   ;;  %v556_v12 = vunpack.c.l.bf16 %v614_v4  ;;  %v557_v14 = vunpack.c.h.bf16 %v614_v4  ;;  %v622_v25 = vld [vmem:[%s697_s27 + $0x10] sm:$0xff]  }
  0x10   : > { %v584_v7 = vunpack.c.l.bf16 %v583_v3  ;;  %v725_v8 = vld [vmem:[%s831_s2] ss:$0 sm:$0xff]  ;;  %v585_v10 = vunpack.c.h.bf16 %v583_v3  ;;  %v588_v13 = vunpack.c.l.bf16 %v621_v11  ;;  %v589_v15 = vunpack.c.h.bf16 %v621_v11  ;;  %v616_v42 = vld [vmem:[%s702_s30 + $0x18] sm:$0xff]  }
  0x11   : > { %v313_v16 = vmul.f32 %v707_v0, %v552_v5  ;;  %v314_v18 = vmul.f32 %v707_v0, %v553_v9  ;;  %v315_v20 = vmul.f32 %v707_v0, %v556_v12  ;;  %v316_v22 = vmul.f32 %v707_v0, %v557_v14  ;;  %v623_v43 = vld [vmem:[%s697_s27 + $0x18] sm:$0xff]   ;;  %v617_v52 = vld [vmem:[%s702_s30 + $0x20] sm:$0xff]   ;;  %v618_v14 = vld [vmem:[%s702_s30 + $0x28] sm:$0xff]  }
  0x12   : > { %v385_v17 = vmul.f32 %v712_v1, %v584_v7  ;;  %v386_v19 = vmul.f32 %v712_v1, %v585_v10  ;;  %v387_v21 = vmul.f32 %v712_v1, %v588_v13  ;;  %v388_v23 = vmul.f32 %v712_v1, %v589_v15  ;;  %v624_v57 = vld [vmem:[%s697_s27 + $0x20] sm:$0xff]   ;;  %v625_v15 = vld [vmem:[%s697_s27 + $0x28] sm:$0xff]  }
  0x13   : > { %v333_v26 = vadd.f32 %v720_v6, %v313_v16  ;;  %v334_v28 = vadd.f32 %v720_v6, %v314_v18  ;;  %v335_v30 = vadd.f32 %v720_v6, %v315_v20  ;;  %v336_v32 = vadd.f32 %v720_v6, %v316_v22 }
  0x14   : > { %v405_v27 = vadd.f32 %v725_v8, %v385_v17  ;;  %v406_v29 = vadd.f32 %v725_v8, %v386_v19  ;;  %v407_v31 = vadd.f32 %v725_v8, %v387_v21  ;;  %v408_v33 = vadd.f32 %v725_v8, %v388_v23 }
  0x15   : > { %v560_v36 = vunpack.c.l.bf16 %v615_v24  ;;  %v592_v37 = vunpack.c.l.bf16 %v622_v25  ;;  %v561_v40 = vunpack.c.h.bf16 %v615_v24  ;;  %v593_v41 = vunpack.c.h.bf16 %v622_v25 }
  0x16   : > { %v421_v34 = vadd.f32 %v405_v27, %v333_v26  ;;  %v422_v35 = vadd.f32 %v406_v29, %v334_v28  ;;  %v423_v38 = vadd.f32 %v407_v31, %v335_v30  ;;  %v424_v39 = vadd.f32 %v408_v33, %v336_v32  ;;  %v619_v32 = vld [vmem:[%s702_s30 + $0x30] sm:$0xff]  }
  0x17   : > { %v317_v46 = vmul.f32 %v707_v0, %v560_v36  ;;  %v389_v47 = vmul.f32 %v712_v1, %v592_v37  ;;  %v318_v50 = vmul.f32 %v707_v0, %v561_v40  ;;  %v390_v51 = vmul.f32 %v712_v1, %v593_v41  ;;  %v626_v37 = vld [vmem:[%s697_s27 + $0x30] sm:$0xff]  }
  0x18   : > { %v437_v44 = vmax.f32 %v421_v34, 0.0  ;;  %v438_v45 = vmax.f32 %v422_v35, 0.0  ;;  %v439_v48 = vmax.f32 %v423_v38, 0.0  ;;  %v440_v49 = vmax.f32 %v424_v39, 0.0 }
  0x19   : > { %v337_v53 = vadd.f32 %v720_v6, %v317_v46  ;;  %v409_v54 = vadd.f32 %v725_v8, %v389_v47  ;;  %v564_v55 = vunpack.c.l.bf16 %v616_v42  ;;  %v596_v56 = vunpack.c.l.bf16 %v623_v43  ;;  %v620_v46 = vld [vmem:[%s702_s30 + $0x38] sm:$0xff]  }
  0x1a   : > { %453 = vst [vmem:[%s750_s18] sm:$0xff] %v437_v44  ;;  %v338_v58 = vadd.f32 %v720_v6, %v318_v50  ;;  %v410_v59 = vadd.f32 %v725_v8, %v390_v51  ;;  %v565_v60 = vunpack.c.h.bf16 %v616_v42  ;;  %v597_v61 = vunpack.c.h.bf16 %v623_v43 }
  0x1b   : > { %454 = vst [vmem:[%s750_s18 + $0x8] sm:$0xff] %v438_v45  ;;  %v425_v62 = vadd.f32 %v409_v54, %v337_v53  ;;  %v319_v63 = vmul.f32 %v707_v0, %v564_v55  ;;  %v391_v2 = vmul.f32 %v712_v1, %v596_v56  ;;  %v568_v3 = vunpack.c.l.bf16 %v617_v52  ;;  %v627_v55 = vld [vmem:[%s697_s27 + $0x38] sm:$0xff]  }
  0x1c   : > { %455 = vst [vmem:[%s750_s18 + $0x10] sm:$0xff] %v439_v48  ;;  %v426_v4 = vadd.f32 %v410_v59, %v338_v58  ;;  %v320_v5 = vmul.f32 %v707_v0, %v565_v60  ;;  %v392_v7 = vmul.f32 %v712_v1, %v597_v61  ;;  %v600_v9 = vunpack.c.l.bf16 %v624_v57 }
  0x1d   : > { %456 = vst [vmem:[%s750_s18 + $0x18] sm:$0xff] %v440_v49  ;;  %v441_v10 = vmax.f32 %v425_v62, 0.0  ;;  %v339_v11 = vadd.f32 %v720_v6, %v319_v63  ;;  %v411_v12 = vadd.f32 %v725_v8, %v391_v2  ;;  %v321_v13 = vmul.f32 %v707_v0, %v568_v3 }
  0x1e   : > { %v442_v16 = vmax.f32 %v426_v4, 0.0  ;;  %v340_v17 = vadd.f32 %v720_v6, %v320_v5  ;;  %v412_v18 = vadd.f32 %v725_v8, %v392_v7  ;;  %v393_v19 = vmul.f32 %v712_v1, %v600_v9 }
  0x1f   : > { %457 = vst [vmem:[%s750_s18 + $0x20] sm:$0xff] %v441_v10  ;;  %v427_v20 = vadd.f32 %v411_v12, %v339_v11  ;;  %v341_v21 = vadd.f32 %v720_v6, %v321_v13  ;;  %v569_v22 = vunpack.c.h.bf16 %v617_v52  ;;  %v601_v23 = vunpack.c.h.bf16 %v624_v57 }
  0x20   : > { %458 = vst [vmem:[%s750_s18 + $0x28] sm:$0xff] %v442_v16  ;;  %v428_v24 = vadd.f32 %v412_v18, %v340_v17  ;;  %v413_v25 = vadd.f32 %v725_v8, %v393_v19  ;;  %v572_v26 = vunpack.c.l.bf16 %v618_v14  ;;  %v604_v27 = vunpack.c.l.bf16 %v625_v15 }
  0x21   : > { %v443_v28 = vmax.f32 %v427_v20, 0.0  ;;  %v322_v29 = vmul.f32 %v707_v0, %v569_v22  ;;  %v394_v30 = vmul.f32 %v712_v1, %v601_v23  ;;  %v573_v31 = vunpack.c.h.bf16 %v618_v14 }
  0x22   : > { %v444_v33 = vmax.f32 %v428_v24, 0.0  ;;  %v429_v34 = vadd.f32 %v413_v25, %v341_v21  ;;  %v323_v35 = vmul.f32 %v707_v0, %v572_v26  ;;  %v395_v36 = vmul.f32 %v712_v1, %v604_v27 }
  0x23   : > { %459 = vst [vmem:[%s750_s18 + $0x30] sm:$0xff] %v443_v28  ;;  %v342_v38 = vadd.f32 %v720_v6, %v322_v29  ;;  %v414_v39 = vadd.f32 %v725_v8, %v394_v30  ;;  %v324_v40 = vmul.f32 %v707_v0, %v573_v31  ;;  %v605_v41 = vunpack.c.h.bf16 %v625_v15 }
  0x24   : > { %460 = vst [vmem:[%s750_s18 + $0x38] sm:$0xff] %v444_v33  ;;  %v445_v42 = vmax.f32 %v429_v34, 0.0  ;;  %v343_v43 = vadd.f32 %v720_v6, %v323_v35  ;;  %v415_v44 = vadd.f32 %v725_v8, %v395_v36  ;;  %v576_v45 = vunpack.c.l.bf16 %v619_v32 }
  0x25   : > { %v430_v47 = vadd.f32 %v414_v39, %v342_v38  ;;  %v344_v48 = vadd.f32 %v720_v6, %v324_v40  ;;  %v396_v49 = vmul.f32 %v712_v1, %v605_v41  ;;  %v608_v50 = vunpack.c.l.bf16 %v626_v37 }
  0x26   : > { %461 = vst [vmem:[%s750_s18 + $0x40] sm:$0xff] %v445_v42  ;;  %v431_v51 = vadd.f32 %v415_v44, %v343_v43  ;;  %v325_v52 = vmul.f32 %v707_v0, %v576_v45  ;;  %v577_v53 = vunpack.c.h.bf16 %v619_v32  ;;  %v609_v54 = vunpack.c.h.bf16 %v626_v37 }
  0x27   : > { %v446_v56 = vmax.f32 %v430_v47, 0.0  ;;  %v416_v57 = vadd.f32 %v725_v8, %v396_v49  ;;  %v397_v58 = vmul.f32 %v712_v1, %v608_v50  ;;  %v580_v59 = vunpack.c.l.bf16 %v620_v46 }
  0x28   : > { %v447_v60 = vmax.f32 %v431_v51, 0.0  ;;  %v345_v61 = vadd.f32 %v720_v6, %v325_v52  ;;  %v326_v62 = vmul.f32 %v707_v0, %v577_v53  ;;  %v398_v63 = vmul.f32 %v712_v1, %v609_v54 }
  0x29   : > { %462 = vst [vmem:[%s750_s18 + $0x48] sm:$0xff] %v446_v56  ;;  %v432_v2 = vadd.f32 %v416_v57, %v344_v48  ;;  %v417_v3 = vadd.f32 %v725_v8, %v397_v58  ;;  %v327_v4 = vmul.f32 %v707_v0, %v580_v59  ;;  %v612_v5 = vunpack.c.l.bf16 %v627_v55 }
  0x2a   : > { %463 = vst [vmem:[%s750_s18 + $0x50] sm:$0xff] %v447_v60  ;;  %v346_v7 = vadd.f32 %v720_v6, %v326_v62  ;;  %v418_v9 = vadd.f32 %v725_v8, %v398_v63  ;;  %v581_v10 = vunpack.c.h.bf16 %v620_v46  ;;  %v613_v11 = vunpack.c.h.bf16 %v627_v55 }
  0x2b   : > { %v448_v12 = vmax.f32 %v432_v2, 0.0  ;;  %v433_v13 = vadd.f32 %v417_v3, %v345_v61  ;;  %v347_v14 = vadd.f32 %v720_v6, %v327_v4  ;;  %v399_v15 = vmul.f32 %v712_v1, %v612_v5 }
  0x2c   : > { %v434_v16 = vadd.f32 %v418_v9, %v346_v7  ;;  %v328_v17 = vmul.f32 %v707_v0, %v581_v10  ;;  %v400_v18 = vmul.f32 %v712_v1, %v613_v11 }
  0x2d   : > { %464 = vst [vmem:[%s750_s18 + $0x58] sm:$0xff] %v448_v12  ;;  %v449_v19 = vmax.f32 %v433_v13, 0.0  ;;  %v419_v20 = vadd.f32 %v725_v8, %v399_v15 }
  0x2e   : > { %v450_v21 = vmax.f32 %v434_v16, 0.0  ;;  %v348_v22 = vadd.f32 %v720_v6, %v328_v17  ;;  %v420_v23 = vadd.f32 %v725_v8, %v400_v18 }
  0x2f   : > { %465 = vst [vmem:[%s750_s18 + $0x60] sm:$0xff] %v449_v19  ;;  %v435_v24 = vadd.f32 %v419_v20, %v347_v14 }
  0x30   : > { %466 = vst [vmem:[%s750_s18 + $0x68] sm:$0xff] %v450_v21  ;;  %v436_v25 = vadd.f32 %v420_v23, %v348_v22 }
  0x31   : > { %v451_v26 = vmax.f32 %v435_v24, 0.0 }
  0x32   : > { %v452_v27 = vmax.f32 %v436_v25, 0.0 }
  0x33   : > { %467 = vst [vmem:[%s750_s18 + $0x70] sm:$0xff] %v451_v26 }
  0x34   : > { %468 = vst [vmem:[%s750_s18 + $0x78] sm:$0xff] %v452_v27 }
  0x35 PF: > { %s16_s21 = sadd.s32 1, %s646_s21  }
  0x36   : > { %p13_p4 = scmp.ge.s32.totalorder %s16_s21, 6  }
  0x38   :  { %15 = sbr.rel (!%p13_p4) target bundleno = 1 (0x1), region = 77 }

// kernel: bottleneck_forward.7
= control target key start
LH: loop header
LB: loop body
LE: loop exit
PB: predicated region body
PF: predicated region fallthrough
CT: control target
= control target key end

     0   :  { %s837_s18 = smov 0   ;;  %s961_s0 = inlined_call_operand.vmem [shape: bf16[512,128], index: 0, kind: input, shape index: {}]   ;;  %s962_s1 = inlined_call_operand.vmem [shape: f32[1,128], index: 1, kind: input, shape index: {}]   ;;  %s963_s2 = inlined_call_operand.vmem [shape: f32[1,128], index: 2, kind: input, shape index: {}]   ;;  %s964_s3 = inlined_call_operand.vmem [shape: bf16[128,128], index: 3, kind: input, shape index: {}]   ;;  %s965_s4 = inlined_call_operand.vmem [shape: bf16[512,128], index: 4, kind: output, shape index: {0}]   ;;  %s966_s5 = inlined_call_operand.vmem [shape: f32[4,2,128], index: 5, kind: output, shape index: {1}]  }
   0x1 LB: > { %s843_s19 = sadd.s32 4294967295, %s805_s18   ;;  %p631_p0 = scmp.ge.s32.totalorder %s805_s18, 1  ;;  %s805_s18 = sphi %s837_s18, %s16_s18  }
   0x2   : > { %p191_p1 = scmp.lt.s32.totalorder %s805_s18, 5 }
   0x4   : > { %p192_p2 = pnand %p631_p0, %p191_p1 }
   0x5   : > { %s632_s22 = sshll.u32 (!%p192_p2), %s843_s19, 4  ;;  %p235_p4 = scmp.lt.s32.totalorder (!%p192_p2), %s843_s19, 3 }
   0x6   : > { %195 = sbr.rel (%p192_p2) target bundleno = 234 (0xea), region = 36  ;;  %p224_p3 = scmp.lt.s32.totalorder (!%p192_p2), %s632_s22, 63 }
   0xb   : > { %v678_v0 = vld [vmem:[%s964_s3 + $0x38] sm:$0xff]  ;;  %v677_v1 = vld [vmem:[%s964_s3 + $0x30] sm:$0xff]  ;;  %s968_s22 = smov (!%p224_p3, %s632_s22), 63  ;;  %v676_v2 = vld [vmem:[%s964_s3 + $0x28] sm:$0xff]  ;;  %s970_s19 = smov (!%p235_p4, %s843_s19), 3 }
   0xc   : > { %399 = vmatpush.bf16.msra.mxu0 %v678_v0  ;;  %765 = vmatpush.bf16.msra.mxu1 %v678_v0  ;;  %s633_s25 = sshll.u32 %s968_s22, 2  ;;  %v675_v5 = vld [vmem:[%s964_s3 + $0x20] sm:$0xff]  ;;  %v674_v15 = vld [vmem:[%s964_s3 + $0x18] sm:$0xff]  ;;  %v673_v25 = vld [vmem:[%s964_s3 + $0x10] sm:$0xff]  ;;  %s636_s22 = sshll.u32 %s970_s19, 1 }
   0xd   : > { %766 = vmatpush.bf16.msra.mxu2 %v678_v0  ;;  %767 = vmatpush.bf16.msra.mxu3 %v678_v0  ;;  %s865_s30 = scalar_lea.vmem %s961_s0, %s633_s25  ;;  %v877_v10 = vld [vmem:[%s962_s1] ss:$0 sm:$0xff]  ;;  %v672_v34 = vld [vmem:[%s964_s3 + $0x8] sm:$0xff]  ;;  %s939_s26 = scalar_lea.vmem %s965_s4, %s633_s25 }
   0xe   : > { %v680_v3 = vld [vmem:[%s865_s30] sm:$0xff]   ;;  %v752_v4 = vld [vmem:[%s865_s30 + $0x10] sm:$0xff]   ;;  %v751_v43 = vld [vmem:[%s865_s30 + $0x8] sm:$0xff]   ;;  %s238_s28 = scalar_lea.vmem %s966_s5, %s636_s22 }
   0xf   : > { %v754_v6 = vld [vmem:[%s865_s30 + $0x20] sm:$0xff]   ;;  %v756_v7 = vld [vmem:[%s865_s30 + $0x30] sm:$0xff]   ;;  %v681_v8 = vunpack.c.l.bf16 %v680_v3  ;;  %v682_v9 = vunpack.c.h.bf16 %v680_v3  ;;  %v689_v11 = vunpack.c.l.bf16 %v752_v4  ;;  %v690_v12 = vunpack.c.h.bf16 %v752_v4  ;;  %v753_v47 = vld [vmem:[%s865_s30 + $0x18] sm:$0xff]  }
  0x10   : > { %400 = vmatpush.bf16.msra.mxu0 %v677_v1  ;;  %768 = vmatpush.bf16.msra.mxu1 %v677_v1  ;;  %v697_v13 = vunpack.c.l.bf16 %v754_v6  ;;  %v698_v14 = vunpack.c.h.bf16 %v754_v6  ;;  %v705_v16 = vunpack.c.l.bf16 %v756_v7  ;;  %v706_v17 = vunpack.c.h.bf16 %v756_v7  ;;  %v887_v20 = vld [vmem:[%s963_s2] ss:$0 sm:$0xff]  ;;  %v755_v48 = vld [vmem:[%s865_s30 + $0x28] sm:$0xff]   ;;  %v757_v49 = vld [vmem:[%s865_s30 + $0x38] sm:$0xff]  }
  0x11   : > { %769 = vmatpush.bf16.msra.mxu2 %v677_v1  ;;  %770 = vmatpush.bf16.msra.mxu3 %v677_v1  ;;  %v275_v18 = vmul.f32 %v877_v10, %v681_v8  ;;  %v276_v19 = vmul.f32 %v877_v10, %v682_v9  ;;  %v279_v21 = vmul.f32 %v877_v10, %v689_v11  ;;  %v671_v44 = vld [vmem:[%s964_s3] sm:$0xff]  ;;  %v685_v52 = vunpack.c.l.bf16 %v751_v43 }
  0x12   : > { %v280_v22 = vmul.f32 %v877_v10, %v690_v12  ;;  %v283_v23 = vmul.f32 %v877_v10, %v697_v13  ;;  %v284_v24 = vmul.f32 %v877_v10, %v698_v14  ;;  %v287_v26 = vmul.f32 %v877_v10, %v705_v16 }
  0x13   : > { %v288_v27 = vmul.f32 %v877_v10, %v706_v17  ;;  %v295_v28 = vadd.f32 %v887_v20, %v275_v18  ;;  %v296_v29 = vadd.f32 %v887_v20, %v276_v19  ;;  %v299_v30 = vadd.f32 %v887_v20, %v279_v21 }
  0x14   : > { %401 = vmatpush.bf16.msra.mxu0 %v676_v2  ;;  %771 = vmatpush.bf16.msra.mxu1 %v676_v2  ;;  %v300_v31 = vadd.f32 %v887_v20, %v280_v22  ;;  %v303_v32 = vadd.f32 %v887_v20, %v283_v23  ;;  %v304_v33 = vadd.f32 %v887_v20, %v284_v24  ;;  %v686_v53 = vunpack.c.h.bf16 %v751_v43 }
  0x15   : > { %772 = vmatpush.bf16.msra.mxu2 %v676_v2  ;;  %773 = vmatpush.bf16.msra.mxu3 %v676_v2  ;;  %v307_v35 = vadd.f32 %v887_v20, %v287_v26  ;;  %v308_v36 = vadd.f32 %v887_v20, %v288_v27  ;;  %v311_v37 = vmax.f32 %v295_v28, 0.0  ;;  %v312_v38 = vmax.f32 %v296_v29, 0.0 }
  0x16   : > { %v315_v39 = vmax.f32 %v299_v30, 0.0  ;;  %v316_v40 = vmax.f32 %v300_v31, 0.0  ;;  %v319_v41 = vmax.f32 %v303_v32, 0.0  ;;  %v320_v42 = vmax.f32 %v304_v33, 0.0 }
  0x17   : > { %v323_v45 = vmax.f32 %v307_v35, 0.0  ;;  %v324_v46 = vmax.f32 %v308_v36, 0.0  ;;  %v327_v50 = vpack.c.bf16 %v312_v38, %v311_v37  ;;  %v693_v55 = vunpack.c.l.bf16 %v753_v47 }
  0x18   : > { %402 = vmatpush.bf16.msra.mxu0 %v675_v5  ;;  %774 = vmatpush.bf16.msra.mxu1 %v675_v5  ;;  %v329_v51 = vpack.c.bf16 %v316_v40, %v315_v39  ;;  %v331_v54 = vpack.c.bf16 %v320_v42, %v319_v41  ;;  %v694_v56 = vunpack.c.h.bf16 %v753_v47  ;;  %v701_v57 = vunpack.c.l.bf16 %v755_v48 }
  0x19   : > { %775 = vmatpush.bf16.msra.mxu2 %v675_v5  ;;  %776 = vmatpush.bf16.msra.mxu3 %v675_v5  ;;  %v333_v58 = vpack.c.bf16 %v324_v46, %v323_v45  ;;  %v702_v59 = vunpack.c.h.bf16 %v755_v48  ;;  %v709_v60 = vunpack.c.l.bf16 %v757_v49  ;;  %v710_v61 = vunpack.c.h.bf16 %v757_v49 }
  0x1a   : > { %v277_v62 = vmul.f32 %v877_v10, %v685_v52  ;;  %v278_v63 = vmul.f32 %v877_v10, %v686_v53  ;;  %v281_v0 = vmul.f32 %v877_v10, %v693_v55  ;;  %v282_v1 = vmul.f32 %v877_v10, %v694_v56 }
  0x1b   : > { %v285_v2 = vmul.f32 %v877_v10, %v701_v57  ;;  %v286_v3 = vmul.f32 %v877_v10, %v702_v59  ;;  %v289_v4 = vmul.f32 %v877_v10, %v709_v60  ;;  %v290_v5 = vmul.f32 %v877_v10, %v710_v61 }
  0x1c   : > { %403 = vmatpush.bf16.msra.mxu0 %v674_v15  ;;  %777 = vmatpush.bf16.msra.mxu1 %v674_v15  ;;  %v297_v6 = vadd.f32 %v887_v20, %v277_v62  ;;  %v298_v7 = vadd.f32 %v887_v20, %v278_v63  ;;  %v301_v8 = vadd.f32 %v887_v20, %v281_v0 }
  0x1d   : > { %778 = vmatpush.bf16.msra.mxu2 %v674_v15  ;;  %779 = vmatpush.bf16.msra.mxu3 %v674_v15  ;;  %v302_v9 = vadd.f32 %v887_v20, %v282_v1  ;;  %v305_v11 = vadd.f32 %v887_v20, %v285_v2  ;;  %v306_v12 = vadd.f32 %v887_v20, %v286_v3 }
  0x1e   : > { %v309_v13 = vadd.f32 %v887_v20, %v289_v4  ;;  %v310_v14 = vadd.f32 %v887_v20, %v290_v5  ;;  %v313_v15 = vmax.f32 %v297_v6, 0.0  ;;  %v314_v16 = vmax.f32 %v298_v7, 0.0 }
  0x1f   : > { %v317_v17 = vmax.f32 %v301_v8, 0.0  ;;  %v318_v10 = vmax.f32 %v302_v9, 0.0  ;;  %v321_v18 = vmax.f32 %v305_v11, 0.0  ;;  %v322_v19 = vmax.f32 %v306_v12, 0.0 }
  0x20   : > { %404 = vmatpush.bf16.msra.mxu0 %v673_v25  ;;  %780 = vmatpush.bf16.msra.mxu1 %v673_v25  ;;  %v325_v21 = vmax.f32 %v309_v13, 0.0  ;;  %v326_v22 = vmax.f32 %v310_v14, 0.0  ;;  %v328_v23 = vpack.c.bf16 %v314_v16, %v313_v15 }
  0x21   : > { %781 = vmatpush.bf16.msra.mxu2 %v673_v25  ;;  %782 = vmatpush.bf16.msra.mxu3 %v673_v25  ;;  %v330_v24 = vpack.c.bf16 %v318_v10, %v317_v17  ;;  %v332_v25 = vpack.c.bf16 %v322_v19, %v321_v18 }
  0x22   : > { %v334_v26 = vpack.c.bf16 %v326_v22, %v325_v21 }
  0x24   : > { %405 = vmatpush.bf16.msra.mxu0 %v672_v34  ;;  %783 = vmatpush.bf16.msra.mxu1 %v672_v34 }
  0x25   : > { %784 = vmatpush.bf16.msra.mxu2 %v672_v34  ;;  %785 = vmatpush.bf16.msra.mxu3 %v672_v34 }
  0x28   : > { %406 = vmatpush.bf16.msra.mxu0 %v671_v44  ;;  %786 = vmatpush.bf16.msra.mxu1 %v671_v44 }
  0x29   : > { %787 = vmatpush.bf16.msra.mxu2 %v671_v44  ;;  %788 = vmatpush.bf16.msra.mxu3 %v671_v44 }
  0x2b   : > { %407 = vmatmul.bf16.vlgmr.msra.gmra.mxu0 %v327_v50  ;;  %417 = vmatmul.bf16.vlgmr.msra.gmra.mxu1 %v329_v51 }
  0x2c   : > { %427 = vmatmul.bf16.vlgmr.msra.gmra.mxu2 %v331_v54  ;;  %437 = vmatmul.bf16.vlgmr.msra.gmra.mxu3 %v333_v58 }
  0x3b   : > { %412 = vmatmul.bf16.gmra.mxu0 %v328_v23  ;;  %422 = vmatmul.bf16.gmra.mxu1 %v330_v24 }
  0x3c   : > { %432 = vmatmul.bf16.gmra.mxu2 %v332_v25  ;;  %442 = vmatmul.bf16.gmra.mxu3 %v334_v26 }
  0xa8   : > { %v408_v27 = vpop.f32.mrf.mxu0  ;;  %v418_v28 = vpop.f32.mrf.mxu1 }
  0xa9   : > { %v502_v41 = vmul.f32 %v408_v27, %v408_v27  ;;  %v506_v55 = vmul.f32 %v418_v28, %v418_v28 }
  0xaf   : > { %v428_v20 = vpop.f32.mrf.mxu2  ;;  %v932_v29 = vpop.f32.mrf.mxu3 }
  0xb0   : > { %v410_v30 = vpop.f32.mrf.mxu0  ;;  %v420_v31 = vpop.f32.mrf.mxu1  ;;  %v510_v7 = vmul.f32 %v428_v20, %v428_v20  ;;  %v514_v19 = vmul.f32 %v932_v29, %v932_v29 }
  0xb1   : > { %v714_v32 = vpack.c.bf16 %v410_v30, %v408_v27  ;;  %v724_v33 = vpack.c.bf16 %v420_v31, %v418_v28  ;;  %v503_v40 = vmul.f32 %v410_v30, %v410_v30  ;;  %v480_v43 = vadd.f32 %v410_v30, %v408_v27 }
  0xb2   : > { %v507_v58 = vmul.f32 %v420_v31, %v420_v31 }
  0xb3   : > { %715 = vst [vmem:[%s939_s26] sm:$0xff] %v714_v32   ;;  %v518_v44 = vadd.f32 %v503_v40, %v502_v41 }
  0xb4   : > { %759 = vst [vmem:[%s939_s26 + $0x10] sm:$0xff] %v724_v33  }
  0xb7   : > { %v430_v34 = vpop.f32.mrf.mxu2  ;;  %v440_v35 = vpop.f32.mrf.mxu3 }
  0xb8   : > { %v413_v36 = vpop.f32.mrf.mxu0  ;;  %v423_v37 = vpop.f32.mrf.mxu1  ;;  %v734_v38 = vpack.c.bf16 %v430_v34, %v428_v20  ;;  %v744_v39 = vpack.c.bf16 %v440_v35, %v932_v29  ;;  %v511_v11 = vmul.f32 %v430_v34, %v430_v34  ;;  %v515_v23 = vmul.f32 %v440_v35, %v440_v35 }
  0xb9   : > { %v504_v42 = vmul.f32 %v413_v36, %v413_v36  ;;  %v481_v45 = vadd.f32 %v480_v43, %v413_v36  ;;  %v508_v61 = vmul.f32 %v423_v37, %v423_v37 }
  0xba   : > { %761 = vst [vmem:[%s939_s26 + $0x20] sm:$0xff] %v734_v38  }
  0xbb   : > { %763 = vst [vmem:[%s939_s26 + $0x30] sm:$0xff] %v744_v39   ;;  %v519_v48 = vadd.f32 %v518_v44, %v504_v42 }
  0xbf   : > { %v433_v46 = vpop.f32.mrf.mxu2  ;;  %v443_v47 = vpop.f32.mrf.mxu3 }
  0xc0   : > { %v415_v49 = vpop.f32.mrf.mxu0  ;;  %v425_v50 = vpop.f32.mrf.mxu1  ;;  %v512_v15 = vmul.f32 %v433_v46, %v433_v46  ;;  %v516_v27 = vmul.f32 %v443_v47, %v443_v47 }
  0xc1   : > { %v719_v51 = vpack.c.bf16 %v415_v49, %v413_v36  ;;  %v482_v52 = vadd.f32 %v481_v45, %v415_v49  ;;  %v505_v53 = vmul.f32 %v415_v49, %v415_v49  ;;  %v729_v54 = vpack.c.bf16 %v425_v50, %v423_v37 }
  0xc2   : > { %v509_v5 = vmul.f32 %v425_v50, %v425_v50 }
  0xc3   : > { %758 = vst [vmem:[%s939_s26 + $0x8] sm:$0xff] %v719_v51   ;;  %v483_v56 = vadd.f32 %v482_v52, %v418_v28  ;;  %v520_v57 = vadd.f32 %v519_v48, %v505_v53 }
  0xc4   : > { %760 = vst [vmem:[%s939_s26 + $0x18] sm:$0xff] %v729_v54  }
  0xc5   : > { %v521_v59 = vadd.f32 %v520_v57, %v506_v55  ;;  %v484_v60 = vadd.f32 %v483_v56, %v420_v31 }
  0xc7   : > { %v485_v62 = vadd.f32 %v484_v60, %v423_v37  ;;  %v522_v63 = vadd.f32 %v521_v59, %v507_v58  ;;  %v435_v0 = vpop.f32.mrf.mxu2  ;;  %v445_v1 = vpop.f32.mrf.mxu3 }
  0xc8   : > { %v739_v2 = vpack.c.bf16 %v435_v0, %v433_v46  ;;  %v749_v3 = vpack.c.bf16 %v445_v1, %v443_v47  ;;  %v513_v18 = vmul.f32 %v435_v0, %v435_v0  ;;  %v517_v31 = vmul.f32 %v445_v1, %v445_v1 }
  0xc9   : > { %v486_v4 = vadd.f32 %v485_v62, %v425_v50  ;;  %v523_v6 = vadd.f32 %v522_v63, %v508_v61 }
  0xca   : > { %762 = vst [vmem:[%s939_s26 + $0x28] sm:$0xff] %v739_v2  }
  0xcb   : > { %v487_v8 = vadd.f32 %v486_v4, %v428_v20  ;;  %v524_v9 = vadd.f32 %v523_v6, %v509_v5  ;;  %764 = vst [vmem:[%s939_s26 + $0x38] sm:$0xff] %v749_v3  }
  0xcd   : > { %v525_v12 = vadd.f32 %v524_v9, %v510_v7  ;;  %v488_v13 = vadd.f32 %v487_v8, %v430_v34 }
  0xcf   : > { %v489_v14 = vadd.f32 %v488_v13, %v433_v46  ;;  %v526_v16 = vadd.f32 %v525_v12, %v511_v11 }
  0xd1   : > { %v527_v17 = vadd.f32 %v526_v16, %v512_v15  ;;  %v490_v10 = vadd.f32 %v489_v14, %v435_v0 }
  0xd3   : > { %v491_v21 = vadd.f32 %v490_v10, %v932_v29  ;;  %v528_v22 = vadd.f32 %v527_v17, %v513_v18 }
  0xd5   : > { %v529_v24 = vadd.f32 %v528_v22, %v514_v19  ;;  %v492_v25 = vadd.f32 %v491_v21, %v440_v35 }
  0xd7   : > { %v493_v26 = vadd.f32 %v492_v25, %v443_v47  ;;  %v530_v28 = vadd.f32 %v529_v24, %v515_v23 }
  0xd9   : > { %v531_v20 = vadd.f32 %v530_v28, %v516_v27  ;;  %v494_v30 = vadd.f32 %v493_v26, %v445_v1 }
  0xdb   : > { %v495_v32 = vrot.slane %v494_v30, 4  ;;  %v532_v33 = vadd.f32 %v531_v20, %v517_v31 }
  0xdd   : > { %v496_v34 = vadd.f32 %v495_v32, %v494_v30  ;;  %v533_v36 = vrot.slane %v532_v33, 4 }
  0xdf   : > { %v497_v37 = vrot.slane %v496_v34, 2  ;;  %v534_v38 = vadd.f32 %v533_v36, %v532_v33 }
  0xe1   : > { %v498_v29 = vadd.f32 %v497_v37, %v496_v34  ;;  %v535_v39 = vrot.slane %v534_v38, 2 }
  0xe3   : > { %v499_v40 = vrot.slane %v498_v29, 1  ;;  %v536_v41 = vadd.f32 %v535_v39, %v534_v38 }
  0xe5   : > { %v500_v35 = vadd.f32 %v499_v40, %v498_v29  ;;  %v537_v42 = vrot.slane %v536_v41, 1 }
  0xe7   : > { %501 = vst [vmem:[%s238_s28] sm:$0x1] %v500_v35  ;;  %v538_v43 = vadd.f32 %v537_v42, %v536_v41 }
  0xe9   : > { %539 = vst [vmem:[%s238_s28 + $0x1] sm:$0x1] %v538_v43 }
  0xea PF: > { %s16_s18 = sadd.s32 1, %s805_s18  }
  0xeb   : > { %p13_p5 = scmp.ge.s32.totalorder %s16_s18, 6  }
  0xed   :  { %15 = sbr.rel (!%p13_p5) target bundleno = 1 (0x1), region = 78 }

// kernel: bottleneck_forward.6
= control target key start
LH: loop header
LB: loop body
LE: loop exit
PB: predicated region body
PF: predicated region fallthrough
CT: control target
= control target key end

     0   :  { %s6031_s12 = smov 0   ;;  %s7898_s0 = inlined_call_operand.vmem [shape: bf16[2,324,128], index: 0, kind: input, shape index: {}]   ;;  %s7899_s1 = inlined_call_operand.vmem [shape: bf16[9,128,128], index: 1, kind: input, shape index: {}]   ;;  %s7900_s2 = inlined_call_operand.vmem [shape: bf16[2,286,128], index: 2, kind: output, shape index: {0}]   ;;  %s7901_s3 = inlined_call_operand.vmem [shape: f32[2,2,128], index: 3, kind: output, shape index: {1}]  }
   0x1 LB: > { %s4955_s13 = sadd.s32 4294967295, %s6007_s12   ;;  %p4959_p0 = scmp.ge.s32.totalorder %s6007_s12, 1  ;;  %s6007_s12 = sphi %s6031_s12, %s14_s12  }
   0x2   : > { %p140_p1 = scmp.lt.s32.totalorder %s6007_s12, 3 }
   0x4   : > { %p141_p2 = pnand %p4959_p0, %p140_p1 }
   0x6   : > { %144 = sbr.rel (%p141_p2) target bundleno = 899 (0x383), region = 28 }
   0xb   : > { %v5720_v0 = vld [vmem:[%s7899_s1 + $0x78] sm:$0xff]  ;;  %p168_p3 = scmp.lt.s32.totalorder %s4955_s13, 1  ;;  %v5719_v1 = vld [vmem:[%s7899_s1 + $0x70] sm:$0xff]  ;;  %v5718_v2 = vld [vmem:[%s7899_s1 + $0x68] sm:$0xff]  ;;  %vm342_vm0 = vsmask.f32 7424 }
   0xc   : > { %5937 = vmatpush.bf16.msra.mxu1 %v5720_v0  ;;  %5938 = vmatpush.bf16.msra.mxu2 %v5720_v0  ;;  %v5717_v3 = vld [vmem:[%s7899_s1 + $0x60] sm:$0xff]  ;;  %v5716_v5 = vld [vmem:[%s7899_s1 + $0x58] sm:$0xff]  ;;  %v5715_v11 = vld [vmem:[%s7899_s1 + $0x50] sm:$0xff]  ;;  %vm840_vm1 = vcmask 1046528   ;;  %vm1603_vm2 = vsmask.f32 6400 }
   0xd   : > { %s8010_s13 = smov (!%p168_p3, %s4955_s13), 1  ;;  %552 = vmatpush.bf16.msra.mxu0 %v5720_v0  ;;  %5939 = vmatpush.bf16.msra.mxu3 %v5720_v0  ;;  %v5714_v20 = vld [vmem:[%s7899_s1 + $0x48] sm:$0xff]  ;;  %v5713_v31 = vld [vmem:[%s7899_s1 + $0x40] sm:$0xff]  ;;  %v5728_v36 = vld [vmem:[%s7899_s1 + $0xb8] sm:$0xff]  ;;  %vm2637_vm3 = vsmask.f32 5376 }
   0xe   : > { %s5961_s20 = smul.u32 164, %s8010_s13  ;;  %v5712_v39 = vld [vmem:[%s7899_s1 + $0x38] sm:$0xff]  ;;  %v5727_v46 = vld [vmem:[%s7899_s1 + $0xb0] sm:$0xff]  ;;  %v5726_v56 = vld [vmem:[%s7899_s1 + $0xa8] sm:$0xff]  ;;  %vm1992_vm4 = vcmask 1045504   ;;  %vm3030_vm5 = vcmask 1044480  }
   0xf   : > { %v5779_v40 = vld [vmem:[%s7899_s1 + $0x138] sm:$0xff]  ;;  %v5711_v47 = vld [vmem:[%s7899_s1 + $0x30] sm:$0xff]  ;;  %v5710_v57 = vld [vmem:[%s7899_s1 + $0x28] sm:$0xff]  ;;  %s5962_s17 = smul.u32 144, %s8010_s13 }
  0x10   : > { %5940 = vmatpush.bf16.msra.mxu1 %v5719_v1  ;;  %5941 = vmatpush.bf16.msra.mxu2 %v5719_v1  ;;  %s6057_s25 = scalar_lea.vmem %s7898_s0, %s5961_s20  ;;  %v5778_v48 = vld [vmem:[%s7899_s1 + $0x130] sm:$0xff]  ;;  %v5754_v54 = vld [vmem:[%s7899_s1 + $0xf8] sm:$0xff]  ;;  %v5777_v58 = vld [vmem:[%s7899_s1 + $0x128] sm:$0xff] }
  0x11   : > { %553 = vmatpush.bf16.msra.mxu0 %v5719_v1  ;;  %5942 = vmatpush.bf16.msra.mxu3 %v5719_v1  ;;  %v6060_v4 = vld [vmem:[%s6057_s25 + $0x28] sm:$0xff]  ;;  %v6066_v6 = vld [vmem:[%s6057_s25 + $0x50] sm:$0xff]  ;;  %v6069_v7 = vld [vmem:[%s6057_s25] sm:$0xff]   ;;  %s7235_s20 = scalar_lea.vmem %s7900_s2, %s5962_s17 }
  0x12   : > { %v6072_v8 = vld [vmem:[%s6057_s25 + $0x30] sm:$0xff]  ;;  %v383_v9 = vshll.u32 %v6060_v4, 16  ;;  %v6076_v10 = vld [vmem:[%s6057_s25 + $0x58] sm:$0xff]  ;;  %v423_v12 = vshll.u32 %v6066_v6, 16  ;;  %v6083_v13 = vld [vmem:[%s6057_s25 + $0x8] sm:$0xff]  ;;  %v346_v14 = vshll.u32 %v6069_v7, 16 }
  0x13   : > { %v5703_v15 = vld [vmem:[%s6057_s25 + $0x78] sm:$0xff]  ;;  %v387_v17 = vshrl.u32 %v6060_v4, 16  ;;  %v391_v18 = vshll.u32 %v6072_v8, 16  ;;  %v431_v19 = vshll.u32 %v6076_v10, 16  ;;  %v427_v22 = vshrl.u32 %v6066_v6, 16  ;;  %v6099_v23 = vld [vmem:[%s6057_s25 + $0x80] sm:$0xff] }
  0x14   : > { %5943 = vmatpush.bf16.msra.mxu1 %v5718_v2  ;;  %5944 = vmatpush.bf16.msra.mxu2 %v5718_v2  ;;  %v6087_v16 = vrot.slane %v383_v9, 1  ;;  %v6095_v21 = vrot.slane %v423_v12, 1  ;;  %v463_v24 = vshll.u32 %v5703_v15, 16  ;;  %v344_v25 = vshrl.u32 %v6069_v7, 16  ;;  %v6140_v49 = vld [vmem:[%s6057_s25 + $0x38] sm:$0xff]  ;;  %v6143_v50 = vld [vmem:[%s6057_s25 + $0x88] sm:$0xff]  }
  0x15   : > { %554 = vmatpush.bf16.msra.mxu0 %v5718_v2  ;;  %5945 = vmatpush.bf16.msra.mxu3 %v5718_v2  ;;  %v348_v26 = vrot.slane %v346_v14, 1  ;;  %v351_v27 = vshll.u32 %v6083_v13, 16  ;;  %v6104_v29 = vrot.slane %v391_v18, 1  ;;  %v6106_v30 = vrot.slane %v431_v19, 1  ;;  %v6146_v51 = vld [vmem:[%s6057_s25 + $0x88] sm:$0xf]  }
  0x16   : > { %v389_v28 = vor.u32 %v387_v17, %v6087_v16  ;;  %v429_v32 = vor.u32 %v427_v22, %v6095_v21  ;;  %v6112_v33 = vrot.slane %v463_v24, 1  ;;  %v467_v34 = vshrl.u32 %v5703_v15, 16  ;;  %v6149_v52 = vld [vmem:[%s6057_s25 + $0x60] sm:$0xff]  ;;  %v6156_v55 = vld [vmem:[%s6057_s25 + $0x10] sm:$0xff]  ;;  %v5752_v18 = vld [vmem:[%s7899_s1 + $0xe8] sm:$0xff] }
  0x17   : > { %v471_v35 = vshll.u32 %v6099_v23, 16  ;;  %v349_v37 = vor.u32 %v348_v26, %v344_v25  ;;  %v353_v38 = vrot.slane %v351_v27, 1  ;;  %v395_v59 = vshrl.u32 %v6072_v8, 16  ;;  %v5753_v63 = vld [vmem:[%s7899_s1 + $0xf0] sm:$0xff]  ;;  %v5725_v2 = vld [vmem:[%s7899_s1 + $0xa0] sm:$0xff]  ;;  %v6193_v19 = vld [vmem:[%s6057_s25 + $0x48] sm:$0xff] }
  0x18   : > { %5946 = vmatpush.bf16.msra.mxu1 %v5717_v3  ;;  %5947 = vmatpush.bf16.msra.mxu2 %v5717_v3  ;;  %v394_v41 = vsel %vm342_vm0, %v389_v28, %v6104_v29  ;;  %v434_v42 = vsel %vm342_vm0, %v429_v32, %v6106_v30  ;;  %v469_v43 = vor.u32 %v467_v34, %v6112_v33  ;;  %v399_v60 = vshll.u32 %v6140_v49, 16  ;;  %v5724_v24 = vld [vmem:[%s7899_s1 + $0x98] sm:$0xff]  ;;  %v6209_v32 = vld [vmem:[%s6057_s25 + $0x68] sm:$0xff] }
  0x19   : > { %555 = vmatpush.bf16.msra.mxu0 %v5717_v3  ;;  %5948 = vmatpush.bf16.msra.mxu3 %v5717_v3  ;;  %v473_v44 = vrot.slane %v471_v35, 1  ;;  %v354_v45 = vsel %vm342_vm0, %v349_v37, %v353_v38  ;;  %v435_v61 = vshrl.u32 %v6076_v10, 16  ;;  %v439_v62 = vshll.u32 %v6149_v52, 16  ;;  %v5709_v3 = vld [vmem:[%s7899_s1 + $0x20] sm:$0xff]  ;;  %v5775_v37 = vld [vmem:[%s7899_s1 + $0x118] sm:$0xff] }
  0x1a   : > { %v355_v0 = vshrl.u32 %v6083_v13, 16  ;;  %v359_v1 = vshll.u32 %v6156_v55, 16  ;;  %v397_v9 = vor.u32 %v395_v59, %v6104_v29  ;;  %v475_v15 = vshrl.u32 %v6099_v23, 16  ;;  %v5708_v23 = vld [vmem:[%s7899_s1 + $0x18] sm:$0xff] }
  0x1b   : > { %v474_v53 = vsel %vm342_vm0, %v469_v43, %v473_v44  ;;  %v437_v12 = vor.u32 %v435_v61, %v6106_v30  ;;  %v441_v14 = vrot.slane %v439_v62, 1  ;;  %v479_v17 = vshll.u32 %v6143_v50, 16  ;;  %v5774_v43 = vld [vmem:[%s7899_s1 + $0x110] sm:$0xff] }
  0x1c   : > { %5949 = vmatpush.bf16.msra.mxu1 %v5716_v5  ;;  %5950 = vmatpush.bf16.msra.mxu2 %v5716_v5  ;;  %v361_v22 = vrot.slane %v359_v1, 1  ;;  %v477_v27 = vor.u32 %v475_v15, %v473_v44  ;;  %v415_v29 = vshll.u32 %v6193_v19, 16  ;;  %v6263_v15 = vld [vmem:[%s6057_s25 + $0x70] sm:$0xff] }
  0x1d   : > { %556 = vmatpush.bf16.msra.mxu0 %v5716_v5  ;;  %5951 = vmatpush.bf16.msra.mxu3 %v5716_v5  ;;  %v5776_v5 = vld [vmem:[%s7899_s1 + $0x120] sm:$0xff]  ;;  %v442_v26 = vsel %vm342_vm0, %v437_v12, %v441_v14  ;;  %v481_v28 = vrot.slane %v479_v17, 1 }
  0x1e   : > { %v6212_v35 = vrot.slane %v415_v29, 1  ;;  %v455_v29 = vshll.u32 %v6263_v15, 16 }
  0x1f   : > { %v482_v34 = vsel %vm342_vm0, %v477_v27, %v481_v28 }
  0x20   : > { %5952 = vmatpush.bf16.msra.mxu1 %v5715_v11  ;;  %5953 = vmatpush.bf16.msra.mxu2 %v5715_v11 }
  0x21   : > { %557 = vmatpush.bf16.msra.mxu0 %v5715_v11  ;;  %5954 = vmatpush.bf16.msra.mxu3 %v5715_v11  ;;  %v401_v11 = vrot.slane %v399_v60, 1 }
  0x23   : > { %v402_v25 = vsel %vm342_vm0, %v397_v9, %v401_v11 }
  0x24   : > { %5955 = vmatpush.bf16.msra.mxu1 %v5714_v20  ;;  %5956 = vmatpush.bf16.msra.mxu2 %v5714_v20 }
  0x25   : > { %558 = vmatpush.bf16.msra.mxu0 %v5714_v20  ;;  %5957 = vmatpush.bf16.msra.mxu3 %v5714_v20  ;;  %v357_v20 = vor.u32 %v355_v0, %v353_v38  ;;  %v5751_v38 = vld [vmem:[%s7899_s1 + $0xe0] sm:$0xff]  ;;  %v5749_v0 = vld [vmem:[%s7899_s1 + $0xd0] sm:$0xff] }
  0x27   : > { %v362_v30 = vsel %vm342_vm0, %v357_v20, %v361_v22 }
  0x28   : > { %5958 = vmatpush.bf16.msra.mxu1 %v5713_v31  ;;  %5959 = vmatpush.bf16.msra.mxu2 %v5713_v31 }
  0x29   : > { %559 = vmatpush.bf16.msra.mxu0 %v5713_v31  ;;  %5960 = vmatpush.bf16.msra.mxu3 %v5713_v31  ;;  %v6206_v31 = vld [vmem:[%s6057_s25 + $0x40] sm:$0xff] }
  0x2a   : > { %v411_v27 = vshrl.u32 %v6206_v31, 16 }
  0x2b   : > { %585 = vmatmul.bf16.vlgmr.msra.gmra.mxu1 %v394_v41  ;;  %610 = vmatmul.bf16.vlgmr.msra.gmra.mxu2 %v434_v42  ;;  %v5707_v41 = vld [vmem:[%s7899_s1 + $0x10] sm:$0xff]  ;;  %v5722_v42 = vld [vmem:[%s7899_s1 + $0x88] sm:$0xff] }
  0x2c   : > { %942 = vmatpush.bf16.msrb.mxu2 %v5728_v36  ;;  %720 = vmatpush.bf16.msrb.mxu1 %v5712_v39  ;;  %v5723_v36 = vld [vmem:[%s7899_s1 + $0x90] sm:$0xff]  ;;  %v419_v39 = vshrl.u32 %v6193_v19, 16 }
  0x2d   : > { %1836 = vmatpush.bf16.msrb.mxu0 %v5779_v40  ;;  %635 = vmatmul.bf16.vlgmr.msra.gmra.mxu3 %v474_v53  ;;  %v6225_v40 = vld [vmem:[%s6057_s25 + $0x18] sm:$0xff]  ;;  %v6242_v53 = vld [vmem:[%s6057_s25 + $0x20] sm:$0xff] }
  0x2e   : > { %560 = vmatmul.bf16.vlgmr.msra.gmra.mxu0 %v354_v45  ;;  %1321 = vmatpush.bf16.msrb.mxu3 %v5754_v54  ;;  %v421_v44 = vor.u32 %v419_v39, %v6212_v35  ;;  %v403_v45 = vshrl.u32 %v6140_v49, 16  ;;  %v5750_v54 = vld [vmem:[%s7899_s1 + $0xd8] sm:$0xff]  ;;  %v457_v39 = vrot.slane %v455_v29, 1 }
  0x30   : > { %943 = vmatpush.bf16.msrb.mxu2 %v5727_v46  ;;  %721 = vmatpush.bf16.msrb.mxu1 %v5711_v47  ;;  %v407_v46 = vshll.u32 %v6206_v31, 16  ;;  %v443_v47 = vshrl.u32 %v6149_v52, 16  ;;  %v405_v59 = vor.u32 %v403_v45, %v401_v11  ;;  %v379_v11 = vshrl.u32 %v6242_v53, 16 }
  0x31   : > { %1837 = vmatpush.bf16.msrb.mxu0 %v5778_v48  ;;  %v447_v48 = vshll.u32 %v6209_v32, 16 }
  0x32   : > { %1322 = vmatpush.bf16.msrb.mxu3 %v5753_v63  ;;  %v409_v60 = vrot.slane %v407_v46, 1  ;;  %v445_v61 = vor.u32 %v443_v47, %v441_v14  ;;  %v375_v63 = vshll.u32 %v6242_v53, 16 }
  0x33   : > { %v449_v62 = vrot.slane %v447_v48, 1 }
  0x34   : > { %944 = vmatpush.bf16.msrb.mxu2 %v5726_v56  ;;  %722 = vmatpush.bf16.msrb.mxu1 %v5710_v57  ;;  %v6249_v56 = vsel %vm342_vm0, %v421_v44, %v6095_v21  ;;  %v363_v57 = vshrl.u32 %v6156_v55, 16  ;;  %v377_v9 = vrot.slane %v375_v63, 1 }
  0x35   : > { %1838 = vmatpush.bf16.msrb.mxu0 %v5777_v58  ;;  %v367_v58 = vshll.u32 %v6225_v40, 16 }
  0x36   : > { %1323 = vmatpush.bf16.msrb.mxu3 %v5752_v18  ;;  %v365_v21 = vor.u32 %v363_v57, %v361_v22  ;;  %v381_v14 = vor.u32 %v379_v11, %v377_v9  ;;  %v5706_v18 = vld [vmem:[%s7899_s1 + $0x8] sm:$0xff]  ;;  %v5918_v11 = vld [vmem:[%s6057_s25] sm:$0xf0] }
  0x37   : > { %v369_v1 = vrot.slane %v367_v58, 1  ;;  %v5748_v22 = vld [vmem:[%s7899_s1 + $0xc8] sm:$0xff]  ;;  %v5787_v58 = vld [vmem:[%s7899_s1 + $0x178] sm:$0xff] }
  0x38   : > { %945 = vmatpush.bf16.msrb.mxu2 %v5725_v2  ;;  %723 = vmatpush.bf16.msrb.mxu1 %v5709_v3  ;;  %v483_v2 = vshrl.u32 %v6143_v50, 16  ;;  %v410_v3 = vsel %vm342_vm0, %v405_v59, %v409_v60  ;;  %v386_v20 = vsel %vm342_vm0, %v381_v14, %v6087_v16  ;;  %v5747_v16 = vld [vmem:[%s7899_s1 + $0xc0] sm:$0xff]  ;;  %v5828_v59 = vld [vmem:[%s7899_s1 + $0x238] sm:$0xff] }
  0x39   : > { %1839 = vmatpush.bf16.msrb.mxu0 %v5776_v5  ;;  %v450_v5 = vsel %vm342_vm0, %v445_v61, %v449_v62  ;;  %v370_v12 = vsel %vm342_vm0, %v365_v21, %v369_v1  ;;  %v1456_v61 = vld [vmem:[%s6057_s25 + $0x8] sm:$0xe]  ;;  %v5919_v14 = vld [vmem:[%s6057_s25] sm:$0xe] }
  0x3a   : > { %1324 = vmatpush.bf16.msrb.mxu3 %v5751_v38  ;;  %v485_v17 = vor.u32 %v483_v2, %v481_v28  ;;  %v451_v28 = vshrl.u32 %v6209_v32, 16  ;;  %v1547_v21 = vunpack.c.l.b16 %v1456_v61 }
  0x3b   : > { %590 = vmatmul.bf16.gmra.mxu1 %v402_v25  ;;  %615 = vmatmul.bf16.gmra.mxu2 %v442_v26  ;;  %v5705_v25 = vld [vmem:[%s7899_s1] sm:$0xff] }
  0x3c   : > { %946 = vmatpush.bf16.msrb.mxu2 %v5724_v24  ;;  %724 = vmatpush.bf16.msrb.mxu1 %v5708_v23  ;;  %v5721_v24 = vld [vmem:[%s7899_s1 + $0x80] sm:$0xff]  ;;  %v5773_v23 = vld [vmem:[%s7899_s1 + $0x108] sm:$0xff]  ;;  %v453_v38 = vor.u32 %v451_v28, %v449_v62 }
  0x3d   : > { %1840 = vmatpush.bf16.msrb.mxu0 %v5775_v37  ;;  %640 = vmatmul.bf16.gmra.mxu3 %v482_v34  ;;  %v5772_v26 = vld [vmem:[%s7899_s1 + $0x100] sm:$0xff]  ;;  %v5173_v34 = vld [vmem:[%s6057_s25 + $0x8] sm:$0xe]  ;;  %v413_v37 = vor.u32 %v411_v27, %v409_v60  ;;  %v459_v60 = vshrl.u32 %v6263_v15, 16  ;;  %v6315_v62 = vld [vmem:[%s6057_s25 + $0xc] sm:$0xf] }
  0x3e   : > { %565 = vmatmul.bf16.gmra.mxu0 %v362_v30  ;;  %1325 = vmatpush.bf16.msrb.mxu3 %v5750_v54  ;;  %v371_v30 = vshrl.u32 %v6225_v40, 16  ;;  %v458_v45 = vsel %vm342_vm0, %v453_v38, %v457_v39  ;;  %v5812_v54 = vld [vmem:[%s7899_s1 + $0x1b8] sm:$0xff] }
  0x3f   : > { %v418_v44 = vsel %vm342_vm0, %v413_v37, %v6212_v35  ;;  %v5820_v35 = vld [vmem:[%s7899_s1 + $0x1f8] sm:$0xff]  ;;  %v461_v63 = vor.u32 %v459_v60, %v457_v39  ;;  %v5811_v39 = vld [vmem:[%s7899_s1 + $0x1b0] sm:$0xff] }
  0x40   : > { %947 = vmatpush.bf16.msrb.mxu2 %v5723_v36  ;;  %725 = vmatpush.bf16.msrb.mxu1 %v5707_v41  ;;  %v5729_v36 = vld [vmem:[%s6057_s25 + $0x8] sm:$0xf0]  ;;  %v5730_v41 = vld [vmem:[%s6057_s25 + $0x10] sm:$0xff]  ;;  %v5756_v37 = vld [vmem:[%s6057_s25 + $0x18] sm:$0xff] }
  0x41   : > { %1841 = vmatpush.bf16.msrb.mxu0 %v5774_v43  ;;  %v373_v43 = vor.u32 %v371_v30, %v369_v1  ;;  %v1221_v47 = vrot.slane %v5730_v41, 1  ;;  %v7902_v1 = vunpack.c.l.b16 %v6315_v62  ;;  %v466_v2 = vsel %vm342_vm0, %v461_v63, %v6112_v33  ;;  %v5819_v41 = vld [vmem:[%s7899_s1 + $0x1f0] sm:$0xff] }
  0x42   : > { %1326 = vmatpush.bf16.msrb.mxu3 %v5749_v0  ;;  %v5731_v0 = vld [vmem:[%s6057_s25 + $0x18] sm:$0xff]  ;;  %v5920_v33 = vor.u32 %v5919_v14, %v5918_v11 }
  0x43   : > { %v378_v48 = vsel %vm342_vm0, %v373_v43, %v377_v9  ;;  %v1584_v9 = vpack.c.b16 %v7902_v1, %v1547_v21  ;;  %v1622_v43 = vshrl.u32 %v5756_v37, 16 }
  0x44   : > { %948 = vmatpush.bf16.msrb.mxu2 %v5722_v42  ;;  %726 = vmatpush.bf16.msrb.mxu1 %v5706_v18  ;;  %v5174_v42 = vor.u32 %v5729_v36, %v5173_v34  ;;  %v841_v27 = vrot.slane %v5920_v33, 1  ;;  %v5810_v33 = vld [vmem:[%s7899_s1 + $0x1a8] sm:$0xff] }
  0x45   : > { %1842 = vmatpush.bf16.msrb.mxu0 %v5773_v23  ;;  %v1608_v18 = vshll.u32 %v1584_v9, 16 }
  0x46   : > { %1327 = vmatpush.bf16.msrb.mxu3 %v5748_v22  ;;  %v1220_v46 = vrot.slane %v5174_v42, 1  ;;  %v5786_v42 = vld [vmem:[%s7899_s1 + $0x170] sm:$0xff] }
  0x48   : > { %949 = vmatpush.bf16.msrb.mxu2 %v5721_v24  ;;  %727 = vmatpush.bf16.msrb.mxu1 %v5705_v25  ;;  %v1222_v57 = vsel %vm840_vm1, %v1220_v46, %v1221_v47  ;;  %v1610_v25 = vrot.slane %v1608_v18, 2  ;;  %v844_v46 = vrot.slane %v6156_v55, 1 }
  0x49   : > { %1843 = vmatpush.bf16.msrb.mxu0 %v5772_v26 }
  0x4a   : > { %1328 = vmatpush.bf16.msrb.mxu3 %v5747_v16 }
  0x4b   : > { %595 = vmatmul.bf16.gmra.mxu1 %v410_v3  ;;  %620 = vmatmul.bf16.gmra.mxu2 %v450_v5  ;;  %v1223_v3 = vrot.slane %v5731_v0, 1  ;;  %v5755_v5 = vld [vmem:[%s6057_s25 + $0x10] sm:$0xff] }
  0x4c   : > { %2481 = vmatpush.bf16.msra.mxu2 %v5812_v54  ;;  %2096 = vmatpush.bf16.msra.mxu1 %v5787_v58  ;;  %v1613_v22 = vshrl.u32 %v5755_v5, 16  ;;  %v1616_v24 = vshll.u32 %v5755_v5, 16 }
  0x4d   : > { %645 = vmatmul.bf16.gmra.mxu3 %v485_v17  ;;  %3134 = vmatpush.bf16.msra.mxu0 %v5828_v59  ;;  %v1605_v17 = vshrl.u32 %v1584_v9, 16  ;;  %v5757_v59 = vld [vmem:[%s6057_s25 + $0x20] sm:$0xff] }
  0x4e   : > { %570 = vmatmul.bf16.gmra.mxu0 %v370_v12  ;;  %2874 = vmatpush.bf16.msra.mxu3 %v5820_v35  ;;  %v1224_v12 = vsel %vm840_vm1, %v1221_v47, %v1223_v3  ;;  %v1615_v16 = vrot.slane %v1613_v22, 1  ;;  %v1618_v26 = vrot.slane %v1616_v24, 2  ;;  %v5733_v47 = vld [vmem:[%s6057_s25 + $0x28] sm:$0xff]  ;;  %v5827_v35 = vld [vmem:[%s7899_s1 + $0x230] sm:$0xff]  ;;  %v1631_v61 = vshrl.u32 %v5757_v59, 16 }
  0x4f   : > { %v1607_v23 = vrot.slane %v1605_v17, 1  ;;  %v1634_v63 = vshll.u32 %v5757_v59, 16  ;;  %v5760_v59 = vld [vmem:[%s6057_s25 + $0x38] sm:$0xff] }
  0x50   : > { %v1619_v29 = vor.u32 %v1618_v26, %v1615_v16  ;;  %2482 = vmatpush.bf16.msra.mxu2 %v5811_v39  ;;  %2097 = vmatpush.bf16.msra.mxu1 %v5786_v42  ;;  %v1633_v0 = vrot.slane %v1631_v61, 1  ;;  %v5785_v26 = vld [vmem:[%s7899_s1 + $0x168] sm:$0xff] }
  0x51   : > { %v1611_v28 = vor.u32 %v1610_v25, %v1607_v23  ;;  %3135 = vmatpush.bf16.msra.mxu0 %v5827_v35  ;;  %v1636_v21 = vrot.slane %v1634_v63, 2  ;;  %v5818_v23 = vld [vmem:[%s7899_s1 + $0x1e8] sm:$0xff]  ;;  %v5735_v25 = vld [vmem:[%s6057_s25 + $0x38] sm:$0xff]  ;;  %v1658_v63 = vshrl.u32 %v5760_v59, 16 }
  0x52   : > { %2875 = vmatpush.bf16.msra.mxu3 %v5819_v41 }
  0x53   : > { %v1620_v36 = vsel %vm1603_vm2, %v1611_v28, %v1619_v29  ;;  %v1637_v5 = vor.u32 %v1636_v21, %v1633_v0  ;;  %v1661_v0 = vshll.u32 %v5760_v59, 16 }
  0x54   : > { %2483 = vmatpush.bf16.msra.mxu2 %v5810_v33  ;;  %2098 = vmatpush.bf16.msra.mxu1 %v5785_v26  ;;  %v5817_v33 = vld [vmem:[%s7899_s1 + $0x1e0] sm:$0xff] }
  0x55   : > { %v5784_v26 = vld [vmem:[%s7899_s1 + $0x160] sm:$0xff] }
  0x56   : > { %2876 = vmatpush.bf16.msra.mxu3 %v5818_v23 }
  0x58   : > { %2099 = vmatpush.bf16.msra.mxu1 %v5784_v26 }
  0x5a   : > { %2877 = vmatpush.bf16.msra.mxu3 %v5817_v33 }
  0x5b   : > { %600 = vmatmul.bf16.gmra.mxu1 %v418_v44  ;;  %625 = vmatmul.bf16.gmra.mxu2 %v458_v45  ;;  %v1624_v44 = vrot.slane %v1622_v43, 1 }
  0x5d   : > { %1329 = vmatmul.bf16.vlgmr.msrb.gmra.mxu3 %v1222_v57  ;;  %v1227_v57 = vrot.slane %v5733_v47, 1 }
  0x5e   : > { %575 = vmatmul.bf16.gmra.mxu0 %v378_v48 }
  0x6b   : > { %605 = vmatmul.bf16.gmra.mxu1 %v6249_v56  ;;  %630 = vmatmul.bf16.gmra.mxu2 %v466_v2  ;;  %v842_v56 = vrot.slane %v6083_v13, 1  ;;  %v846_v2 = vrot.slane %v6225_v40, 1 }
  0x6d   : > { %1334 = vmatmul.bf16.gmra.mxu3 %v1224_v12  ;;  %v843_v30 = vsel %vm840_vm1, %v841_v27, %v842_v56  ;;  %v845_v54 = vsel %vm840_vm1, %v842_v56, %v844_v46  ;;  %v847_v9 = vsel %vm840_vm1, %v844_v46, %v846_v2 }
  0x6e   : > { %580 = vmatmul.bf16.gmra.mxu0 %v386_v20  ;;  %v5732_v20 = vld [vmem:[%s6057_s25 + $0x20] sm:$0xff] }
  0x6f   : > { %v1225_v34 = vrot.slane %v5732_v20, 1  ;;  %v1231_v20 = vrot.slane %v5735_v25, 1  ;;  %v5761_v25 = vld [vmem:[%s6057_s25 + $0x40] sm:$0xff] }
  0x71   : > { %v1226_v38 = vsel %vm840_vm1, %v1223_v3, %v1225_v34  ;;  %v1228_v60 = vsel %vm840_vm1, %v1225_v34, %v1227_v57  ;;  %v5734_v3 = vld [vmem:[%s6057_s25 + $0x30] sm:$0xff] }
  0x72   : > { %v1229_v11 = vrot.slane %v5734_v3, 1 }
  0x74   : > { %v1230_v14 = vsel %vm840_vm1, %v1227_v57, %v1229_v11  ;;  %v1232_v34 = vsel %vm840_vm1, %v1229_v11, %v1231_v20 }
  0x7b   : > { %728 = vmatmul.bf16.vlgmr.msrb.gmra.mxu1 %v6069_v7  ;;  %950 = vmatmul.bf16.vlgmr.msrb.gmra.mxu2 %v843_v30  ;;  %v1625_v7 = vshll.u32 %v5756_v37, 16  ;;  %v5759_v30 = vld [vmem:[%s6057_s25 + $0x30] sm:$0xff] }
  0x7c   : > { %v1649_v37 = vshrl.u32 %v5759_v30, 16 }
  0x7d   : > { %1339 = vmatmul.bf16.gmra.mxu3 %v1226_v38  ;;  %v1627_v45 = vrot.slane %v1625_v7, 2  ;;  %v1652_v38 = vshll.u32 %v5759_v30, 16 }
  0x7e   : > { %1844 = vmatmul.bf16.vlgmr.msrb.gmra.mxu0 %v1620_v36  ;;  %v5826_v36 = vld [vmem:[%s7899_s1 + $0x228] sm:$0xff] }
  0x7f   : > { %v1628_v48 = vor.u32 %v1627_v45, %v1624_v44  ;;  %3136 = vmatpush.bf16.msra.mxu0 %v5826_v36  ;;  %v1654_v43 = vrot.slane %v1652_v38, 2  ;;  %v850_v44 = vrot.slane %v6060_v4, 1  ;;  %v5736_v45 = vld [vmem:[%s6057_s25 + $0x40] sm:$0xff] }
  0x80   : > { %v1233_v57 = vrot.slane %v5736_v45, 1 }
  0x81   : > { %v1629_v58 = vsel %vm1603_vm2, %v1619_v29, %v1628_v48  ;;  %v1638_v12 = vsel %vm1603_vm2, %v1628_v48, %v1637_v5 }
  0x82   : > { %v1234_v61 = vsel %vm840_vm1, %v1231_v20, %v1233_v57  ;;  %v1667_v20 = vshrl.u32 %v5761_v25, 16 }
  0x8b   : > { %733 = vmatmul.bf16.gmra.mxu1 %v6083_v13  ;;  %955 = vmatmul.bf16.gmra.mxu2 %v845_v54  ;;  %v5758_v13 = vld [vmem:[%s6057_s25 + $0x28] sm:$0xff] }
  0x8c   : > { %v1640_v17 = vshrl.u32 %v5758_v13, 16  ;;  %v1643_v18 = vshll.u32 %v5758_v13, 16 }
  0x8d   : > { %1344 = vmatmul.bf16.gmra.mxu3 %v1228_v60 }
  0x8e   : > { %1849 = vmatmul.bf16.gmra.mxu0 %v1629_v58  ;;  %v1642_v22 = vrot.slane %v1640_v17, 1  ;;  %v1645_v24 = vrot.slane %v1643_v18, 2  ;;  %v5809_v17 = vld [vmem:[%s7899_s1 + $0x1a0] sm:$0xff] }
  0x8f   : > { %2484 = vmatpush.bf16.msra.mxu2 %v5809_v17 }
  0x90   : > { %v1646_v16 = vor.u32 %v1645_v24, %v1642_v22 }
  0x92   : > { %v1647_v29 = vsel %vm1603_vm2, %v1637_v5, %v1646_v16  ;;  %v1660_v5 = vrot.slane %v1658_v63, 1  ;;  %v5762_v63 = vld [vmem:[%s6057_s25 + $0x48] sm:$0xff] }
  0x9b   : > { %738 = vmatmul.bf16.gmra.mxu1 %v6156_v55  ;;  %960 = vmatmul.bf16.gmra.mxu2 %v847_v9  ;;  %v848_v55 = vrot.slane %v6242_v53, 1  ;;  %v1663_v9 = vrot.slane %v1661_v0, 2 }
  0x9d   : > { %1349 = vmatmul.bf16.gmra.mxu3 %v1230_v14  ;;  %v849_v56 = vsel %vm840_vm1, %v846_v2, %v848_v55  ;;  %v851_v54 = vsel %vm840_vm1, %v848_v55, %v850_v44  ;;  %v1664_v13 = vor.u32 %v1663_v9, %v1660_v5  ;;  %v1676_v9 = vshrl.u32 %v5762_v63, 16 }
  0x9e   : > { %1854 = vmatmul.bf16.gmra.mxu0 %v1638_v12  ;;  %v5737_v12 = vld [vmem:[%s6057_s25 + $0x48] sm:$0xff] }
  0x9f   : > { %v1235_v24 = vrot.slane %v5737_v12, 1  ;;  %v1679_v12 = vshll.u32 %v5762_v63, 16 }
  0xa1   : > { %v1681_v33 = vrot.slane %v1679_v12, 2 }
  0xa8   : > { %v6372_v27 = vpop.f32.mrf.mxu1 }
  0xab   : > { %v6375_v28 = vpop.f32.mrf.mxu0  ;;  %743 = vmatmul.bf16.gmra.mxu1 %v6225_v40  ;;  %965 = vmatmul.bf16.gmra.mxu2 %v849_v56  ;;  %v1651_v40 = vrot.slane %v1649_v37, 1  ;;  %v1236_v56 = vsel %vm840_vm1, %v1233_v57, %v1235_v24  ;;  %v1669_v37 = vrot.slane %v1667_v20, 1 }
  0xad   : > { %1354 = vmatmul.bf16.gmra.mxu3 %v1232_v34  ;;  %v1655_v46 = vor.u32 %v1654_v43, %v1651_v40  ;;  %v854_v43 = vrot.slane %v6140_v49, 1 }
  0xae   : > { %1859 = vmatmul.bf16.gmra.mxu0 %v1647_v29  ;;  %v6384_v39 = vpop.f32.mrf.mxu2  ;;  %v1670_v29 = vshll.u32 %v5761_v25, 16  ;;  %v856_v25 = vrot.slane %v6206_v31, 1 }
  0xaf   : > { %v1656_v58 = vsel %vm1603_vm2, %v1646_v16, %v1655_v46  ;;  %v1665_v55 = vsel %vm1603_vm2, %v1655_v46, %v1664_v13 }
  0xb0   : > { %v6386_v41 = vpop.f32.mrf.mxu1  ;;  %v6390_v7 = vpop.f32.mrf.mxu3  ;;  %v1672_v38 = vrot.slane %v1670_v29, 2  ;;  %v857_v20 = vsel %vm840_vm1, %v854_v43, %v856_v25 }
  0xb1   : > { %7917 = vst [vmem:[#allocation2_spill] sm:$0xff] %v6390_v7 }
  0xb2   : > { %v1673_v45 = vor.u32 %v1672_v38, %v1669_v37  ;;  %v5763_v38 = vld [vmem:[%s6057_s25 + $0x50] sm:$0xff] }
  0xb3   : > { %v6388_v42 = vpop.f32.mrf.mxu0  ;;  %v1685_v63 = vshrl.u32 %v5763_v38, 16 }
  0xb5   : > { %v1687_v12 = vrot.slane %v1685_v63, 1 }
  0xb6   : > { %v6394_v47 = vpop.f32.mrf.mxu2 }
  0xb8   : > { %v6396_v48 = vpop.f32.mrf.mxu1  ;;  %v6403_v60 = vpop.f32.mrf.mxu3 }
  0xb9   : > { %7918 = vst [vmem:[#allocation3_spill] sm:$0xff] %v6403_v60 }
  0xbb   : > { %v6399_v35 = vpop.f32.mrf.mxu0  ;;  %748 = vmatmul.bf16.gmra.mxu1 %v6242_v53  ;;  %970 = vmatmul.bf16.gmra.mxu2 %v851_v54  ;;  %v852_v53 = vrot.slane %v6072_v8, 1 }
  0xbd   : > { %1359 = vmatmul.bf16.gmra.mxu3 %v1234_v61  ;;  %v853_v22 = vsel %vm840_vm1, %v850_v44, %v852_v53  ;;  %v5738_v44 = vld [vmem:[%s6057_s25 + $0x50] sm:$0xff]  ;;  %v855_v57 = vsel %vm840_vm1, %v852_v53, %v854_v43  ;;  %v1674_v61 = vsel %vm1603_vm2, %v1664_v13, %v1673_v45  ;;  %v1678_v13 = vrot.slane %v1676_v9, 1  ;;  %v5816_v43 = vld [vmem:[%s7899_s1 + $0x1d8] sm:$0xff] }
  0xbe   : > { %1864 = vmatmul.bf16.gmra.mxu0 %v1656_v58  ;;  %v6407_v21 = vpop.f32.mrf.mxu2  ;;  %v1237_v58 = vrot.slane %v5738_v44, 1  ;;  %2878 = vmatpush.bf16.msra.mxu3 %v5816_v43 }
  0xbf   : > { %v1682_v26 = vor.u32 %v1681_v33, %v1678_v13  ;;  %v5824_v33 = vld [vmem:[%s7899_s1 + $0x218] sm:$0xff] }
  0xc0   : > { %v6409_v2 = vpop.f32.mrf.mxu1  ;;  %v6413_v11 = vpop.f32.mrf.mxu3  ;;  %v1238_v5 = vsel %vm840_vm1, %v1235_v24, %v1237_v58 }
  0xc1   : > { %7919 = vst [vmem:[#allocation4_spill] sm:$0xff] %v6413_v11  ;;  %v1683_v37 = vsel %vm1603_vm2, %v1673_v45, %v1682_v26 }
  0xc3   : > { %v6411_v3 = vpop.f32.mrf.mxu0 }
  0xc6   : > { %v6417_v14 = vpop.f32.mrf.mxu2 }
  0xc8   : > { %v6422_v18 = vpop.f32.mrf.mxu1  ;;  %v6432_v16 = vpop.f32.mrf.mxu3 }
  0xc9   : > { %7920 = vst [vmem:[#allocation5_spill] sm:$0xff] %v6432_v16 }
  0xcb   : > { %v6428_v23 = vpop.f32.mrf.mxu0  ;;  %753 = vmatmul.bf16.gmra.mxu1 %v6060_v4  ;;  %975 = vmatmul.bf16.gmra.mxu2 %v853_v22  ;;  %v5825_v4 = vld [vmem:[%s7899_s1 + $0x220] sm:$0xff] }
  0xcc   : > { %3137 = vmatpush.bf16.msra.mxu0 %v5825_v4 }
  0xcd   : > { %1364 = vmatmul.bf16.gmra.mxu3 %v1236_v56 }
  0xce   : > { %1869 = vmatmul.bf16.gmra.mxu0 %v1665_v55  ;;  %v6439_v30 = vpop.f32.mrf.mxu2 }
  0xd0   : > { %v6441_v34 = vpop.f32.mrf.mxu1  ;;  %v6448_v40 = vpop.f32.mrf.mxu3  ;;  %3138 = vmatpush.bf16.msra.mxu0 %v5824_v33 }
  0xd1   : > { %7921 = vst [vmem:[#allocation6_spill] sm:$0xff] %v6448_v40 }
  0xd3   : > { %v6446_v36 = vpop.f32.mrf.mxu0 }
  0xd6   : > { %v6452_v46 = vpop.f32.mrf.mxu2 }
  0xd8   : > { %v6454_v54 = vpop.f32.mrf.mxu1  ;;  %v6461_v0 = vpop.f32.mrf.mxu3 }
  0xd9   : > { %7922 = vst [vmem:[#allocation7_spill] sm:$0xff] %v6461_v0  ;;  %v5764_v0 = vld [vmem:[%s6057_s25 + $0x58] sm:$0xff] }
  0xda   : > { %v1697_v33 = vshll.u32 %v5764_v0, 16 }
  0xdb   : > { %v6457_v59 = vpop.f32.mrf.mxu0  ;;  %758 = vmatmul.bf16.gmra.mxu1 %v6072_v8  ;;  %980 = vmatmul.bf16.gmra.mxu2 %v855_v57  ;;  %v5739_v8 = vld [vmem:[%s6057_s25 + $0x58] sm:$0xff] }
  0xdc   : > { %v1239_v29 = vrot.slane %v5739_v8, 1  ;;  %v5808_v57 = vld [vmem:[%s7899_s1 + $0x198] sm:$0xff]  ;;  %v1699_v7 = vrot.slane %v1697_v33, 2 }
  0xdd   : > { %1369 = vmatmul.bf16.gmra.mxu3 %v1238_v5  ;;  %v1688_v5 = vshll.u32 %v5763_v38, 16  ;;  %2485 = vmatpush.bf16.msra.mxu2 %v5808_v57 }
  0xde   : > { %1874 = vmatmul.bf16.gmra.mxu0 %v1674_v61  ;;  %v6465_v17 = vpop.f32.mrf.mxu2  ;;  %v1240_v61 = vsel %vm840_vm1, %v1237_v58, %v1239_v29  ;;  %v5783_v58 = vld [vmem:[%s7899_s1 + $0x158] sm:$0xff] }
  0xdf   : > { %v1690_v13 = vrot.slane %v1688_v5, 2  ;;  %2100 = vmatpush.bf16.msra.mxu1 %v5783_v58 }
  0xe0   : > { %v6467_v53 = vpop.f32.mrf.mxu1  ;;  %v1330_v55 = vpop.f32.mrf.mxu3 }
  0xe1   : > { %v1691_v38 = vor.u32 %v1690_v13, %v1687_v12  ;;  %v1694_v13 = vshrl.u32 %v5764_v0, 16 }
  0xe3   : > { %v6469_v22 = vpop.f32.mrf.mxu0  ;;  %v1692_v1 = vsel %vm1603_vm2, %v1682_v26, %v1691_v38  ;;  %v1696_v60 = vrot.slane %v1694_v13, 1 }
  0xe6   : > { %v6473_v56 = vpop.f32.mrf.mxu2 }
  0xe8   : > { %v6475_v24 = vpop.f32.mrf.mxu1  ;;  %v1332_v44 = vpop.f32.mrf.mxu3 }
  0xeb   : > { %v6478_v4 = vpop.f32.mrf.mxu0  ;;  %763 = vmatmul.bf16.gmra.mxu1 %v6140_v49  ;;  %985 = vmatmul.bf16.gmra.mxu2 %v857_v20  ;;  %v858_v20 = vrot.slane %v6193_v19, 1 }
  0xed   : > { %1374 = vmatmul.bf16.gmra.mxu3 %v1240_v61  ;;  %v859_v43 = vsel %vm840_vm1, %v856_v25, %v858_v20 }
  0xee   : > { %1879 = vmatmul.bf16.gmra.mxu0 %v1683_v37  ;;  %v6490_v45 = vpop.f32.mrf.mxu2  ;;  %v5740_v37 = vld [vmem:[%s6057_s25 + $0x60] sm:$0xff] }
  0xef   : > { %7923 = vst [vmem:[#allocation8_spill] sm:$0xff] %v6490_v45  ;;  %v1241_v63 = vrot.slane %v5740_v37, 1 }
  0xf0   : > { %v6492_v49 = vpop.f32.mrf.mxu1  ;;  %v1335_v8 = vpop.f32.mrf.mxu3 }
  0xf1   : > { %v1242_v58 = vsel %vm840_vm1, %v1239_v29, %v1241_v63  ;;  %v5741_v29 = vld [vmem:[%s6057_s25 + $0x68] sm:$0xff] }
  0xf3   : > { %v6494_v9 = vpop.f32.mrf.mxu0 }
  0xf6   : > { %v6504_v57 = vpop.f32.mrf.mxu2 }
  0xf7   : > { %7924 = vst [vmem:[#allocation9_spill] sm:$0xff] %v6504_v57 }
  0xf8   : > { %v729_v61 = vpop.f32.mrf.mxu1  ;;  %v6509_v40 = vpop.f32.mrf.mxu3 }
  0xf9   : > { %v730_v12 = vadd.f32 %v729_v61, %v6375_v28  ;;  %v1700_v61 = vor.u32 %v1699_v7, %v1696_v60 }
  0xfb   : > { %v1845_v5 = vpop.f32.mrf.mxu0  ;;  %768 = vmatmul.bf16.gmra.mxu1 %v6206_v31  ;;  %990 = vmatmul.bf16.gmra.mxu2 %v859_v43  ;;  %v1701_v33 = vsel %vm1603_vm2, %v1691_v38, %v1700_v61 }
  0xfd   : > { %1379 = vmatmul.bf16.gmra.mxu3 %v1242_v58 }
  0xfe   : > { %1884 = vmatmul.bf16.gmra.mxu0 %v1692_v1  ;;  %v951_v16 = vpop.f32.mrf.mxu2  ;;  %v860_v1 = vrot.slane %v6066_v6, 1 }
  0xff   : > { %v1041_v25 = vadd.f32 %v951_v16, %v730_v12 }
 0x100   : > { %v731_v37 = vpop.f32.mrf.mxu1  ;;  %v6514_v57 = vpop.f32.mrf.mxu3  ;;  %v861_v58 = vsel %vm840_vm1, %v858_v20, %v860_v1 }
 0x101   : > { %v1420_v11 = vadd.f32 %v1330_v55, %v1041_v25  ;;  %v732_v28 = vadd.f32 %v731_v37, %v6388_v42  ;;  %v1243_v55 = vrot.slane %v5741_v29, 1  ;;  %v5765_v25 = vld [vmem:[%s6057_s25 + $0x60] sm:$0xff] }
 0x102   : > { %v1703_v60 = vshrl.u32 %v5765_v25, 16 }
 0x103   : > { %v1847_v26 = vpop.f32.mrf.mxu0  ;;  %v6516_v31 = vadd.f32 %v1845_v5, %v1420_v11  ;;  %v1244_v42 = vsel %vm840_vm1, %v1241_v63, %v1243_v55  ;;  %v1706_v11 = vshll.u32 %v5765_v25, 16  ;;  %v5815_v63 = vld [vmem:[%s7899_s1 + $0x1d0] sm:$0xff] }
 0x104   : > { %v1705_v29 = vrot.slane %v1703_v60, 1  ;;  %2879 = vmatpush.bf16.msra.mxu3 %v5815_v63 }
 0x106   : > { %v953_v0 = vpop.f32.mrf.mxu2 }
 0x107   : > { %v1042_v43 = vadd.f32 %v953_v0, %v732_v28  ;;  %v1708_v28 = vrot.slane %v1706_v11, 2  ;;  %v862_v0 = vrot.slane %v6076_v10, 1  ;;  %v5823_v10 = vld [vmem:[%s7899_s1 + $0x210] sm:$0xff] }
 0x108   : > { %v734_v16 = vpop.f32.mrf.mxu1  ;;  %v6524_v45 = vpop.f32.mrf.mxu3  ;;  %3139 = vmatpush.bf16.msra.mxu0 %v5823_v10 }
 0x109   : > { %v1421_v12 = vadd.f32 %v1332_v44, %v1042_v43  ;;  %v735_v7 = vadd.f32 %v734_v16, %v6399_v35  ;;  %v5782_v35 = vld [vmem:[%s7899_s1 + $0x150] sm:$0xff] }
 0x10a   : > { %2101 = vmatpush.bf16.msra.mxu1 %v5782_v35  ;;  %v5742_v43 = vld [vmem:[%s6057_s25 + $0x70] sm:$0xff] }
 0x10b   : > { %v1850_v13 = vpop.f32.mrf.mxu0  ;;  %773 = vmatmul.bf16.gmra.mxu1 %v6193_v19  ;;  %995 = vmatmul.bf16.gmra.mxu2 %v861_v58  ;;  %v6527_v6 = vadd.f32 %v1847_v26, %v1421_v12  ;;  %v5807_v19 = vld [vmem:[%s7899_s1 + $0x190] sm:$0xff]  ;;  %v1709_v58 = vor.u32 %v1708_v28, %v1705_v29 }
 0x10c   : > { %2486 = vmatpush.bf16.msra.mxu2 %v5807_v19 }
 0x10d   : > { %1384 = vmatmul.bf16.gmra.mxu3 %v1244_v42  ;;  %v863_v42 = vsel %vm840_vm1, %v860_v1, %v862_v0 }
 0x10e   : > { %1889 = vmatmul.bf16.gmra.mxu0 %v1701_v33  ;;  %v956_v20 = vpop.f32.mrf.mxu2 }
 0x10f   : > { %v1043_v44 = vadd.f32 %v956_v20, %v735_v7  ;;  %v1245_v7 = vrot.slane %v5742_v43, 1  ;;  %v5766_v20 = vld [vmem:[%s6057_s25 + $0x68] sm:$0xff] }
 0x110   : > { %v736_v38 = vpop.f32.mrf.mxu1  ;;  %v6540_v26 = vpop.f32.mrf.mxu3 }
 0x111   : > { %v1422_v5 = vadd.f32 %v1335_v8, %v1043_v44  ;;  %v737_v16 = vadd.f32 %v736_v38, %v6411_v3  ;;  %v5973_v3 = vld [vmem:[%s6057_s25 + $0x50] sm:$0xff]  ;;  %v1246_v1 = vsel %vm840_vm1, %v1243_v55, %v1245_v7 }
 0x113   : > { %v1852_v37 = vpop.f32.mrf.mxu0  ;;  %v6542_v8 = vadd.f32 %v1850_v13, %v1422_v5  ;;  %v1710_v13 = vsel %vm1603_vm2, %v1700_v61, %v1709_v58  ;;  %v1712_v5 = vshrl.u32 %v5766_v20, 16  ;;  %v1715_v61 = vshll.u32 %v5766_v20, 16 }
 0x115   : > { %v1714_v43 = vrot.slane %v1712_v5, 1  ;;  %v5974_v5 = vld [vmem:[%s6057_s25 + $0x58] sm:$0xff] }
 0x116   : > { %v958_v12 = vpop.f32.mrf.mxu2 }
 0x117   : > { %v1044_v33 = vadd.f32 %v958_v12, %v737_v16  ;;  %v5743_v12 = vld [vmem:[%s6057_s25 + $0x78] sm:$0xff] }
 0x118   : > { %v739_v25 = vpop.f32.mrf.mxu1  ;;  %v6554_v44 = vpop.f32.mrf.mxu3  ;;  %v1247_v20 = vrot.slane %v5743_v12, 1 }
 0x119   : > { %v1423_v60 = vadd.f32 %v6509_v40, %v1044_v33  ;;  %v740_v40 = vadd.f32 %v739_v25, %v6428_v23  ;;  %v864_v23 = vrot.slane %v6149_v52, 1 }
 0x11b   : > { %v1855_v11 = vpop.f32.mrf.mxu0  ;;  %778 = vmatmul.bf16.gmra.mxu1 %v5973_v3  ;;  %1000 = vmatmul.bf16.gmra.mxu2 %v863_v42  ;;  %v6557_v38 = vadd.f32 %v1852_v37, %v1423_v60  ;;  %v1717_v37 = vrot.slane %v1715_v61, 2 }
 0x11d   : > { %1389 = vmatmul.bf16.gmra.mxu3 %v1246_v1  ;;  %v1718_v25 = vor.u32 %v1717_v37, %v1714_v43 }
 0x11e   : > { %1894 = vmatmul.bf16.gmra.mxu0 %v1710_v13  ;;  %v961_v29 = vpop.f32.mrf.mxu2 }
 0x11f   : > { %v1045_v28 = vadd.f32 %v961_v29, %v740_v40  ;;  %v1719_v1 = vsel %vm1603_vm2, %v1709_v58, %v1718_v25  ;;  %v5767_v40 = vld [vmem:[%s6057_s25 + $0x70] sm:$0xff] }
 0x120   : > { %v741_v19 = vpop.f32.mrf.mxu1  ;;  %v6562_v16 = vpop.f32.mrf.mxu3  ;;  %v1724_v29 = vshll.u32 %v5767_v40, 16 }
 0x121   : > { %v1424_v63 = vadd.f32 %v6514_v57, %v1045_v28  ;;  %v742_v33 = vadd.f32 %v741_v19, %v6446_v36  ;;  %v865_v57 = vsel %vm840_vm1, %v862_v0, %v864_v23  ;;  %v1248_v36 = vsel %vm840_vm1, %v1245_v7, %v1247_v20 }
 0x122   : > { %v1721_v0 = vshrl.u32 %v5767_v40, 16  ;;  %v1726_v37 = vrot.slane %v1724_v29, 2 }
 0x123   : > { %v1857_v35 = vpop.f32.mrf.mxu0  ;;  %v6564_v55 = vadd.f32 %v1855_v11, %v1424_v63 }
 0x124   : > { %v1723_v43 = vrot.slane %v1721_v0, 1 }
 0x126   : > { %v963_v42 = vpop.f32.mrf.mxu2 }
 0x127   : > { %v1046_v60 = vadd.f32 %v963_v42, %v742_v33  ;;  %v5744_v33 = vld [vmem:[%s6057_s25 + $0x80] sm:$0xff] }
 0x128   : > { %v744_v13 = vpop.f32.mrf.mxu1  ;;  %v6573_v11 = vpop.f32.mrf.mxu3  ;;  %v1249_v40 = vrot.slane %v5744_v33, 1 }
 0x129   : > { %v1425_v10 = vadd.f32 %v6524_v45, %v1046_v60  ;;  %v745_v61 = vadd.f32 %v744_v13, %v6457_v59  ;;  %v5814_v59 = vld [vmem:[%s7899_s1 + $0x1c8] sm:$0xff]  ;;  %v1727_v60 = vor.u32 %v1726_v37, %v1723_v43 }
 0x12a   : > { %2880 = vmatpush.bf16.msra.mxu3 %v5814_v59 }
 0x12b   : > { %v1860_v3 = vpop.f32.mrf.mxu0  ;;  %783 = vmatmul.bf16.gmra.mxu1 %v5974_v5  ;;  %1005 = vmatmul.bf16.gmra.mxu2 %v865_v57  ;;  %v6576_v52 = vadd.f32 %v1857_v35, %v1425_v10  ;;  %v5806_v35 = vld [vmem:[%s7899_s1 + $0x188] sm:$0xff] }
 0x12c   : > { %2487 = vmatpush.bf16.msra.mxu2 %v5806_v35 }
 0x12d   : > { %1394 = vmatmul.bf16.gmra.mxu3 %v1248_v36 }
 0x12e   : > { %1899 = vmatmul.bf16.gmra.mxu0 %v1719_v1  ;;  %v966_v45 = vpop.f32.mrf.mxu2 }
 0x12f   : > { %v1047_v28 = vadd.f32 %v966_v45, %v745_v61  ;;  %v1728_v61 = vsel %vm1603_vm2, %v1718_v25, %v1727_v60 }
 0x130   : > { %v746_v58 = vpop.f32.mrf.mxu1  ;;  %v6587_v7 = vpop.f32.mrf.mxu3 }
 0x131   : > { %v1426_v19 = vadd.f32 %v6540_v26, %v1047_v28  ;;  %v866_v26 = vrot.slane %v6209_v32, 1  ;;  %v747_v42 = vadd.f32 %v746_v58, %v6469_v22  ;;  %v5781_v32 = vld [vmem:[%s7899_s1 + $0x148] sm:$0xff]  ;;  %v5975_v22 = vld [vmem:[%s6057_s25 + $0x60] sm:$0xff] }
 0x132   : > { %2102 = vmatpush.bf16.msra.mxu1 %v5781_v32 }
 0x133   : > { %v1862_v63 = vpop.f32.mrf.mxu0  ;;  %v6589_v12 = vadd.f32 %v1860_v3, %v1426_v19  ;;  %v867_v1 = vsel %vm840_vm1, %v864_v23, %v866_v26  ;;  %v5768_v3 = vld [vmem:[%s6057_s25 + $0x78] sm:$0xff]  ;;  %v1250_v23 = vsel %vm840_vm1, %v1247_v20, %v1249_v40 }
 0x134   : > { %v1730_v45 = vshrl.u32 %v5768_v3, 16  ;;  %v1733_v28 = vshll.u32 %v5768_v3, 16 }
 0x136   : > { %v968_v13 = vpop.f32.mrf.mxu2  ;;  %v1732_v35 = vrot.slane %v1730_v45, 1  ;;  %v1735_v20 = vrot.slane %v1733_v28, 2 }
 0x137   : > { %v1048_v57 = vadd.f32 %v968_v13, %v747_v42  ;;  %v5745_v42 = vld [vmem:[%s6057_s25 + $0x88] sm:$0xff] }
 0x138   : > { %v749_v10 = vpop.f32.mrf.mxu1  ;;  %v6601_v0 = vpop.f32.mrf.mxu3 }
 0x139   : > { %v1427_v5 = vadd.f32 %v6554_v44, %v1048_v57  ;;  %v5822_v44 = vld [vmem:[%s7899_s1 + $0x208] sm:$0xff]  ;;  %v750_v25 = vadd.f32 %v749_v10, %v6478_v4  ;;  %v868_v4 = vrot.slane %v6263_v15, 1  ;;  %v1736_v57 = vor.u32 %v1735_v20, %v1732_v35 }
 0x13a   : > { %3140 = vmatpush.bf16.msra.mxu0 %v5822_v44  ;;  %v5976_v44 = vld [vmem:[%s6057_s25 + $0x68] sm:$0xff] }
 0x13b   : > { %v1865_v36 = vpop.f32.mrf.mxu0  ;;  %788 = vmatmul.bf16.gmra.mxu1 %v5975_v22  ;;  %1010 = vmatmul.bf16.gmra.mxu2 %v867_v1  ;;  %v6604_v29 = vadd.f32 %v1862_v63, %v1427_v5  ;;  %v1737_v22 = vsel %vm1603_vm2, %v1727_v60, %v1736_v57 }
 0x13d   : > { %1399 = vmatmul.bf16.gmra.mxu3 %v1250_v23  ;;  %v5769_v23 = vld [vmem:[%s6057_s25 + $0x80] sm:$0xff] }
 0x13e   : > { %1904 = vmatmul.bf16.gmra.mxu0 %v1728_v61  ;;  %v971_v58 = vpop.f32.mrf.mxu2  ;;  %v1251_v61 = vrot.slane %v5745_v42, 1  ;;  %v1739_v45 = vshrl.u32 %v5769_v23, 16 }
 0x13f   : > { %v1049_v19 = vadd.f32 %v971_v58, %v750_v25 }
 0x140   : > { %v751_v43 = vpop.f32.mrf.mxu1  ;;  %v6612_v59 = vpop.f32.mrf.mxu3 }
 0x141   : > { %v1428_v63 = vadd.f32 %v6562_v16, %v1049_v19  ;;  %v752_v13 = vadd.f32 %v751_v43, %v6494_v9  ;;  %v869_v16 = vsel %vm840_vm1, %v866_v26, %v868_v4  ;;  %v1252_v9 = vsel %vm840_vm1, %v1249_v40, %v1251_v61  ;;  %v5977_v40 = vld [vmem:[%s6057_s25 + $0x78] sm:$0xff] }
 0x142   : > { %v870_v42 = vrot.slane %v5977_v40, 1 }
 0x143   : > { %v1867_v37 = vpop.f32.mrf.mxu0  ;;  %v6614_v33 = vadd.f32 %v1865_v36, %v1428_v63  ;;  %v1741_v63 = vrot.slane %v1739_v45, 1 }
 0x146   : > { %v973_v10 = vpop.f32.mrf.mxu2 }
 0x147   : > { %v1050_v1 = vadd.f32 %v973_v10, %v752_v13  ;;  %v6637_v13 = vld [vmem:[%s6057_s25 + $0x90] sm:$0xff] }
 0x148   : > { %v754_v5 = vpop.f32.mrf.mxu1  ;;  %v6623_v36 = vpop.f32.mrf.mxu3 }
 0x149   : > { %v1429_v3 = vadd.f32 %v6573_v11, %v1050_v1  ;;  %v755_v26 = vadd.f32 %v754_v5, %v6372_v27  ;;  %v1742_v11 = vshll.u32 %v5769_v23, 16 }
 0x14b   : > { %v1870_v32 = vpop.f32.mrf.mxu0  ;;  %793 = vmatmul.bf16.gmra.mxu1 %v5976_v44  ;;  %1015 = vmatmul.bf16.gmra.mxu2 %v869_v16  ;;  %v6626_v25 = vadd.f32 %v1867_v37, %v1429_v3  ;;  %v1744_v35 = vrot.slane %v1742_v11, 2  ;;  %v1253_v3 = vrot.slane %v6637_v13, 1  ;;  %v5770_v44 = vld [vmem:[%s6057_s25 + $0x88] sm:$0xff] }
 0x14c   : > { %v1748_v11 = vshrl.u32 %v5770_v44, 16 }
 0x14d   : > { %1404 = vmatmul.bf16.gmra.mxu3 %v1252_v9  ;;  %v1745_v10 = vor.u32 %v1744_v35, %v1741_v63  ;;  %v5805_v9 = vld [vmem:[%s7899_s1 + $0x180] sm:$0xff] }
 0x14e   : > { %1909 = vmatmul.bf16.gmra.mxu0 %v1737_v22  ;;  %v976_v28 = vpop.f32.mrf.mxu2  ;;  %2488 = vmatpush.bf16.msra.mxu2 %v5805_v9 }
 0x14f   : > { %v1051_v58 = vadd.f32 %v976_v28, %v755_v26  ;;  %v1751_v28 = vshll.u32 %v5770_v44, 16 }
 0x150   : > { %v756_v60 = vpop.f32.mrf.mxu1  ;;  %v6631_v37 = vpop.f32.mrf.mxu3 }
 0x151   : > { %v1430_v19 = vadd.f32 %v6587_v7, %v1051_v58  ;;  %v757_v27 = vadd.f32 %v756_v60, %v6386_v41  ;;  %v871_v7 = vsel %vm840_vm1, %v868_v4, %v870_v42  ;;  %v5813_v41 = vld [vmem:[%s7899_s1 + $0x1c0] sm:$0xff]  ;;  %v1753_v35 = vrot.slane %v1751_v28, 2 }
 0x152   : > { %2881 = vmatpush.bf16.msra.mxu3 %v5813_v41 }
 0x153   : > { %v1872_v43 = vpop.f32.mrf.mxu0  ;;  %v6633_v20 = vadd.f32 %v1870_v32, %v1430_v19  ;;  %v1746_v32 = vsel %vm1603_vm2, %v1736_v57, %v1745_v10  ;;  %v1254_v57 = vsel %vm840_vm1, %v1251_v61, %v1253_v3  ;;  %v5821_v61 = vld [vmem:[%s7899_s1 + $0x200] sm:$0xff] }
 0x154   : > { %3141 = vmatpush.bf16.msra.mxu0 %v5821_v61 }
 0x156   : > { %v978_v1 = vpop.f32.mrf.mxu2 }
 0x157   : > { %v1052_v5 = vadd.f32 %v978_v1, %v757_v27  ;;  %v5978_v27 = vld [vmem:[%s6057_s25 + $0x80] sm:$0xff] }
 0x158   : > { %v759_v16 = vpop.f32.mrf.mxu1  ;;  %v6651_v26 = vpop.f32.mrf.mxu3  ;;  %v872_v1 = vrot.slane %v5978_v27, 1 }
 0x159   : > { %v1431_v22 = vadd.f32 %v6601_v0, %v1052_v5  ;;  %v5780_v0 = vld [vmem:[%s7899_s1 + $0x140] sm:$0xff]  ;;  %v760_v45 = vadd.f32 %v759_v16, %v6396_v48 }
 0x15a   : > { %2103 = vmatpush.bf16.msra.mxu1 %v5780_v0  ;;  %v5771_v0 = vld [vmem:[%s6057_s25 + $0x90] sm:$0xff] }
 0x15b   : > { %v1875_v23 = vpop.f32.mrf.mxu0  ;;  %798 = vmatmul.bf16.gmra.mxu1 %v6263_v15  ;;  %1020 = vmatmul.bf16.gmra.mxu2 %v871_v7  ;;  %v6657_v4 = vadd.f32 %v1872_v43, %v1431_v22  ;;  %v1750_v43 = vrot.slane %v1748_v11, 1 }
 0x15d   : > { %1409 = vmatmul.bf16.gmra.mxu3 %v1254_v57  ;;  %v2231_v57 = vld [vmem:[%s6057_s25 + $0x10] sm:$0xc] }
 0x15e   : > { %1914 = vmatmul.bf16.gmra.mxu0 %v1746_v32  ;;  %v981_v58 = vpop.f32.mrf.mxu2  ;;  %v873_v32 = vsel %vm840_vm1, %v870_v42, %v872_v1  ;;  %v2322_v11 = vunpack.c.l.b16 %v2231_v57  ;;  %v6685_v42 = vld [vmem:[%s6057_s25 + $0x18] sm:$0xff] }
 0x15f   : > { %v1053_v15 = vadd.f32 %v981_v58, %v760_v45  ;;  %v1757_v58 = vshrl.u32 %v5771_v0, 16  ;;  %v2650_v61 = vshll.u32 %v6685_v42, 16 }
 0x160   : > { %v761_v60 = vpop.f32.mrf.mxu1  ;;  %v6665_v48 = vpop.f32.mrf.mxu3 }
 0x161   : > { %v1432_v19 = vadd.f32 %v6612_v59, %v1053_v15  ;;  %v762_v5 = vadd.f32 %v761_v60, %v6409_v2  ;;  %v1754_v59 = vor.u32 %v1753_v35, %v1750_v43  ;;  %v1760_v15 = vshll.u32 %v5771_v0, 16 }
 0x162   : > { %v2647_v35 = vshrl.u32 %v6685_v42, 16  ;;  %v2652_v57 = vrot.slane %v2650_v61, 3 }
 0x163   : > { %v1877_v63 = vpop.f32.mrf.mxu0  ;;  %v6667_v13 = vadd.f32 %v1875_v23, %v1432_v19  ;;  %v1755_v41 = vsel %vm1603_vm2, %v1745_v10, %v1754_v59  ;;  %v6677_v23 = vld [vmem:[%s6057_s25 + $0x14] sm:$0xf] }
 0x164   : > { %v7903_v2 = vunpack.c.l.b16 %v6677_v23  ;;  %v2649_v0 = vrot.slane %v2647_v35, 2 }
 0x166   : > { %v983_v16 = vpop.f32.mrf.mxu2 }
 0x167   : > { %v1054_v7 = vadd.f32 %v983_v16, %v762_v5 }
 0x168   : > { %v764_v22 = vpop.f32.mrf.mxu1  ;;  %v6679_v45 = vpop.f32.mrf.mxu3 }
 0x169   : > { %v1433_v44 = vadd.f32 %v6623_v36, %v1054_v7  ;;  %v6689_v36 = vpack.c.b16 %v7903_v2, %v2322_v11  ;;  %v765_v10 = vadd.f32 %v764_v22, %v6422_v18  ;;  %v1759_v7 = vrot.slane %v1757_v58, 1  ;;  %v1492_v2 = vld [vmem:[%s6057_s25 + $0x98] sm:$0x1] }
 0x16a   : > { %v1762_v18 = vrot.slane %v1760_v15, 2 }
 0x16b   : > { %v1880_v9 = vpop.f32.mrf.mxu0  ;;  %803 = vmatmul.bf16.gmra.mxu1 %v5977_v40  ;;  %1025 = vmatmul.bf16.gmra.mxu2 %v873_v32  ;;  %v6682_v28 = vadd.f32 %v1877_v63, %v1433_v44  ;;  %v2639_v40 = vshrl.u32 %v6689_v36, 16  ;;  %v2642_v63 = vshll.u32 %v6689_v36, 16  ;;  %v874_v32 = vrot.slane %v6143_v50, 1 }
 0x16d   : > { %7925 = vst [vmem:[#allocation10_spill] sm:$0xff] %v6682_v28  ;;  %1414 = vmatmul.bf16.gmra.mxu3 %v1253_v3  ;;  %v2641_v44 = vrot.slane %v2639_v40, 2  ;;  %v875_v58 = vsel %vm840_vm1, %v872_v1, %v874_v32  ;;  %v6713_v1 = vld [vmem:[%s6057_s25 + $0x20] sm:$0xff] }
 0x16e   : > { %1919 = vmatmul.bf16.gmra.mxu0 %v1755_v41  ;;  %v986_v60 = vpop.f32.mrf.mxu2  ;;  %v2644_v41 = vrot.slane %v2642_v63, 3  ;;  %v1583_v63 = vunpack.c.l.b16 %v1492_v2 }
 0x16f   : > { %v1055_v19 = vadd.f32 %v986_v60, %v765_v10  ;;  %v1763_v10 = vor.u32 %v1762_v18, %v1759_v7 }
 0x170   : > { %v766_v43 = vpop.f32.mrf.mxu1  ;;  %v6697_v22 = vpop.f32.mrf.mxu3  ;;  %v2645_v15 = vor.u32 %v2644_v41, %v2641_v44 }
 0x171   : > { %v1434_v5 = vadd.f32 %v6631_v37, %v1055_v19  ;;  %v767_v11 = vadd.f32 %v766_v43, %v6441_v34  ;;  %v2653_v19 = vor.u32 %v2652_v57, %v2649_v0  ;;  %v1764_v40 = vsel %vm1603_vm2, %v1754_v59, %v1763_v10 }
 0x173   : > { %v1882_v16 = vpop.f32.mrf.mxu0  ;;  %v6700_v3 = vadd.f32 %v1880_v9, %v1434_v5  ;;  %v2654_v43 = vsel %vm2637_vm3, %v2645_v15, %v2653_v19  ;;  %v6004_v5 = vld [vmem:[%s6057_s25 + $0x88] sm:$0x70] }
 0x174   : > { %v5999_v15 = vor.u32 %v6004_v5, %v6146_v51  ;;  %v6739_v51 = vld [vmem:[%s6057_s25 + $0x28] sm:$0xff] }
 0x176   : > { %v988_v60 = vpop.f32.mrf.mxu2 }
 0x177   : > { %v1056_v28 = vadd.f32 %v988_v60, %v767_v11 }
 0x178   : > { %v769_v37 = vpop.f32.mrf.mxu1  ;;  %v6707_v35 = vpop.f32.mrf.mxu3 }
 0x179   : > { %v1435_v50 = vadd.f32 %v6651_v26, %v1056_v28  ;;  %v770_v61 = vadd.f32 %v769_v37, %v6454_v54  ;;  %v6716_v26 = vpack.c.b16 %v1583_v63, %v1583_v63 }
 0x17b   : > { %v1885_v9 = vpop.f32.mrf.mxu0  ;;  %808 = vmatmul.bf16.gmra.mxu1 %v5978_v27  ;;  %1030 = vmatmul.bf16.gmra.mxu2 %v875_v58  ;;  %v6709_v34 = vadd.f32 %v1882_v16, %v1435_v50  ;;  %7927 = vst [vmem:[#allocation12_spill] sm:$0xff] %v6716_v26  ;;  %v2656_v27 = vshrl.u32 %v6713_v1, 16  ;;  %v2659_v16 = vshll.u32 %v6713_v1, 16  ;;  %v1766_v44 = vshll.u32 %v6716_v26, 16 }
 0x17d   : > { %7926 = vst [vmem:[#allocation11_spill] sm:$0xff] %v6709_v34  ;;  %2882 = vmatmul.bf16.vlgmr.msra.gmra.mxu3 %v2654_v43  ;;  %v2658_v0 = vrot.slane %v2656_v27, 2  ;;  %v2661_v57 = vrot.slane %v2659_v16, 3  ;;  %v1768_v60 = vrot.slane %v1766_v44, 2 }
 0x17e   : > { %1924 = vmatmul.bf16.gmra.mxu0 %v1764_v40  ;;  %v991_v28 = vpop.f32.mrf.mxu2 }
 0x17f   : > { %v1057_v59 = vadd.f32 %v991_v28, %v770_v61  ;;  %v2662_v40 = vor.u32 %v2661_v57, %v2658_v0  ;;  %v1769_v61 = vsel %vm1603_vm2, %v1763_v10, %v1768_v60  ;;  %v7930_v10 = vunpack.c.l.b16 %v6315_v62 }
 0x180   : > { %v771_v2 = vpop.f32.mrf.mxu1  ;;  %v6723_v41 = vpop.f32.mrf.mxu3  ;;  %v7931_v57 = vunpack.c.l.b16 %v6677_v23  ;;  %v2378_v62 = vrot.slane %v6689_v36, 2  ;;  %v3032_v23 = vrot.slane %v6685_v42, 3 }
 0x181   : > { %v1436_v7 = vadd.f32 %v6665_v48, %v1057_v59  ;;  %v772_v11 = vadd.f32 %v771_v2, %v6467_v53  ;;  %v1971_v48 = vld [vmem:[%s6057_s25 + $0x8] sm:$0xc]  ;;  %v2663_v2 = vsel %vm2637_vm3, %v2653_v19, %v2662_v40 }
 0x182   : > { %v1990_v53 = vunpack.c.l.b16 %v1971_v48 }
 0x183   : > { %v1887_v18 = vpop.f32.mrf.mxu0  ;;  %v6725_v54 = vadd.f32 %v1885_v9, %v1436_v7  ;;  %v3009_v9 = vld [vmem:[%s6057_s25 + $0x10] sm:$0x8] }
 0x184   : > { %v1991_v7 = vpack.c.b16 %v7930_v10, %v1990_v53 }
 0x185   : > { %7928 = vst [vmem:[#allocation13_spill] sm:$0xff] %v6725_v54 }
 0x186   : > { %v993_v37 = vpop.f32.mrf.mxu2 }
 0x187   : > { %v1058_v58 = vadd.f32 %v993_v37, %v772_v11  ;;  %v5979_v37 = vld [vmem:[%s6057_s25 + $0x10] sm:$0xff] }
 0x188   : > { %v774_v50 = vpop.f32.mrf.mxu1  ;;  %v6733_v28 = vpop.f32.mrf.mxu3 }
 0x189   : > { %v1437_v63 = vadd.f32 %v6679_v45, %v1058_v58  ;;  %v775_v5 = vadd.f32 %v774_v50, %v6475_v24  ;;  %v3028_v45 = vunpack.c.l.b16 %v3009_v9  ;;  %v1993_v24 = vrot.slane %v1991_v7, 2  ;;  %v6768_v7 = vld [vmem:[%s6057_s25 + $0x30] sm:$0xff] }
 0x18a   : > { %v1994_v58 = vrot.slane %v5979_v37, 2  ;;  %v2379_v50 = vrot.slane %v6685_v42, 2 }
 0x18b   : > { %v1890_v43 = vpop.f32.mrf.mxu0  ;;  %813 = vmatmul.bf16.gmra.mxu1 %v5999_v15  ;;  %1035 = vmatmul.bf16.gmra.mxu2 %v874_v32  ;;  %v6735_v59 = vadd.f32 %v1887_v18, %v1437_v63  ;;  %v2665_v32 = vshrl.u32 %v6739_v51, 16  ;;  %v2668_v18 = vshll.u32 %v6739_v51, 16  ;;  %v3029_v11 = vpack.c.b16 %v7931_v57, %v3028_v45 }
 0x18c   : > { %v2677_v57 = vshll.u32 %v6768_v7, 16 }
 0x18d   : > { %7929 = vst [vmem:[#allocation14_spill] sm:$0xff] %v6735_v59  ;;  %2887 = vmatmul.bf16.gmra.mxu3 %v2663_v2  ;;  %v2667_v48 = vrot.slane %v2665_v32, 2  ;;  %v2670_v63 = vrot.slane %v2668_v18, 3 }
 0x18e   : > { %1929 = vmatmul.bf16.gmra.mxu0 %v1769_v61  ;;  %v996_v27 = vpop.f32.mrf.mxu2 }
 0x18f   : > { %v1059_v16 = vadd.f32 %v996_v27, %v775_v5  ;;  %v2380_v5 = vsel %vm1992_vm4, %v2378_v62, %v2379_v50  ;;  %v2671_v36 = vor.u32 %v2670_v63, %v2667_v48  ;;  %v2381_v48 = vrot.slane %v6713_v1, 2 }
 0x190   : > { %v776_v44 = vpop.f32.mrf.mxu1  ;;  %v6749_v60 = vpop.f32.mrf.mxu3  ;;  %v2679_v63 = vrot.slane %v2677_v57, 3 }
 0x191   : > { %v1438_v0 = vadd.f32 %v6697_v22, %v1059_v16  ;;  %v777_v61 = vadd.f32 %v776_v44, %v6492_v49  ;;  %v3031_v22 = vrot.slane %v3029_v11, 3  ;;  %v2672_v10 = vsel %vm2637_vm3, %v2662_v40, %v2671_v36  ;;  %v5980_v40 = vld [vmem:[%s6057_s25 + $0x18] sm:$0xff] }
 0x192   : > { %v1996_v62 = vrot.slane %v5980_v40, 2  ;;  %v2383_v40 = vrot.slane %v6739_v51, 2 }
 0x193   : > { %v1892_v19 = vpop.f32.mrf.mxu0  ;;  %v6752_v15 = vadd.f32 %v1890_v43, %v1438_v0  ;;  %v1995_v43 = vsel %vm1992_vm4, %v1993_v24, %v1994_v58  ;;  %v3033_v16 = vsel %vm3030_vm5, %v3031_v22, %v3032_v23  ;;  %v2674_v0 = vshrl.u32 %v6768_v7, 16 }
 0x194   : > { %v3034_v22 = vrot.slane %v6713_v1, 3 }
 0x195   : > { %7932 = vst [vmem:[#allocation15_spill] sm:$0xff] %v6752_v15 }
 0x196   : > { %v998_v9 = vpop.f32.mrf.mxu2 }
 0x197   : > { %v1060_v53 = vadd.f32 %v998_v9, %v777_v61 }
 0x198   : > { %v779_v2 = vpop.f32.mrf.mxu1  ;;  %v6762_v49 = vpop.f32.mrf.mxu3 }
 0x199   : > { %v1439_v45 = vadd.f32 %v6707_v35, %v1060_v53  ;;  %v780_v44 = vadd.f32 %v779_v2, %v6384_v39  ;;  %v2676_v39 = vrot.slane %v2674_v0, 2 }
 0x19b   : > { %v1895_v27 = vpop.f32.mrf.mxu0  ;;  %2104 = vmatmul.bf16.vlgmr.msra.gmra.mxu1 %v1995_v43  ;;  %2489 = vmatmul.bf16.vlgmr.msra.gmra.mxu2 %v2380_v5  ;;  %v6764_v42 = vadd.f32 %v1892_v19, %v1439_v45  ;;  %v2382_v43 = vsel %vm1992_vm4, %v2379_v50, %v2381_v48  ;;  %v2680_v5 = vor.u32 %v2679_v63, %v2676_v39 }
 0x19d   : > { %7933 = vst [vmem:[#allocation16_spill] sm:$0xff] %v6764_v42  ;;  %2892 = vmatmul.bf16.gmra.mxu3 %v2672_v10  ;;  %v2681_v1 = vsel %vm2637_vm3, %v2671_v36, %v2680_v5  ;;  %v5981_v36 = vld [vmem:[%s6057_s25 + $0x20] sm:$0xff]  ;;  %v7015_v42 = vld [vmem:[%s6057_s25 + $0x58] sm:$0xff] }
 0x19e   : > { %3142 = vmatmul.bf16.vlgmr.msra.gmra.mxu0 %v3033_v16  ;;  %v1001_v32 = vpop.f32.mrf.mxu2  ;;  %v3035_v16 = vsel %vm3030_vm5, %v3032_v23, %v3034_v22 }
 0x19f   : > { %v1061_v18 = vadd.f32 %v1001_v32, %v780_v44  ;;  %v6792_v44 = vld [vmem:[%s6057_s25 + $0x38] sm:$0xff] }
 0x1a0   : > { %v781_v35 = vpop.f32.mrf.mxu1  ;;  %v6774_v19 = vpop.f32.mrf.mxu3  ;;  %v2683_v23 = vshrl.u32 %v6792_v44, 16 }
 0x1a1   : > { %v1440_v11 = vadd.f32 %v6723_v41, %v1061_v18  ;;  %v782_v61 = vadd.f32 %v781_v35, %v6394_v47  ;;  %v1997_v41 = vsel %vm1992_vm4, %v1994_v58, %v1996_v62  ;;  %v2686_v18 = vshll.u32 %v6792_v44, 16 }
 0x1a3   : > { %v1897_v24 = vpop.f32.mrf.mxu0  ;;  %v6776_v37 = vadd.f32 %v1895_v27, %v1440_v11  ;;  %v2688_v39 = vrot.slane %v2686_v18, 3 }
 0x1a5   : > { %7934 = vst [vmem:[#allocation17_spill] sm:$0xff] %v6776_v37 }
 0x1a6   : > { %v1003_v9 = vpop.f32.mrf.mxu2 }
 0x1a7   : > { %v1062_v53 = vadd.f32 %v1003_v9, %v782_v61  ;;  %v3036_v61 = vrot.slane %v6739_v51, 3 }
 0x1a8   : > { %v784_v2 = vpop.f32.mrf.mxu1  ;;  %v6786_v10 = vpop.f32.mrf.mxu3 }
 0x1a9   : > { %v1441_v45 = vadd.f32 %v6733_v28, %v1062_v53  ;;  %v785_v58 = vadd.f32 %v784_v2, %v6407_v21  ;;  %v2685_v21 = vrot.slane %v2683_v23, 2 }
 0x1ab   : > { %v1900_v27 = vpop.f32.mrf.mxu0  ;;  %2109 = vmatmul.bf16.gmra.mxu1 %v1997_v41  ;;  %2494 = vmatmul.bf16.gmra.mxu2 %v2382_v43  ;;  %v6788_v47 = vadd.f32 %v1897_v24, %v1441_v45  ;;  %v1998_v24 = vrot.slane %v5981_v36, 2  ;;  %v2384_v41 = vsel %vm1992_vm4, %v2381_v48, %v2383_v40  ;;  %v2689_v43 = vor.u32 %v2688_v39, %v2685_v21 }
 0x1ac   : > { %v3038_v39 = vrot.slane %v6768_v7, 3 }
 0x1ad   : > { %7935 = vst [vmem:[#allocation18_spill] sm:$0xff] %v6788_v47  ;;  %2897 = vmatmul.bf16.gmra.mxu3 %v2681_v1  ;;  %v2690_v51 = vsel %vm2637_vm3, %v2680_v5, %v2689_v43  ;;  %v2385_v5 = vrot.slane %v6768_v7, 2  ;;  %v6838_v7 = vld [vmem:[%s6057_s25 + $0x48] sm:$0xff] }
 0x1ae   : > { %3147 = vmatmul.bf16.gmra.mxu0 %v3035_v16  ;;  %v1006_v50 = vpop.f32.mrf.mxu2  ;;  %v3037_v16 = vsel %vm3030_vm5, %v3034_v22, %v3036_v61 }
 0x1af   : > { %v1063_v32 = vadd.f32 %v1006_v50, %v785_v58  ;;  %v6816_v58 = vld [vmem:[%s6057_s25 + $0x40] sm:$0xff] }
 0x1b0   : > { %v786_v28 = vpop.f32.mrf.mxu1  ;;  %v6798_v57 = vpop.f32.mrf.mxu3  ;;  %v2692_v22 = vshrl.u32 %v6816_v58, 16 }
 0x1b1   : > { %v1442_v35 = vadd.f32 %v6749_v60, %v1063_v32  ;;  %v787_v63 = vadd.f32 %v786_v28, %v6417_v14  ;;  %v1999_v60 = vsel %vm1992_vm4, %v1996_v62, %v1998_v24  ;;  %v2695_v32 = vshll.u32 %v6816_v58, 16 }
 0x1b2   : > { %v2694_v36 = vrot.slane %v2692_v22, 2 }
 0x1b3   : > { %v1902_v0 = vpop.f32.mrf.mxu0  ;;  %v6800_v11 = vadd.f32 %v1900_v27, %v1442_v35  ;;  %v5982_v35 = vld [vmem:[%s6057_s25 + $0x28] sm:$0xff]  ;;  %v2697_v21 = vrot.slane %v2695_v32, 3 }
 0x1b5   : > { %7936 = vst [vmem:[#allocation19_spill] sm:$0xff] %v6800_v11 }
 0x1b6   : > { %v1008_v9 = vpop.f32.mrf.mxu2 }
 0x1b7   : > { %v1064_v53 = vadd.f32 %v1008_v9, %v787_v63 }
 0x1b8   : > { %v789_v2 = vpop.f32.mrf.mxu1  ;;  %v6810_v1 = vpop.f32.mrf.mxu3 }
 0x1b9   : > { %v1443_v45 = vadd.f32 %v6762_v49, %v1064_v53  ;;  %v790_v62 = vadd.f32 %v789_v2, %v6439_v30 }
 0x1bb   : > { %v1905_v27 = vpop.f32.mrf.mxu0  ;;  %2114 = vmatmul.bf16.gmra.mxu1 %v1999_v60  ;;  %2499 = vmatmul.bf16.gmra.mxu2 %v2384_v41  ;;  %v6812_v14 = vadd.f32 %v1902_v0, %v1443_v45  ;;  %v2000_v0 = vrot.slane %v5982_v35, 2  ;;  %v2386_v60 = vsel %vm1992_vm4, %v2383_v40, %v2385_v5  ;;  %v2698_v41 = vor.u32 %v2697_v21, %v2694_v36 }
 0x1bc   : > { %v2387_v35 = vrot.slane %v6792_v44, 2 }
 0x1bd   : > { %7937 = vst [vmem:[#allocation20_spill] sm:$0xff] %v6812_v14  ;;  %2902 = vmatmul.bf16.gmra.mxu3 %v2690_v51  ;;  %v3039_v51 = vsel %vm3030_vm5, %v3036_v61, %v3038_v39  ;;  %v2701_v61 = vshrl.u32 %v6838_v7, 16 }
 0x1be   : > { %3152 = vmatmul.bf16.gmra.mxu0 %v3037_v16  ;;  %v1011_v48 = vpop.f32.mrf.mxu2 }
 0x1bf   : > { %v1065_v50 = vadd.f32 %v1011_v48, %v790_v62 }
 0x1c0   : > { %v791_v49 = vpop.f32.mrf.mxu1  ;;  %v6822_v18 = vpop.f32.mrf.mxu3 }
 0x1c1   : > { %v1444_v28 = vadd.f32 %v6774_v19, %v1065_v50  ;;  %v792_v30 = vadd.f32 %v791_v49, %v6452_v46  ;;  %v2001_v19 = vsel %vm1992_vm4, %v1998_v24, %v2000_v0  ;;  %v2699_v46 = vsel %vm2637_vm3, %v2689_v43, %v2698_v41  ;;  %v5983_v43 = vld [vmem:[%s6057_s25 + $0x30] sm:$0xff] }
 0x1c2   : > { %v2704_v50 = vshll.u32 %v6838_v7, 16 }
 0x1c3   : > { %v1907_v23 = vpop.f32.mrf.mxu0  ;;  %v6828_v53 = vadd.f32 %v1905_v27, %v1444_v28  ;;  %v2002_v28 = vrot.slane %v5983_v43, 2 }
 0x1c4   : > { %v2706_v36 = vrot.slane %v2704_v50, 3 }
 0x1c5   : > { %7938 = vst [vmem:[#allocation21_spill] sm:$0xff] %v6828_v53  ;;  %v7948_v53 = vld [vmem:[#allocation3_spill] sm:$0xff] }
 0x1c6   : > { %v1013_v63 = vpop.f32.mrf.mxu2 }
 0x1c7   : > { %v1066_v9 = vadd.f32 %v1013_v63, %v792_v30 }
 0x1c8   : > { %v794_v2 = vpop.f32.mrf.mxu1  ;;  %v6834_v62 = vpop.f32.mrf.mxu3 }
 0x1c9   : > { %v1445_v45 = vadd.f32 %v6786_v10, %v1066_v9  ;;  %v795_v24 = vadd.f32 %v794_v2, %v6465_v17  ;;  %v2703_v17 = vrot.slane %v2701_v61, 2  ;;  %v2003_v2 = vsel %vm1992_vm4, %v2000_v0, %v2002_v28  ;;  %v7941_v0 = vld [vmem:[#allocation8_spill] sm:$0xff] }
 0x1cb   : > { %v1910_v16 = vpop.f32.mrf.mxu0  ;;  %2119 = vmatmul.bf16.gmra.mxu1 %v2001_v19  ;;  %2504 = vmatmul.bf16.gmra.mxu2 %v2386_v60  ;;  %v6841_v48 = vadd.f32 %v1907_v23, %v1445_v45  ;;  %v3040_v23 = vrot.slane %v6792_v44, 3  ;;  %v2707_v19 = vor.u32 %v2706_v36, %v2703_v17  ;;  %v6862_v44 = vld [vmem:[%s6057_s25 + $0x50] sm:$0xff]  ;;  %v2389_v17 = vrot.slane %v6816_v58, 2 }
 0x1cd   : > { %2907 = vmatmul.bf16.gmra.mxu3 %v2699_v46  ;;  %7939 = vst [vmem:[#allocation22_spill] sm:$0xff] %v6841_v48 }
 0x1ce   : > { %3157 = vmatmul.bf16.gmra.mxu0 %v3039_v51  ;;  %v1016_v27 = vpop.f32.mrf.mxu2  ;;  %v3041_v51 = vsel %vm3030_vm5, %v3038_v39, %v3040_v23  ;;  %v2710_v39 = vshrl.u32 %v6862_v44, 16 }
 0x1cf   : > { %v1067_v40 = vadd.f32 %v1016_v27, %v795_v24 }
 0x1d0   : > { %v796_v10 = vpop.f32.mrf.mxu1  ;;  %v6846_v32 = vpop.f32.mrf.mxu3  ;;  %v2712_v36 = vrot.slane %v2710_v39, 2 }
 0x1d1   : > { %v1446_v49 = vadd.f32 %v6798_v57, %v1067_v40  ;;  %v797_v21 = vadd.f32 %v796_v10, %v6473_v56  ;;  %v2388_v57 = vsel %vm1992_vm4, %v2385_v5, %v2387_v35  ;;  %v2708_v56 = vsel %vm2637_vm3, %v2698_v41, %v2707_v19  ;;  %v5984_v41 = vld [vmem:[%s6057_s25 + $0x38] sm:$0xff] }
 0x1d2   : > { %v2004_v43 = vrot.slane %v5984_v41, 2  ;;  %v6898_v41 = vld [vmem:[%s6057_s25 + $0x58] sm:$0xff] }
 0x1d3   : > { %v1912_v22 = vpop.f32.mrf.mxu0  ;;  %v6856_v46 = vadd.f32 %v1910_v16, %v1446_v49  ;;  %v2713_v16 = vshll.u32 %v6862_v44, 16 }
 0x1d5   : > { %7940 = vst [vmem:[#allocation23_spill] sm:$0xff] %v6856_v46 }
 0x1d6   : > { %v1018_v30 = vpop.f32.mrf.mxu2 }
 0x1d7   : > { %v1068_v63 = vadd.f32 %v1018_v30, %v797_v21  ;;  %v2715_v21 = vrot.slane %v2713_v16, 3  ;;  %v7943_v30 = vld [vmem:[#allocation9_spill] sm:$0xff]  ;;  %v2391_v16 = vrot.slane %v6838_v7, 2 }
 0x1d8   : > { %v799_v9 = vpop.f32.mrf.mxu1  ;;  %v6858_v24 = vpop.f32.mrf.mxu3 }
 0x1d9   : > { %v1447_v60 = vadd.f32 %v6810_v1, %v1068_v63  ;;  %v800_v5 = vadd.f32 %v799_v9, %v7941_v0  ;;  %v3042_v9 = vrot.slane %v6816_v58, 3 }
 0x1db   : > { %v1915_v45 = vpop.f32.mrf.mxu0  ;;  %2124 = vmatmul.bf16.gmra.mxu1 %v2003_v2  ;;  %2509 = vmatmul.bf16.gmra.mxu2 %v2388_v57  ;;  %v6870_v50 = vadd.f32 %v1912_v22, %v1447_v60  ;;  %v3269_v57 = vlaneseq  ;;  %v2005_v22 = vsel %vm1992_vm4, %v2002_v28, %v2004_v43  ;;  %v2390_v60 = vsel %vm1992_vm4, %v2387_v35, %v2389_v17  ;;  %v5985_v28 = vld [vmem:[%s6057_s25 + $0x40] sm:$0xff] }
 0x1dc   : > { %v3043_v58 = vsel %vm3030_vm5, %v3040_v23, %v3042_v9  ;;  %v2006_v39 = vrot.slane %v5985_v28, 2  ;;  %v2392_v28 = vsel %vm1992_vm4, %v2389_v17, %v2391_v16 }
 0x1dd   : > { %2912 = vmatmul.bf16.gmra.mxu3 %v2708_v56  ;;  %7942 = vst [vmem:[#allocation8_spill] sm:$0xff] %v6870_v50  ;;  %v6880_v56 = vor.u32 %v2715_v21, %v2712_v36  ;;  %v6882_v0 = vshrl.u32 %v3269_v57, 7  ;;  %v7945_v21 = vld [vmem:[#allocation2_spill] sm:$0xff] }
 0x1de   : > { %3162 = vmatmul.bf16.gmra.mxu0 %v3041_v51  ;;  %v1021_v27 = vpop.f32.mrf.mxu2 }
 0x1df   : > { %v1069_v40 = vadd.f32 %v1021_v27, %v800_v5  ;;  %v3310_v23 = vshrl.u32 %v6882_v0, 16  ;;  %v6917_v17 = vadd.s32 8, %v6882_v0 }
 0x1e0   : > { %v801_v1 = vpop.f32.mrf.mxu1  ;;  %v6872_v49 = vpop.f32.mrf.mxu3 }
 0x1e1   : > { %v1448_v10 = vadd.f32 %v6822_v18, %v1069_v40  ;;  %v802_v63 = vadd.f32 %v801_v1, %v7943_v30  ;;  %v3309_v1 = vand.u32 65535, %v6882_v0  ;;  %v3314_v57 = vmul.u32 14564, %v3310_v23 }
 0x1e2   : > { %v3339_v14 = vshrl.u32 %v6917_v17, 16 }
 0x1e3   : > { %v6868_v61 = vpop.f32.mrf.mxu0  ;;  %v6892_v35 = vadd.f32 %v1915_v45, %v1448_v10  ;;  %v3313_v36 = vmul.u32 58254, %v3309_v1  ;;  %v2722_v45 = vshll.u32 %v6898_v41, 16  ;;  %v3312_v10 = vmul.u32 14564, %v3309_v1 }
 0x1e5   : > { %7944 = vst [vmem:[#allocation9_spill] sm:$0xff] %v6892_v35  ;;  %v5986_v35 = vld [vmem:[%s6057_s25 + $0x48] sm:$0xff] }
 0x1e6   : > { %v1023_v2 = vpop.f32.mrf.mxu2  ;;  %v2008_v50 = vrot.slane %v5986_v35, 2 }
 0x1e7   : > { %v1070_v18 = vadd.f32 %v1023_v2, %v802_v63  ;;  %v2719_v2 = vshrl.u32 %v6898_v41, 16 }
 0x1e8   : > { %v804_v51 = vpop.f32.mrf.mxu1  ;;  %v6888_v40 = vpop.f32.mrf.mxu3 }
 0x1e9   : > { %v1449_v5 = vadd.f32 %v6834_v62, %v1070_v18  ;;  %v2717_v62 = vsel %vm2637_vm3, %v2707_v19, %v6880_v56  ;;  %v805_v30 = vadd.f32 %v804_v51, %v7945_v21  ;;  %v3044_v19 = vrot.slane %v6838_v7, 3 }
 0x1ea   : > { %v3315_v51 = vmul.u32 58254, %v3310_v23  ;;  %v3318_v21 = vshll.u32 %v3314_v57, 16  ;;  %v2721_v1 = vrot.slane %v2719_v2, 2  ;;  %v7904_v7 = vmov 0  }
 0x1eb   : > { %v6885_v27 = vpop.f32.mrf.mxu0  ;;  %2129 = vmatmul.bf16.gmra.mxu1 %v2005_v22  ;;  %2514 = vmatmul.bf16.gmra.mxu2 %v2390_v60  ;;  %v2007_v22 = vsel %vm1992_vm4, %v2004_v43, %v2006_v39  ;;  %v3316_v60 = vshll.u32 %v3313_v36, 16  ;;  %v2724_v43 = vrot.slane %v2722_v45, 3  ;;  %v3045_v35 = vsel %vm3030_vm5, %v3042_v9, %v3044_v19 }
 0x1ec   : > { %v2393_v23 = vrot.slane %v6862_v44, 2  ;;  %v3046_v2 = vrot.slane %v6862_v44, 3  ;;  %v3338_v45 = vand.u32 65535, %v6917_v17 }
 0x1ed   : > { %2917 = vmatmul.bf16.gmra.mxu3 %v2717_v62  ;;  %vm3320_vm6 = vc.u32 %v3312_v10, %v3316_v60 }
 0x1ee   : > { %3167 = vmatmul.bf16.gmra.mxu0 %v3043_v58  ;;  %v1026_v63 = vpop.f32.mrf.mxu2  ;;  %v3321_v62 = vsel %vm3320_vm6, 1, %v7904_v7  ;;  %v6934_v44 = vmul.u32 58254, %v3338_v45 }
 0x1ef   : > { %v1071_v18 = vadd.f32 %v1026_v63, %v805_v30  ;;  %v3322_v63 = vadd.s32 %v3316_v60, %v3312_v10  ;;  %v6928_v60 = vsel %vm1992_vm4, %v2006_v39, %v2008_v50 }
 0x1f0   : > { %v806_v58 = vpop.f32.mrf.mxu1  ;;  %v6913_v30 = vpop.f32.mrf.mxu3 }
 0x1f1   : > { %v6909_v46 = vadd.f32 %v6846_v32, %v1071_v18  ;;  %v3323_v32 = vadd.s32 %v3321_v62, %v3315_v51  ;;  %v6922_v18 = vadd.f32 %v6868_v61, %v1449_v5  ;;  %vm3324_vm7 = vc.u32 %v3322_v63, %v3318_v21 }
 0x1f2   : > { %v807_v10 = vadd.f32 %v806_v58, %v7948_v53  ;;  %v3325_v9 = vsel %vm3324_vm7, 1, %v7904_v7  ;;  %v6932_v62 = vor.u32 %v2724_v43, %v2721_v1  ;;  %v3319_v61 = vshrl.u32 %v3314_v57, 16  ;;  %v6945_v7 = vld [vmem:[%s6057_s25 + $0x50] sm:$0xff] }
 0x1f3   : > { %v6911_v48 = vpop.f32.mrf.mxu0  ;;  %7947 = vst [vmem:[#allocation24_spill] sm:$0xff] %v6922_v18  ;;  %v3327_v5 = vadd.s32 %v3325_v9, %v3323_v32  ;;  %v6937_v21 = vsel %vm1992_vm4, %v2391_v16, %v2393_v23  ;;  %v3341_v63 = vmul.u32 14564, %v3338_v45  ;;  %v6939_v53 = vmul.u32 14564, %v3339_v14 }
 0x1f4   : > { %7946 = vst [vmem:[#allocation2_spill] sm:$0xff] %v6911_v48  ;;  %v3317_v48 = vshrl.u32 %v3313_v36, 16  ;;  %v6942_v58 = vsel %vm3030_vm5, %v3044_v19, %v3046_v2  ;;  %v7906_v1 = vrot.slane %v6945_v7, 2  ;;  %v3344_v16 = vmul.u32 58254, %v3339_v14 }
 0x1f5   : > { %v3345_v45 = vshll.u32 %v6934_v44, 16  ;;  %v3347_v9 = vshll.u32 %v6939_v53, 16  ;;  %v2726_v57 = vsel %vm2637_vm3, %v6880_v56, %v6932_v62 }
 0x1f6   : > { %v1028_v51 = vpop.f32.mrf.mxu2  ;;  %v3328_v43 = vadd.s32 %v3327_v5, %v3317_v48  ;;  %v7907_v48 = vrot.slane %v6898_v41, 3  ;;  %v6966_v14 = vsel %vm1992_vm4, %v2008_v50, %v7906_v1  ;;  %v7953_v50 = vmov 0  }
 0x1f7   : > { %v1072_v36 = vadd.f32 %v1028_v51, %v807_v10  ;;  %v7951_v51 = vld [vmem:[#allocation4_spill] sm:$0xff]  ;;  %vm3349_vm8 = vc.u32 %v3341_v63, %v3345_v45  ;;  %v3351_v5 = vadd.s32 %v3345_v45, %v3341_v63 }
 0x1f8   : > { %v809_v39 = vpop.f32.mrf.mxu1  ;;  %v6957_v18 = vpop.f32.mrf.mxu3 }
 0x1f9   : > { %v6950_v32 = vadd.f32 %v6858_v24, %v1072_v36  ;;  %v810_v19 = vadd.f32 %v809_v39, %v7951_v51  ;;  %v3329_v24 = vadd.s32 %v3328_v43, %v3319_v61  ;;  %v6969_v36 = vadd.s32 16, %v6882_v0  ;;  %v6982_v61 = vld [vmem:[%s6057_s25 + $0x60] sm:$0xff] }
 0x1fa   : > { %v7952_v39 = vrot.slane %v6898_v41, 2  ;;  %v3350_v43 = vsel %vm3349_vm8, 1, %v7953_v50  ;;  %vm3353_vm9 = vc.u32 %v3351_v5, %v3347_v9 }
 0x1fb   : > { %7949 = vst [vmem:[#allocation3_spill] sm:$0xff] %v6950_v32  ;;  %v6952_v10 = vpop.f32.mrf.mxu0  ;;  %2134 = vmatmul.bf16.gmra.mxu1 %v2007_v22  ;;  %2519 = vmatmul.bf16.gmra.mxu2 %v2392_v28  ;;  %v6979_v22 = vsel %vm3030_vm5, %v3046_v2, %v7907_v48  ;;  %v3330_v28 = vshrl.u32 %v3329_v24, 4  ;;  %v3352_v63 = vadd.s32 %v3350_v43, %v3344_v16  ;;  %v3367_v45 = vand.u32 65535, %v6969_v36 }
 0x1fc   : > { %7950 = vst [vmem:[#allocation25_spill] sm:$0xff] %v6952_v10  ;;  %v6974_v56 = vsel %vm1992_vm4, %v2393_v23, %v7952_v39  ;;  %v2728_v23 = vshrl.u32 %v6982_v61, 16  ;;  %v2731_v39 = vshll.u32 %v6982_v61, 16  ;;  %v3346_v2 = vshrl.u32 %v6934_v44, 16 }
 0x1fd   : > { %v3331_v1 = vmul.u32 18, %v3330_v28  ;;  %2922 = vmatmul.bf16.gmra.mxu3 %v2726_v57  ;;  %v3348_v24 = vshrl.u32 %v6939_v53, 16  ;;  %v3354_v10 = vsel %vm3353_vm9, 1, %v7953_v50  ;;  %v3371_v16 = vmul.u32 58254, %v3367_v45 }
 0x1fe   : > { %3172 = vmatmul.bf16.gmra.mxu0 %v3045_v35  ;;  %v3368_v35 = vshrl.u32 %v6969_v36, 16  ;;  %v1031_v51 = vpop.f32.mrf.mxu2  ;;  %v2730_v43 = vrot.slane %v2728_v23, 2  ;;  %v2733_v32 = vrot.slane %v2731_v39, 3  ;;  %v3356_v11 = vadd.s32 %v3354_v10, %v3352_v63  ;;  %v7956_v10 = vld [vmem:[#allocation5_spill] sm:$0xff] }
 0x1ff   : > { %v1073_v48 = vadd.f32 %v1031_v51, %v810_v19  ;;  %v3332_v5 = vsub.s32 %v6882_v0, %v3331_v1  ;;  %v3370_v37 = vmul.u32 14564, %v3367_v45  ;;  %v3374_v23 = vshll.u32 %v3371_v16, 16 }
 0x200   : > { %v811_v9 = vpop.f32.mrf.mxu1  ;;  %v3372_v44 = vmul.u32 14564, %v3368_v35  ;;  %v3373_v19 = vmul.u32 58254, %v3368_v35  ;;  %v6998_v57 = vpop.f32.mrf.mxu3  ;;  %v7000_v51 = vor.u32 %v2733_v32, %v2730_v43  ;;  %v3357_v1 = vadd.s32 %v3356_v11, %v3346_v2 }
 0x201   : > { %v6994_v28 = vadd.f32 %v6872_v49, %v1073_v48  ;;  %vm4350_vm10 = vcmp.ne.s32.totalorder %v3332_v5, 0  ;;  %vm4386_vm11 = vcmp.lt.s32.totalorder %v3332_v5, 0  ;;  %v4458_v53 = vadd.s32 18, %v3332_v5 }
 0x202   : > { %vm4422_vm12 = vmand %vm4386_vm11, %vm4350_vm10  ;;  %v3376_v39 = vshll.u32 %v3372_v44, 16  ;;  %v812_v63 = vadd.f32 %v811_v9, %v7956_v10  ;;  %v2735_v48 = vsel %vm2637_vm3, %v6932_v62, %v7000_v51  ;;  %v7007_v45 = vadd.s32 24, %v6882_v0 }
 0x203   : > { %7954 = vst [vmem:[#allocation4_spill] sm:$0xff] %v6994_v28  ;;  %v6996_v47 = vpop.f32.mrf.mxu0  ;;  %v4494_v49 = vsel %vm4422_vm12, %v4458_v53, %v3332_v5  ;;  %v3358_v35 = vadd.s32 %v3357_v1, %v3348_v24  ;;  %vm3378_vm14 = vc.u32 %v3370_v37, %v3374_v23  ;;  %v3380_v32 = vadd.s32 %v3374_v23, %v3370_v37 }
 0x204   : > { %7955 = vst [vmem:[#allocation26_spill] sm:$0xff] %v6996_v47  ;;  %vm4530_vm13 = vcmp.lt.s32.totalorder %v4494_v49, 16  ;;  %v7908_v47 = vmov 0.0   ;;  %v3375_v2 = vshrl.u32 %v3371_v16, 16  ;;  %v3379_v9 = vsel %vm3378_vm14, 1, %v7953_v50 }
 0x205   : > { %v7010_v11 = vsel %vm4530_vm13, 1.0, %v7908_v47  ;;  %v3396_v5 = vand.u32 65535, %v7007_v45  ;;  %v3359_v62 = vshrl.u32 %v3358_v35, 4  ;;  %v3381_v10 = vadd.s32 %v3379_v9, %v3373_v19  ;;  %v7959_v35 = vld [vmem:[#allocation6_spill] sm:$0xff] }
 0x206   : > { %v1033_v43 = vpop.f32.mrf.mxu2  ;;  %vm3382_vm15 = vc.u32 %v3380_v32, %v3376_v39  ;;  %v7912_v24 = vrot.slane %v7015_v42, 2  ;;  %v7911_v37 = vrot.slane %v6982_v61, 2  ;;  %v3397_v23 = vshrl.u32 %v7007_v45, 16 }
 0x207   : > { %v1074_v53 = vadd.f32 %v1033_v43, %v812_v63  ;;  %v3383_v1 = vsel %vm3382_vm15, 1, %v7953_v50  ;;  %v3360_v63 = vmul.u32 18, %v3359_v62  ;;  %v3377_v19 = vshrl.u32 %v3372_v44, 16 }
 0x208   : > { %v814_v28 = vpop.f32.mrf.mxu1  ;;  %v3385_v39 = vadd.s32 %v3383_v1, %v3381_v10  ;;  %v7027_v43 = vpop.f32.mrf.mxu3  ;;  %v7960_v9 = vrot.slane %v6945_v7, 2  ;;  %v7910_v44 = vrot.slane %v6982_v61, 3  ;;  %v3399_v7 = vmul.u32 14564, %v3396_v5 }
 0x209   : > { %v7022_v16 = vadd.f32 %v6888_v40, %v1074_v53  ;;  %v815_v32 = vadd.f32 %v814_v28, %v7959_v35  ;;  %v7961_v40 = vrot.slane %v6898_v41, 2  ;;  %v3361_v28 = vsub.s32 %v6917_v17, %v3360_v63 }
 0x20a   : > { %v7034_v47 = vsel %vm1992_vm4, %v7960_v9, %v7912_v24  ;;  %v3386_v62 = vadd.s32 %v3385_v39, %v3375_v2  ;;  %v3400_v10 = vmul.u32 58254, %v3396_v5  ;;  %v7962_v1 = vrot.slane %v6898_v41, 3  ;;  %v7056_v9 = vld [vmem:[%s6057_s25 + $0x68] sm:$0xff] }
 0x20b   : > { %7957 = vst [vmem:[#allocation5_spill] sm:$0xff] %v7022_v16  ;;  %v7024_v49 = vpop.f32.mrf.mxu0  ;;  %v7041_v53 = vsel %vm1992_vm4, %v7961_v40, %v7911_v37  ;;  %2139 = vmatmul.bf16.gmra.mxu1 %v6928_v60  ;;  %2524 = vmatmul.bf16.gmra.mxu2 %v6937_v21  ;;  %v7058_v40 = vmul.u32 14564, %v3397_v23  ;;  %v3402_v60 = vmul.u32 58254, %v3397_v23  ;;  %v7062_v17 = vadd.f32 %v6885_v27, %v6909_v46  ;;  %v7967_v16 = vld [vmem:[#allocation7_spill] sm:$0xff] }
 0x20c   : > { %7958 = vst [vmem:[#allocation27_spill] sm:$0xff] %v7024_v49  ;;  %v7053_v35 = vsel %vm3030_vm5, %v7962_v1, %v7910_v44  ;;  %vm4351_vm0 = vcmp.ne.s32.totalorder %v3361_v28, 0  ;;  %vm4387_vm1 = vcmp.lt.s32.totalorder %v3361_v28, 0  ;;  %v4459_v21 = vadd.s32 18, %v3361_v28 }
 0x20d   : > { %7963 = vst [vmem:[#allocation6_spill] sm:$0xff] %v7062_v17  ;;  %vm4423_vm2 = vmand %vm4387_vm1, %vm4351_vm0  ;;  %v2737_v41 = vshrl.u32 %v7056_v9, 16  ;;  %v2740_v5 = vshll.u32 %v7056_v9, 16  ;;  %v3403_v63 = vshll.u32 %v3400_v10, 16  ;;  %v7067_v39 = vadd.s32 32, %v6882_v0  ;;  %2927 = vmatmul.bf16.gmra.mxu3 %v2735_v48 }
 0x20e   : > { %3177 = vmatmul.bf16.gmra.mxu0 %v6942_v58  ;;  %v3387_v58 = vadd.s32 %v3386_v62, %v3377_v19  ;;  %v1036_v2 = vpop.f32.mrf.mxu2  ;;  %v4495_v23 = vsel %vm4423_vm2, %v4459_v21, %v3361_v28  ;;  %v3404_v46 = vshrl.u32 %v3400_v10, 16  ;;  %v3405_v24 = vshll.u32 %v7058_v40, 16 }
 0x20f   : > { %v1075_v1 = vadd.f32 %v1036_v2, %v815_v32  ;;  %vm7069_vm6 = vcmp.lt.s32.totalorder %v4495_v23, 16  ;;  %v2739_v19 = vrot.slane %v2737_v41, 2  ;;  %v2742_v62 = vrot.slane %v2740_v5, 3 }
 0x210   : > { %v3388_v44 = vshrl.u32 %v3387_v58, 4  ;;  %v816_v27 = vpop.f32.mrf.mxu1  ;;  %v3406_v32 = vshrl.u32 %v7058_v40, 16  ;;  %vm3407_vm7 = vc.u32 %v3399_v7, %v3403_v63  ;;  %v3409_v10 = vadd.s32 %v3403_v63, %v3399_v7  ;;  %v7095_v40 = vpop.f32.mrf.mxu3 }
 0x211   : > { %v7075_v49 = vadd.f32 %v6913_v30, %v1075_v1  ;;  %v817_v17 = vadd.f32 %v816_v27, %v7967_v16  ;;  %v7081_v28 = vor.u32 %v2742_v62, %v2739_v19  ;;  %v3425_v21 = vand.u32 65535, %v7067_v39 }
 0x212   : > { %v3389_v48 = vmul.u32 18, %v3388_v44  ;;  %v3408_v2 = vsel %vm3407_vm7, 1, %v7953_v50  ;;  %v3426_v30 = vshrl.u32 %v7067_v39, 16  ;;  %v7088_v41 = vadd.s32 40, %v6882_v0 }
 0x213   : > { %7966 = vst [vmem:[#allocation28_spill] sm:$0xff] %v7075_v49  ;;  %v7078_v15 = vpop.f32.mrf.mxu0  ;;  %v7969_v16 = vmov 0.0   ;;  %v2744_v7 = vsel %vm2637_vm3, %v7000_v51, %v7081_v28  ;;  %v3410_v5 = vadd.s32 %v3408_v2, %v3402_v60  ;;  %vm3411_vm8 = vc.u32 %v3409_v10, %v3405_v24  ;;  %v7105_v10 = vld [vmem:[%s6057_s25 + $0x60] sm:$0xff] }
 0x214   : > { %7968 = vst [vmem:[#allocation7_spill] sm:$0xff] %v7078_v15  ;;  %v3390_v58 = vsub.s32 %v6969_v36, %v3389_v48  ;;  %v7093_v44 = vsel %vm7069_vm6, 1.0, %v7969_v16  ;;  %v3412_v63 = vsel %vm3411_vm8, 1, %v7953_v50  ;;  %v3428_v37 = vmul.u32 14564, %v3425_v21 }
 0x215   : > { %v3414_v23 = vadd.s32 %v3412_v63, %v3410_v5  ;;  %v3429_v27 = vmul.u32 58254, %v3425_v21  ;;  %v7101_v19 = vmul.u32 14564, %v3426_v30  ;;  %v3431_v15 = vmul.u32 58254, %v3426_v30 }
 0x216   : > { %vm4352_vm9 = vcmp.ne.s32.totalorder %v3390_v58, 0  ;;  %vm4388_vm10 = vcmp.lt.s32.totalorder %v3390_v58, 0  ;;  %v4460_v36 = vadd.s32 18, %v3390_v58  ;;  %v1038_v1 = vpop.f32.mrf.mxu2  ;;  %v3454_v51 = vand.u32 65535, %v7088_v41 }
 0x217   : > { %vm4424_vm11 = vmand %vm4388_vm10, %vm4352_vm9  ;;  %v1076_v62 = vadd.f32 %v1038_v1, %v817_v17  ;;  %v3415_v24 = vadd.s32 %v3414_v23, %v3404_v46  ;;  %v7914_v2 = vrot.slane %v7105_v10, 2  ;;  %v7913_v49 = vrot.slane %v7056_v9, 2 }
 0x218   : > { %v4496_v48 = vsel %vm4424_vm11, %v4460_v36, %v3390_v58  ;;  %v2105_v60 = vpop.f32.mrf.mxu1  ;;  %v3432_v17 = vshll.u32 %v3429_v27, 16  ;;  %v3455_v58 = vshrl.u32 %v7088_v41, 16  ;;  %v7971_v36 = vrot.slane %v7015_v42, 2 }
 0x219   : > { %vm4532_vm12 = vcmp.lt.s32.totalorder %v4496_v48, 16  ;;  %v7110_v5 = vadd.f32 %v6957_v18, %v1076_v62  ;;  %v2195_v21 = vadd.f32 %v2105_v60, %v6516_v31  ;;  %v3416_v46 = vadd.s32 %v3415_v24, %v3406_v32 }
 0x21a   : > { %v7115_v30 = vsel %vm4532_vm12, 1.0, %v7969_v16  ;;  %v7122_v1 = vsel %vm1992_vm4, %v7971_v36, %v7914_v2  ;;  %v7915_v18 = vrot.slane %v7056_v9, 3  ;;  %v7972_v31 = vrot.slane %v6982_v61, 2 }
 0x21b   : > { %7970 = vst [vmem:[#allocation29_spill] sm:$0xff] %v7110_v5  ;;  %v3143_v63 = vpop.f32.mrf.mxu0  ;;  %2144 = vmatmul.bf16.gmra.mxu1 %v6966_v14  ;;  %2529 = vmatmul.bf16.gmra.mxu2 %v6974_v56  ;;  %v3433_v32 = vshrl.u32 %v3429_v27, 16  ;;  %v3434_v62 = vshll.u32 %v7101_v19, 16  ;;  %vm3436_vm13 = vc.u32 %v3428_v37, %v3432_v17  ;;  %v3417_v42 = vshrl.u32 %v3416_v46, 4  ;;  %v7139_v56 = vld [vmem:[%s6057_s25 + $0x70] sm:$0xff]  ;;  %v7152_v46 = vpop.f32.mrf.mxu3 }
 0x21c   : > { %v7132_v23 = vsel %vm1992_vm4, %v7972_v31, %v7913_v49  ;;  %v3435_v48 = vshrl.u32 %v7101_v19, 16  ;;  %v3437_v14 = vsel %vm3436_vm13, 1, %v7953_v50  ;;  %v3438_v60 = vadd.s32 %v3432_v17, %v3428_v37 }
 0x21d   : > { %v7973_v24 = vrot.slane %v6982_v61, 3  ;;  %v3439_v27 = vadd.s32 %v3437_v14, %v3431_v15  ;;  %v7148_v31 = vmul.u32 58254, %v3454_v51  ;;  %v7150_v49 = vmul.u32 14564, %v3455_v58  ;;  %2932 = vmatmul.bf16.gmra.mxu3 %v2744_v7 }
 0x21e   : > { %3182 = vmatmul.bf16.gmra.mxu0 %v6979_v22  ;;  %v2490_v22 = vpop.f32.mrf.mxu2  ;;  %v3418_v19 = vmul.u32 18, %v3417_v42  ;;  %vm3440_vm14 = vc.u32 %v3438_v60, %v3434_v62  ;;  %v2746_v37 = vshrl.u32 %v7139_v56, 16  ;;  %v2749_v17 = vshll.u32 %v7139_v56, 16 }
 0x21f   : > { %v7146_v36 = vsel %vm3030_vm5, %v7973_v24, %v7915_v18  ;;  %v2580_v2 = vadd.f32 %v2490_v22, %v2195_v21  ;;  %v3441_v61 = vsel %vm3440_vm14, 1, %v7953_v50  ;;  %v3457_v24 = vmul.u32 14564, %v3454_v51 }
 0x220   : > { %v3461_v15 = vshll.u32 %v7148_v31, 16  ;;  %v2107_v14 = vpop.f32.mrf.mxu1  ;;  %v3419_v18 = vsub.s32 %v7007_v45, %v3418_v19  ;;  %v3443_v5 = vadd.s32 %v3441_v61, %v3439_v27  ;;  %v2748_v26 = vrot.slane %v2746_v37, 2 }
 0x221   : > { %v2751_v59 = vrot.slane %v2749_v17, 3  ;;  %v2973_v42 = vadd.f32 %v6998_v57, %v2580_v2  ;;  %v2196_v62 = vadd.f32 %v2107_v14, %v6527_v6  ;;  %v3460_v54 = vmul.u32 58254, %v3455_v58 }
 0x222   : > { %v3463_v21 = vshll.u32 %v7150_v49, 16  ;;  %vm4353_vm15 = vcmp.ne.s32.totalorder %v3419_v18, 0  ;;  %vm4389_vm0 = vcmp.lt.s32.totalorder %v3419_v18, 0  ;;  %v4461_v7 = vadd.s32 18, %v3419_v18 }
 0x223   : > { %v3145_v60 = vpop.f32.mrf.mxu0  ;;  %v3444_v51 = vadd.s32 %v3443_v5, %v3433_v32  ;;  %v3233_v22 = vadd.f32 %v3143_v63, %v2973_v42  ;;  %vm4425_vm1 = vmand %vm4389_vm0, %vm4353_vm15  ;;  %v7162_v34 = vor.u32 %v2751_v59, %v2748_v26  ;;  %v3462_v45 = vshrl.u32 %v7148_v31, 16  ;;  %v7182_v31 = vpop.f32.mrf.mxu3 }
 0x224   : > { %vm3465_vm2 = vc.u32 %v3457_v24, %v3461_v15  ;;  %v4497_v27 = vsel %vm4425_vm1, %v4461_v7, %v3419_v18  ;;  %v3467_v6 = vadd.s32 %v3461_v15, %v3457_v24  ;;  %v3464_v58 = vshrl.u32 %v7150_v49, 16 }
 0x225   : > { %v3445_v19 = vadd.s32 %v3444_v51, %v3435_v48  ;;  %v3466_v57 = vsel %vm3465_vm2, 1, %v7953_v50  ;;  %v7167_v2 = vmul.f32 %v7010_v11, %v3233_v22  ;;  %vm4533_vm6 = vcmp.lt.s32.totalorder %v4497_v27, 16 }
 0x226   : > { %v3468_v5 = vadd.s32 %v3466_v57, %v3460_v54  ;;  %v2492_v63 = vpop.f32.mrf.mxu2  ;;  %v2753_v26 = vsel %vm2637_vm3, %v7081_v28, %v7162_v34  ;;  %vm3469_vm7 = vc.u32 %v3467_v6, %v3463_v21  ;;  %v7174_v59 = vadd.s32 48, %v6882_v0  ;;  %v7185_v28 = vld [vmem:[%s6057_s25 + $0x68] sm:$0xff] }
 0x227   : > { %v3446_v32 = vshrl.u32 %v3445_v19, 4  ;;  %v4790_v18 = vmul.f32 %v7167_v2, %v7167_v2  ;;  %v2581_v11 = vadd.f32 %v2492_v63, %v2196_v62  ;;  %v7179_v48 = vsel %vm4533_vm6, 1.0, %v7969_v16 }
 0x228   : > { %v3470_v54 = vsel %vm3469_vm7, 1, %v7953_v50  ;;  %v2110_v49 = vpop.f32.mrf.mxu1  ;;  %v2016_v61 = vrot.slane %v7185_v28, 2  ;;  %v2401_v24 = vrot.slane %v7139_v56, 2  ;;  %v3483_v42 = vand.u32 65535, %v7174_v59 }
 0x229   : > { %v3447_v37 = vmul.u32 18, %v3446_v32  ;;  %v3472_v17 = vadd.s32 %v3470_v54, %v3468_v5  ;;  %v2974_v15 = vadd.f32 %v7027_v43, %v2581_v11  ;;  %v3484_v62 = vshrl.u32 %v7174_v59, 16  ;;  %v7241_v54 = vld [vmem:[%s6057_s25 + $0x78] sm:$0xff] }
 0x22a   : > { %v7193_v21 = vadd.s32 56, %v6882_v0  ;;  %v2197_v7 = vadd.f32 %v2110_v49, %v6542_v8  ;;  %v7974_v27 = vrot.slane %v7105_v10, 2  ;;  %v7975_v57 = vrot.slane %v7056_v9, 2 }
 0x22b   : > { %v3148_v14 = vpop.f32.mrf.mxu0  ;;  %v3448_v51 = vsub.s32 %v7067_v39, %v3447_v37  ;;  %v3473_v22 = vadd.s32 %v3472_v17, %v3462_v45  ;;  %v3234_v19 = vadd.f32 %v3145_v60, %v2974_v15  ;;  %2149 = vmatmul.bf16.gmra.mxu1 %v7034_v47  ;;  %2534 = vmatmul.bf16.gmra.mxu2 %v7041_v53  ;;  %v3054_v39 = vrot.slane %v7139_v56, 3 }
 0x22c   : > { %v7203_v43 = vsel %vm1992_vm4, %v7974_v27, %v2016_v61  ;;  %v7212_v8 = vsel %vm1992_vm4, %v7975_v57, %v2401_v24  ;;  %v7215_v45 = vmul.u32 58254, %v3483_v42  ;;  %v7978_v6 = vrot.slane %v7056_v9, 3 }
 0x22d   : > { %vm4354_vm8 = vcmp.ne.s32.totalorder %v3448_v51, 0  ;;  %vm4390_vm9 = vcmp.lt.s32.totalorder %v3448_v51, 0  ;;  %v4462_v10 = vadd.s32 18, %v3448_v51  ;;  %v3474_v47 = vadd.s32 %v3473_v22, %v3464_v58  ;;  %2937 = vmatmul.bf16.gmra.mxu3 %v2753_v26  ;;  %v7255_v26 = vpop.f32.mrf.mxu3 }
 0x22e   : > { %3187 = vmatmul.bf16.gmra.mxu0 %v7053_v35  ;;  %v4639_v53 = vmul.f32 %v7093_v44, %v3234_v19  ;;  %vm7219_vm10 = vmand %vm4390_vm9, %vm4354_vm8  ;;  %v7228_v5 = vsel %vm3030_vm5, %v7978_v6, %v3054_v39  ;;  %v3486_v63 = vmul.u32 14564, %v3483_v42  ;;  %v7230_v35 = vmul.u32 14564, %v3484_v62  ;;  %v2495_v44 = vpop.f32.mrf.mxu2 }
 0x22f   : > { %v4498_v58 = vsel %vm7219_vm10, %v4462_v10, %v3448_v51  ;;  %v3475_v32 = vshrl.u32 %v3474_v47, 4  ;;  %v3489_v11 = vmul.u32 58254, %v3484_v62  ;;  %v3490_v9 = vshll.u32 %v7215_v45, 16 }
 0x230   : > { %v5836_v49 = vpack.c.bf16 %v4639_v53, %v7167_v2  ;;  %v4746_v37 = vadd.f32 %v4639_v53, %v7167_v2  ;;  %v4791_v17 = vmul.f32 %v4639_v53, %v4639_v53  ;;  %v2582_v15 = vadd.f32 %v2495_v44, %v2197_v7  ;;  %v2112_v42 = vpop.f32.mrf.mxu1 }
 0x231   : > { %vm7245_vm11 = vcmp.lt.s32.totalorder %v4498_v58, 16  ;;  %v3476_v27 = vmul.u32 18, %v3475_v32  ;;  %v3491_v51 = vshrl.u32 %v7215_v45, 16  ;;  %v3492_v62 = vshll.u32 %v7230_v35, 16 }
 0x232   : > { %5837 = vst [vmem:[%s7235_s20] sm:$0xff] %v5836_v49   ;;  %v4826_v19 = vadd.f32 %v4791_v17, %v4790_v18  ;;  %v2975_v57 = vadd.f32 %v7095_v40, %v2582_v15  ;;  %v2198_v10 = vadd.f32 %v2112_v42, %v6557_v38  ;;  %v3493_v7 = vshrl.u32 %v7230_v35, 16 }
 0x233   : > { %v3150_v2 = vpop.f32.mrf.mxu0  ;;  %v3477_v47 = vsub.s32 %v7088_v41, %v3476_v27  ;;  %vm3494_vm12 = vc.u32 %v3486_v63, %v3490_v9  ;;  %v3496_v53 = vadd.s32 %v3490_v9, %v3486_v63  ;;  %v2755_v60 = vshrl.u32 %v7241_v54, 16 }
 0x234   : > { %v3235_v45 = vadd.f32 %v3148_v14, %v2975_v57  ;;  %v3495_v6 = vsel %vm3494_vm12, 1, %v7953_v50  ;;  %v2758_v18 = vshll.u32 %v7241_v54, 16  ;;  %v3512_v40 = vand.u32 65535, %v7193_v21 }
 0x235   : > { %vm4355_vm13 = vcmp.ne.s32.totalorder %v3477_v47, 0  ;;  %vm4391_vm14 = vcmp.lt.s32.totalorder %v3477_v47, 0  ;;  %v4463_v38 = vadd.s32 18, %v3477_v47  ;;  %v3497_v44 = vadd.s32 %v3495_v6, %v3489_v11 }
 0x236   : > { %v4640_v35 = vmul.f32 %v7115_v30, %v3235_v45  ;;  %vm4427_vm15 = vmand %vm4391_vm14, %vm4355_vm13  ;;  %vm3498_vm0 = vc.u32 %v3496_v53, %v3492_v62  ;;  %v2757_v41 = vrot.slane %v2755_v60, 2  ;;  %v2760_v58 = vrot.slane %v2758_v18, 3  ;;  %v2497_v63 = vpop.f32.mrf.mxu2 }
 0x237   : > { %v7266_v14 = vsel %vm7245_vm11, 1.0, %v7969_v16  ;;  %v4499_v32 = vsel %vm4427_vm15, %v4463_v38, %v3477_v47  ;;  %v3499_v9 = vsel %vm3498_vm0, 1, %v7953_v50  ;;  %v3513_v49 = vshrl.u32 %v7193_v21, 16 }
 0x238   : > { %v4747_v17 = vadd.f32 %v4746_v37, %v4640_v35  ;;  %v4792_v15 = vmul.f32 %v4640_v35, %v4640_v35  ;;  %v2583_v11 = vadd.f32 %v2497_v63, %v2198_v10  ;;  %vm4535_vm1 = vcmp.lt.s32.totalorder %v4499_v32, 16  ;;  %v2115_v30 = vpop.f32.mrf.mxu1 }
 0x239   : > { %v3501_v42 = vadd.s32 %v3499_v9, %v3497_v44  ;;  %v7270_v27 = vor.u32 %v2760_v58, %v2757_v41  ;;  %v3515_v62 = vmul.u32 14564, %v3512_v40  ;;  %v3516_v57 = vmul.u32 58254, %v3512_v40  ;;  %v7283_v44 = vpop.f32.mrf.mxu3  ;;  %v7286_v41 = vld [vmem:[%s6057_s25 + $0x70] sm:$0xff] }
 0x23a   : > { %v4827_v53 = vadd.f32 %v4826_v19, %v4792_v15  ;;  %v2976_v22 = vadd.f32 %v7152_v46, %v2583_v11  ;;  %v7274_v47 = vsel %vm4535_vm1, 1.0, %v7969_v16  ;;  %v3517_v45 = vmul.u32 14564, %v3513_v49 }
 0x23b   : > { %v3153_v60 = vpop.f32.mrf.mxu0  ;;  %v2199_v37 = vadd.f32 %v2115_v30, %v6564_v55  ;;  %v3502_v6 = vadd.s32 %v3501_v42, %v3491_v51  ;;  %v3518_v10 = vmul.u32 58254, %v3513_v49  ;;  %v3519_v18 = vshll.u32 %v3516_v57, 16  ;;  %2154 = vmatmul.bf16.gmra.mxu1 %v7122_v1  ;;  %2539 = vmatmul.bf16.gmra.mxu2 %v7132_v23 }
 0x23c   : > { %v3236_v38 = vadd.f32 %v3150_v2, %v2976_v22  ;;  %v2762_v46 = vsel %vm2637_vm3, %v7162_v34, %v7270_v27  ;;  %v3520_v19 = vshrl.u32 %v3516_v57, 16  ;;  %v3521_v40 = vshll.u32 %v3517_v45, 16 }
 0x23d   : > { %v3503_v55 = vadd.s32 %v3502_v6, %v3493_v7  ;;  %vm3523_vm2 = vc.u32 %v3515_v62, %v3519_v18  ;;  %v3525_v51 = vadd.s32 %v3519_v18, %v3515_v62  ;;  %v2018_v1 = vrot.slane %v7286_v41, 2  ;;  %v7294_v7 = vld [vmem:[%s6057_s25 + $0x80] sm:$0xff]  ;;  %2942 = vmatmul.bf16.gmra.mxu3 %v2762_v46 }
 0x23e   : > { %3192 = vmatmul.bf16.gmra.mxu0 %v7146_v36  ;;  %v4641_v23 = vmul.f32 %v7179_v48, %v3236_v38  ;;  %v3524_v2 = vsel %vm3523_vm2, 1, %v7953_v50  ;;  %v2403_v34 = vrot.slane %v7241_v54, 2  ;;  %v3056_v58 = vrot.slane %v7241_v54, 3  ;;  %v2500_v63 = vpop.f32.mrf.mxu2 }
 0x23f   : > { %v3504_v36 = vshrl.u32 %v3503_v55, 4  ;;  %v3522_v32 = vshrl.u32 %v3517_v45, 16  ;;  %v3526_v9 = vadd.s32 %v3524_v2, %v3518_v10  ;;  %vm3527_vm6 = vc.u32 %v3525_v51, %v3521_v40 }
 0x240   : > { %v5841_v49 = vpack.c.bf16 %v4641_v23, %v4640_v35  ;;  %v4748_v15 = vadd.f32 %v4747_v17, %v4641_v23  ;;  %v4793_v11 = vmul.f32 %v4641_v23, %v4641_v23  ;;  %v2584_v30 = vadd.f32 %v2500_v63, %v2199_v37  ;;  %v2117_v48 = vpop.f32.mrf.mxu1 }
 0x241   : > { %v3505_v42 = vmul.u32 18, %v3504_v36  ;;  %v3528_v62 = vsel %vm3527_vm6, 1, %v7953_v50  ;;  %v7302_v57 = vsel %vm1992_vm4, %v2016_v61, %v2018_v1  ;;  %v7309_v35 = vsel %vm1992_vm4, %v2401_v24, %v2403_v34  ;;  %v7336_v55 = vpop.f32.mrf.mxu3 }
 0x242   : > { %5921 = vst [vmem:[%s7235_s20 + $0x8] sm:$0xff] %v5841_v49   ;;  %v4828_v17 = vadd.f32 %v4827_v53, %v4793_v11  ;;  %v2977_v22 = vadd.f32 %v7182_v31, %v2584_v30  ;;  %v3530_v37 = vadd.s32 %v3528_v62, %v3526_v9  ;;  %v7318_v28 = vsel %vm3030_vm5, %v3054_v39, %v3056_v58 }
 0x243   : > { %v3155_v45 = vpop.f32.mrf.mxu0  ;;  %v2200_v61 = vadd.f32 %v2117_v48, %v6576_v52  ;;  %v3506_v6 = vsub.s32 %v7174_v59, %v3505_v42  ;;  %v7323_v24 = vadd.s32 64, %v6882_v0  ;;  %v2764_v53 = vshrl.u32 %v7294_v7, 16 }
 0x244   : > { %v3237_v10 = vadd.f32 %v3153_v60, %v2977_v22  ;;  %v3531_v31 = vadd.s32 %v3530_v37, %v3520_v19  ;;  %v2767_v18 = vshll.u32 %v7294_v7, 16  ;;  %v7328_v38 = vadd.s32 72, %v6882_v0 }
 0x245   : > { %vm4356_vm7 = vcmp.ne.s32.totalorder %v3506_v6, 0  ;;  %vm4392_vm8 = vcmp.lt.s32.totalorder %v3506_v6, 0  ;;  %v4464_v56 = vadd.s32 18, %v3506_v6  ;;  %v3541_v39 = vand.u32 65535, %v7323_v24 }
 0x246   : > { %v4642_v52 = vmul.f32 %v7266_v14, %v3237_v10  ;;  %vm4428_vm9 = vmand %vm4392_vm8, %vm4356_vm7  ;;  %v3532_v59 = vadd.s32 %v3531_v31, %v3522_v32  ;;  %v3542_v46 = vshrl.u32 %v7323_v24, 16  ;;  %v7334_v40 = vadd.s32 80, %v6882_v0  ;;  %v2502_v60 = vpop.f32.mrf.mxu2 }
 0x247   : > { %v4500_v19 = vsel %vm4428_vm9, %v4464_v56, %v3506_v6  ;;  %v3544_v51 = vmul.u32 14564, %v3541_v39  ;;  %v3545_v23 = vmul.u32 58254, %v3541_v39  ;;  %v2766_v2 = vrot.slane %v2764_v53, 2 }
 0x248   : > { %v4749_v63 = vadd.f32 %v4748_v15, %v4642_v52  ;;  %v4794_v36 = vmul.f32 %v4642_v52, %v4642_v52  ;;  %v2585_v9 = vadd.f32 %v2502_v60, %v2200_v61  ;;  %vm4536_vm10 = vcmp.lt.s32.totalorder %v4500_v19, 16  ;;  %v2120_v49 = vpop.f32.mrf.mxu1 }
 0x249   : > { %v7339_v14 = vsel %vm4536_vm10, 1.0, %v7969_v16  ;;  %v3533_v32 = vshrl.u32 %v3532_v59, 4  ;;  %v3546_v11 = vmul.u32 14564, %v3542_v46  ;;  %v2769_v30 = vrot.slane %v2767_v18, 3 }
 0x24a   : > { %v4829_v48 = vadd.f32 %v4828_v17, %v4794_v36  ;;  %v2978_v42 = vadd.f32 %v7255_v26, %v2585_v9  ;;  %v3547_v22 = vmul.u32 58254, %v3542_v46  ;;  %v3548_v37 = vshll.u32 %v3545_v23, 16 }
 0x24b   : > { %v3158_v62 = vpop.f32.mrf.mxu0  ;;  %v2201_v6 = vadd.f32 %v2120_v49, %v6589_v12  ;;  %v3534_v53 = vmul.u32 18, %v3533_v32  ;;  %v3549_v15 = vshrl.u32 %v3545_v23, 16  ;;  %v3550_v10 = vshll.u32 %v3546_v11, 16  ;;  %2159 = vmatmul.bf16.gmra.mxu1 %v7203_v43  ;;  %2544 = vmatmul.bf16.gmra.mxu2 %v7212_v8 }
 0x24c   : > { %v3238_v61 = vadd.f32 %v3155_v45, %v2978_v42  ;;  %v3551_v31 = vshrl.u32 %v3546_v11, 16  ;;  %vm3552_vm11 = vc.u32 %v3544_v51, %v3548_v37  ;;  %v3554_v56 = vadd.s32 %v3548_v37, %v3544_v51 }
 0x24d   : > { %v3535_v26 = vsub.s32 %v7193_v21, %v3534_v53  ;;  %v3553_v17 = vsel %vm3552_vm11, 1, %v7953_v50  ;;  %v7348_v18 = vor.u32 %v2769_v30, %v2766_v2  ;;  %v3570_v12 = vand.u32 65535, %v7328_v38  ;;  %v7354_v2 = vpop.f32.mrf.mxu3 }
 0x24e   : > { %3197 = vmatmul.bf16.gmra.mxu0 %v7228_v5  ;;  %v4643_v39 = vmul.f32 %v7274_v47, %v3238_v61  ;;  %v3555_v45 = vadd.s32 %v3553_v17, %v3547_v22  ;;  %vm3556_vm12 = vc.u32 %v3554_v56, %v3550_v10  ;;  %v3571_v43 = vshrl.u32 %v7328_v38, 16  ;;  %v2505_v8 = vpop.f32.mrf.mxu2 }
 0x24f   : > { %vm4357_vm13 = vcmp.ne.s32.totalorder %v3535_v26, 0  ;;  %vm4393_vm14 = vcmp.lt.s32.totalorder %v3535_v26, 0  ;;  %v4465_v59 = vadd.s32 18, %v3535_v26  ;;  %v3557_v5 = vsel %vm3556_vm12, 1, %v7953_v50 }
 0x250   : > { %v5846_v21 = vpack.c.bf16 %v4643_v39, %v4642_v52  ;;  %v4750_v46 = vadd.f32 %v4749_v63, %v4643_v39  ;;  %v4795_v60 = vmul.f32 %v4643_v39, %v4643_v39  ;;  %v2586_v19 = vadd.f32 %v2505_v8, %v2201_v6  ;;  %vm4429_vm15 = vmand %vm4393_vm14, %vm4357_vm13  ;;  %v2122_v51 = vpop.f32.mrf.mxu1 }
 0x251   : > { %v4501_v23 = vsel %vm4429_vm15, %v4465_v59, %v3535_v26  ;;  %v3559_v47 = vadd.s32 %v3557_v5, %v3555_v45  ;;  %v2771_v36 = vsel %vm2637_vm3, %v7270_v27, %v7348_v18  ;;  %v3574_v9 = vmul.u32 58254, %v3570_v12  ;;  %v7364_v27 = vld [vmem:[%s6057_s25 + $0x78] sm:$0xff]  ;;  %v7379_v59 = vld [vmem:[%s6057_s25 + $0x88] sm:$0xff] }
 0x252   : > { %5922 = vst [vmem:[%s7235_s20 + $0x10] sm:$0xff] %v5846_v21   ;;  %v4830_v49 = vadd.f32 %v4829_v48, %v4795_v60  ;;  %v2979_v32 = vadd.f32 %v7283_v44, %v2586_v19  ;;  %vm4537_vm0 = vcmp.lt.s32.totalorder %v4501_v23, 16  ;;  %2947 = vmatmul.bf16.gmra.mxu3 %v2771_v36  ;;  %v3573_v63 = vmul.u32 14564, %v3570_v12 }
 0x253   : > { %v3160_v52 = vpop.f32.mrf.mxu0  ;;  %v2202_v11 = vadd.f32 %v2122_v51, %v6604_v29  ;;  %v5658_v30 = vsel %vm4537_vm0, 1.0, %v7969_v16  ;;  %v3560_v42 = vadd.s32 %v3559_v47, %v3549_v15  ;;  %v3575_v22 = vmul.u32 14564, %v3571_v43 }
 0x254   : > { %v3239_v37 = vadd.f32 %v3158_v62, %v2979_v32  ;;  %v3576_v6 = vmul.u32 58254, %v3571_v43  ;;  %v3577_v53 = vshll.u32 %v3574_v9, 16  ;;  %v2020_v10 = vrot.slane %v7364_v27, 2 }
 0x255   : > { %v3561_v48 = vadd.s32 %v3560_v42, %v3551_v31  ;;  %v3578_v61 = vshrl.u32 %v3574_v9, 16  ;;  %v3579_v44 = vshll.u32 %v3575_v22, 16  ;;  %v2405_v56 = vrot.slane %v7294_v7, 2  ;;  %v7400_v36 = vpop.f32.mrf.mxu3 }
 0x256   : > { %v4644_v26 = vmul.f32 %v7339_v14, %v3239_v37  ;;  %v3580_v29 = vshrl.u32 %v3575_v22, 16  ;;  %vm3581_vm1 = vc.u32 %v3573_v63, %v3577_v53  ;;  %v3583_v17 = vadd.s32 %v3577_v53, %v3573_v63  ;;  %v2507_v15 = vpop.f32.mrf.mxu2 }
 0x257   : > { %v3562_v12 = vshrl.u32 %v3561_v48, 4  ;;  %v3582_v62 = vsel %vm3581_vm1, 1, %v7953_v50  ;;  %v7375_v31 = vsel %vm1992_vm4, %v2018_v1, %v2020_v10  ;;  %v3058_v39 = vrot.slane %v7294_v7, 3 }
 0x258   : > { %v4751_v45 = vadd.f32 %v4750_v46, %v4644_v26  ;;  %v4796_v43 = vmul.f32 %v4644_v26, %v4644_v26  ;;  %v2587_v8 = vadd.f32 %v2507_v15, %v2202_v11  ;;  %v3584_v14 = vadd.s32 %v3582_v62, %v3576_v6  ;;  %v2125_v5 = vpop.f32.mrf.mxu1 }
 0x259   : > { %v3563_v21 = vmul.u32 18, %v3562_v12  ;;  %vm3585_vm2 = vc.u32 %v3583_v17, %v3579_v44  ;;  %v7386_v41 = vsel %vm1992_vm4, %v2403_v34, %v2405_v56  ;;  %v3599_v1 = vand.u32 65535, %v7334_v40 }
 0x25a   : > { %v4831_v60 = vadd.f32 %v4830_v49, %v4796_v43  ;;  %v2980_v46 = vadd.f32 %v7336_v55, %v2587_v8  ;;  %v3586_v51 = vsel %vm3585_vm2, 1, %v7953_v50  ;;  %v7396_v23 = vsel %vm3030_vm5, %v3056_v58, %v3058_v39 }
 0x25b   : > { %v3163_v19 = vpop.f32.mrf.mxu0  ;;  %v2203_v47 = vadd.f32 %v2125_v5, %v6614_v33  ;;  %v3564_v34 = vsub.s32 %v7323_v24, %v3563_v21  ;;  %v3588_v9 = vadd.s32 %v3586_v51, %v3584_v14  ;;  %v3600_v49 = vshrl.u32 %v7334_v40, 16  ;;  %2164 = vmatmul.bf16.gmra.mxu1 %v7302_v57  ;;  %2549 = vmatmul.bf16.gmra.mxu2 %v7309_v35 }
 0x25c   : > { %v3240_v55 = vadd.f32 %v3160_v52, %v2980_v46  ;;  %v3602_v32 = vmul.u32 14564, %v3599_v1  ;;  %v3603_v63 = vmul.u32 58254, %v3599_v1  ;;  %v2773_v54 = vshrl.u32 %v7379_v59, 16 }
 0x25d   : > { %vm4358_vm6 = vcmp.ne.s32.totalorder %v3564_v34, 0  ;;  %vm4394_vm7 = vcmp.lt.s32.totalorder %v3564_v34, 0  ;;  %v4466_v33 = vadd.s32 18, %v3564_v34  ;;  %v3589_v58 = vadd.s32 %v3588_v9, %v3578_v61 }
 0x25e   : > { %3202 = vmatmul.bf16.gmra.mxu0 %v7318_v28  ;;  %v4645_v24 = vmul.f32 %v5658_v30, %v3240_v55  ;;  %vm4430_vm8 = vmand %vm4394_vm7, %vm4358_vm6  ;;  %v7407_v11 = vmul.u32 14564, %v3600_v49  ;;  %v3605_v42 = vmul.u32 58254, %v3600_v49  ;;  %v2776_v57 = vshll.u32 %v7379_v59, 16  ;;  %v2510_v52 = vpop.f32.mrf.mxu2 }
 0x25f   : > { %v4502_v35 = vsel %vm4430_vm8, %v4466_v33, %v3564_v34  ;;  %v3590_v22 = vadd.s32 %v3589_v58, %v3580_v29  ;;  %v3606_v37 = vshll.u32 %v3603_v63, 16  ;;  %v3607_v6 = vshrl.u32 %v3603_v63, 16 }
 0x260   : > { %v5851_v53 = vpack.c.bf16 %v4645_v24, %v4644_v26  ;;  %v4752_v48 = vadd.f32 %v4751_v45, %v4645_v24  ;;  %v4797_v28 = vmul.f32 %v4645_v24, %v4645_v24  ;;  %v2588_v44 = vadd.f32 %v2510_v52, %v2203_v47  ;;  %v2127_v17 = vpop.f32.mrf.mxu1 }
 0x261   : > { %vm4538_vm9 = vcmp.lt.s32.totalorder %v4502_v35, 16  ;;  %v3591_v61 = vshrl.u32 %v3590_v22, 4  ;;  %v3608_v30 = vshll.u32 %v7407_v11, 16  ;;  %v2775_v15 = vrot.slane %v2773_v54, 2 }
 0x262   : > { %5923 = vst [vmem:[%s7235_s20 + $0x18] sm:$0xff] %v5851_v53   ;;  %v4832_v12 = vadd.f32 %v4831_v60, %v4797_v28  ;;  %v2981_v62 = vadd.f32 %v7354_v2, %v2588_v44  ;;  %v5659_v43 = vsel %vm4538_vm9, 1.0, %v7969_v16  ;;  %v3609_v29 = vshrl.u32 %v7407_v11, 16  ;;  %v7421_v2 = vpop.f32.mrf.mxu3 }
 0x263   : > { %v3165_v8 = vpop.f32.mrf.mxu0  ;;  %v3592_v14 = vmul.u32 18, %v3591_v61  ;;  %vm3610_vm10 = vc.u32 %v3602_v32, %v3606_v37  ;;  %v3612_v26 = vadd.s32 %v3606_v37, %v3602_v32  ;;  %v2778_v45 = vrot.slane %v2776_v57, 3  ;;  %v7432_v57 = vld [vmem:[%s6057_s25 + $0x80] sm:$0xff] }
 0x264   : > { %v3241_v5 = vadd.f32 %v3163_v19, %v2981_v62  ;;  %v2204_v21 = vadd.f32 %v2127_v17, %v6626_v25  ;;  %v3611_v1 = vsel %vm3610_vm10, 1, %v7953_v50  ;;  %v7418_v46 = vadd.s32 88, %v6882_v0 }
 0x265   : > { %v3593_v60 = vsub.s32 %v7328_v38, %v3592_v14  ;;  %v3613_v51 = vadd.s32 %v3611_v1, %v3605_v42  ;;  %vm3614_vm11 = vc.u32 %v3612_v26, %v3608_v30  ;;  %v7423_v47 = vor.u32 %v2778_v45, %v2775_v15 }
 0x266   : > { %v4646_v34 = vmul.f32 %v5659_v43, %v3241_v5  ;;  %v3615_v9 = vsel %vm3614_vm11, 1, %v7953_v50  ;;  %v3628_v19 = vand.u32 65535, %v7418_v46  ;;  %v3629_v25 = vshrl.u32 %v7418_v46, 16  ;;  %v2512_v49 = vpop.f32.mrf.mxu2 }
 0x267   : > { %vm4359_vm12 = vcmp.ne.s32.totalorder %v3593_v60, 0  ;;  %vm4395_vm13 = vcmp.lt.s32.totalorder %v3593_v60, 0  ;;  %v4467_v55 = vadd.s32 18, %v3593_v60  ;;  %v3617_v32 = vadd.s32 %v3615_v9, %v3613_v51 }
 0x268   : > { %v4753_v38 = vadd.f32 %v4752_v48, %v4646_v34  ;;  %v4798_v63 = vmul.f32 %v4646_v34, %v4646_v34  ;;  %v2589_v54 = vadd.f32 %v2512_v49, %v2204_v21  ;;  %vm4431_vm14 = vmand %vm4395_vm13, %vm4359_vm12  ;;  %v2780_v33 = vsel %vm2637_vm3, %v7348_v18, %v7423_v47  ;;  %v2130_v24 = vpop.f32.mrf.mxu1  ;;  %v7455_v21 = vld [vmem:[%s6057_s25 + $0x90] sm:$0xff] }
 0x269   : > { %v4503_v58 = vsel %vm4431_vm14, %v4467_v55, %v3593_v60  ;;  %v3618_v11 = vadd.s32 %v3617_v32, %v3607_v6  ;;  %2952 = vmatmul.bf16.gmra.mxu3 %v2780_v33  ;;  %v3632_v42 = vmul.u32 58254, %v3628_v19  ;;  %v2022_v52 = vrot.slane %v7432_v57, 2 }
 0x26a   : > { %v4833_v35 = vadd.f32 %v4832_v12, %v4798_v63  ;;  %v2982_v22 = vadd.f32 %v7400_v36, %v2589_v54  ;;  %vm4539_vm15 = vcmp.lt.s32.totalorder %v4503_v58, 16  ;;  %v3631_v53 = vmul.u32 14564, %v3628_v19 }
 0x26b   : > { %v3168_v37 = vpop.f32.mrf.mxu0  ;;  %v5660_v48 = vsel %vm4539_vm15, 1.0, %v7969_v16  ;;  %v2205_v28 = vadd.f32 %v2130_v24, %v6633_v20  ;;  %v3619_v18 = vadd.s32 %v3618_v11, %v3609_v29  ;;  %v3633_v44 = vmul.u32 14564, %v3629_v25  ;;  %2169 = vmatmul.bf16.gmra.mxu1 %v7375_v31  ;;  %2554 = vmatmul.bf16.gmra.mxu2 %v7386_v41 }
 0x26c   : > { %v3242_v17 = vadd.f32 %v3165_v8, %v2982_v22  ;;  %v3634_v6 = vmul.u32 58254, %v3629_v25  ;;  %v3635_v61 = vshll.u32 %v3632_v42, 16  ;;  %v3636_v30 = vshrl.u32 %v3632_v42, 16  ;;  %v2910_v8 = vpop.f32.mrf.mxu3 }
 0x26d   : > { %v3620_v36 = vshrl.u32 %v3619_v18, 4  ;;  %v3637_v15 = vshll.u32 %v3633_v44, 16  ;;  %v7446_v20 = vsel %vm1992_vm4, %v2020_v10, %v2022_v52  ;;  %v2407_v12 = vrot.slane %v7379_v59, 2 }
 0x26e   : > { %3207 = vmatmul.bf16.gmra.mxu0 %v7396_v23  ;;  %v4647_v31 = vmul.f32 %v5660_v48, %v3242_v17  ;;  %vm3639_vm0 = vc.u32 %v3631_v53, %v3635_v61  ;;  %v3641_v41 = vadd.s32 %v3635_v61, %v3631_v53  ;;  %v3060_v62 = vrot.slane %v7379_v59, 3  ;;  %v2515_v43 = vpop.f32.mrf.mxu2 }
 0x26f   : > { %v3621_v23 = vmul.u32 18, %v3620_v36  ;;  %v3638_v29 = vshrl.u32 %v3633_v44, 16  ;;  %v3640_v14 = vsel %vm3639_vm0, 1, %v7953_v50  ;;  %v7452_v27 = vadd.s32 96, %v6882_v0 }
 0x270   : > { %v5856_v10 = vpack.c.bf16 %v4647_v31, %v4646_v34  ;;  %v4754_v26 = vadd.f32 %v4753_v38, %v4647_v31  ;;  %v4799_v45 = vmul.f32 %v4647_v31, %v4647_v31  ;;  %v2590_v5 = vadd.f32 %v2515_v43, %v2205_v28  ;;  %v2132_v60 = vpop.f32.mrf.mxu1 }
 0x271   : > { %v3622_v1 = vsub.s32 %v7334_v40, %v3621_v23  ;;  %v3642_v51 = vadd.s32 %v3640_v14, %v3634_v6  ;;  %vm3643_vm1 = vc.u32 %v3641_v41, %v3637_v15  ;;  %v2408_v9 = vsel %vm1992_vm4, %v2405_v56, %v2407_v12 }
 0x272   : > { %5924 = vst [vmem:[%s7235_s20 + $0x20] sm:$0xff] %v5856_v10   ;;  %v4834_v19 = vadd.f32 %v4833_v35, %v4799_v45  ;;  %v2983_v34 = vadd.f32 %v7421_v2, %v2590_v5  ;;  %v3644_v25 = vsel %vm3643_vm1, 1, %v7953_v50  ;;  %v3061_v40 = vsel %vm3030_vm5, %v3058_v39, %v3060_v62 }
 0x273   : > { %vm4360_vm2 = vcmp.ne.s32.totalorder %v3622_v1, 0  ;;  %vm4396_vm6 = vcmp.lt.s32.totalorder %v3622_v1, 0  ;;  %v4468_v49 = vadd.s32 18, %v3622_v1  ;;  %v3646_v55 = vadd.s32 %v3644_v25, %v3642_v51  ;;  %v3170_v38 = vpop.f32.mrf.mxu0 }
 0x274   : > { %v3243_v32 = vadd.f32 %v3168_v37, %v2983_v34  ;;  %vm4432_vm7 = vmand %vm4396_vm6, %vm4360_vm2  ;;  %v3657_v56 = vand.u32 65535, %v7452_v27  ;;  %v3658_v63 = vshrl.u32 %v7452_v27, 16  ;;  %v2782_v2 = vshrl.u32 %v7455_v21, 16  ;;  %v2913_v6 = vpop.f32.mrf.mxu3 }
 0x275   : > { %v4504_v54 = vsel %vm4432_vm7, %v4468_v49, %v3622_v1  ;;  %v2206_v33 = vadd.f32 %v2132_v60, %v6657_v4  ;;  %v3647_v58 = vadd.s32 %v3646_v55, %v3636_v30  ;;  %v2785_v7 = vshll.u32 %v7455_v21, 16 }
 0x276   : > { %vm4540_vm8 = vcmp.lt.s32.totalorder %v4504_v54, 16  ;;  %v3661_v39 = vmul.u32 58254, %v3657_v56  ;;  %v3662_v24 = vmul.u32 14564, %v3658_v63  ;;  %v7477_v11 = vadd.s32 104, %v6882_v0  ;;  %v2517_v35 = vpop.f32.mrf.mxu2 }
 0x277   : > { %v5661_v42 = vsel %vm4540_vm8, 1.0, %v7969_v16  ;;  %v3648_v22 = vadd.s32 %v3647_v58, %v3638_v29  ;;  %v3660_v37 = vmul.u32 14564, %v3657_v56  ;;  %v2784_v53 = vrot.slane %v2782_v2, 2 }
 0x278   : > { %v7480_v48 = vmul.f32 %v5661_v42, %v3243_v32  ;;  %v2591_v28 = vadd.f32 %v2517_v35, %v2206_v33  ;;  %v3663_v18 = vmul.u32 58254, %v3658_v63  ;;  %v3664_v4 = vshll.u32 %v3661_v39, 16  ;;  %v2135_v17 = vpop.f32.mrf.mxu1 }
 0x279   : > { %v3649_v44 = vshrl.u32 %v3648_v22, 4  ;;  %v3665_v61 = vshrl.u32 %v3661_v39, 16  ;;  %v3666_v30 = vshll.u32 %v3662_v24, 16  ;;  %v2787_v36 = vrot.slane %v2785_v7, 3 }
 0x27a   : > { %v4755_v15 = vadd.f32 %v4754_v26, %v7480_v48  ;;  %v4800_v31 = vmul.f32 %v7480_v48, %v7480_v48  ;;  %v2984_v41 = vadd.f32 %v2910_v8, %v2591_v28  ;;  %v3667_v43 = vshrl.u32 %v3662_v24, 16  ;;  %v7501_v24 = vld [vmem:[%s6057_s25 + $0x88] sm:$0xff]  ;;  %v7981_v28 = vld [vmem:[#allocation10_spill] sm:$0xff] }
 0x27b   : > { %v3650_v23 = vmul.u32 18, %v3649_v44  ;;  %vm3668_vm9 = vc.u32 %v3660_v37, %v3664_v4  ;;  %v3670_v29 = vadd.s32 %v3664_v4, %v3660_v37  ;;  %v7485_v14 = vor.u32 %v2787_v36, %v2784_v53  ;;  %2174 = vmatmul.bf16.gmra.mxu1 %v7446_v20  ;;  %2559 = vmatmul.bf16.gmra.mxu2 %v2408_v9  ;;  %v7495_v51 = vpop.f32.mrf.mxu0 }
 0x27c   : > { %v4835_v10 = vadd.f32 %v4834_v19, %v4800_v31  ;;  %v2207_v45 = vadd.f32 %v2135_v17, %v6667_v13  ;;  %v3669_v5 = vsel %vm3668_vm9, 1, %v7953_v50  ;;  %v3686_v26 = vand.u32 65535, %v7477_v11  ;;  %v2915_v39 = vpop.f32.mrf.mxu3  ;;  %v7508_v17 = vld [vmem:[%s6057_s25 + $0x98] sm:$0xff] }
 0x27d   : > { %v3651_v1 = vsub.s32 %v7418_v46, %v3650_v23  ;;  %v3671_v8 = vadd.s32 %v3669_v5, %v3663_v18  ;;  %vm3672_vm10 = vc.u32 %v3670_v29, %v3666_v30  ;;  %v2789_v60 = vsel %vm2637_vm3, %v7423_v47, %v7485_v14 }
 0x27e   : > { %3212 = vmatmul.bf16.gmra.mxu0 %v3061_v40  ;;  %v3673_v13 = vsel %vm3672_vm10, 1, %v7953_v50  ;;  %2957 = vmatmul.bf16.gmra.mxu3 %v2789_v60  ;;  %v3687_v20 = vshrl.u32 %v7477_v11, 16  ;;  %v3689_v9 = vmul.u32 14564, %v3686_v26  ;;  %v3690_v19 = vmul.u32 58254, %v3686_v26  ;;  %v2520_v46 = vpop.f32.mrf.mxu2 }
 0x27f   : > { %vm4361_vm11 = vcmp.ne.s32.totalorder %v3651_v1, 0  ;;  %vm4397_vm12 = vcmp.lt.s32.totalorder %v3651_v1, 0  ;;  %v4469_v34 = vadd.s32 18, %v3651_v1  ;;  %v3675_v25 = vadd.s32 %v3673_v13, %v3671_v8 }
 0x280   : > { %v3244_v40 = vadd.f32 %v3170_v38, %v2984_v41  ;;  %vm4433_vm13 = vmand %vm4397_vm12, %vm4361_vm11  ;;  %v2592_v49 = vadd.f32 %v2520_v46, %v2207_v45  ;;  %v3691_v55 = vmul.u32 14564, %v3687_v20  ;;  %v3693_v47 = vshll.u32 %v3690_v19, 16  ;;  %v2137_v63 = vpop.f32.mrf.mxu1 }
 0x281   : > { %v4505_v32 = vsel %vm4433_vm13, %v4469_v34, %v3651_v1  ;;  %v3676_v56 = vadd.s32 %v3675_v25, %v3665_v61  ;;  %v3692_v2 = vmul.u32 58254, %v3687_v20  ;;  %v3694_v54 = vshrl.u32 %v3690_v19, 16 }
 0x282   : > { %vm4541_vm14 = vcmp.lt.s32.totalorder %v4505_v32, 16  ;;  %v3695_v33 = vshll.u32 %v3691_v55, 16  ;;  %vm3697_vm15 = vc.u32 %v3689_v9, %v3693_v47  ;;  %v2024_v38 = vrot.slane %v7501_v24, 2 }
 0x283   : > { %v5662_v58 = vsel %vm4541_vm14, 1.0, %v7969_v16  ;;  %v3677_v7 = vadd.s32 %v3676_v56, %v3667_v43  ;;  %v2985_v35 = vadd.f32 %v2913_v6, %v2592_v49  ;;  %v3698_v22 = vsel %vm3697_vm15, 1, %v7953_v50  ;;  %v3175_v45 = vpop.f32.mrf.mxu0 }
 0x284   : > { %v4649_v42 = vmul.f32 %v5662_v58, %v3244_v40  ;;  %v3699_v37 = vadd.s32 %v3693_v47, %v3689_v9  ;;  %v2208_v18 = vadd.f32 %v2137_v63, %v7981_v28  ;;  %v3700_v4 = vadd.s32 %v3698_v22, %v3692_v2  ;;  %v2918_v25 = vpop.f32.mrf.mxu3 }
 0x285   : > { %v3678_v53 = vshrl.u32 %v3677_v7, 4  ;;  %v2409_v44 = vrot.slane %v7455_v21, 2  ;;  %v3696_v6 = vshrl.u32 %v3691_v55, 16  ;;  %v3062_v23 = vrot.slane %v7455_v21, 3 }
 0x286   : > { %v5861_v61 = vpack.c.bf16 %v4649_v42, %v7480_v48  ;;  %v4756_v30 = vadd.f32 %v4755_v15, %v4649_v42  ;;  %v4801_v36 = vmul.f32 %v4649_v42, %v4649_v42  ;;  %vm3701_vm0 = vc.u32 %v3699_v37, %v3695_v33  ;;  %v2522_v41 = vpop.f32.mrf.mxu2 }
 0x287   : > { %v3679_v31 = vmul.u32 18, %v3678_v53  ;;  %v3702_v43 = vsel %vm3701_vm0, 1, %v7953_v50  ;;  %v2025_v48 = vsel %vm1992_vm4, %v2022_v52, %v2024_v38  ;;  %v7520_v15 = vadd.s32 112, %v6882_v0 }
 0x288   : > { %5925 = vst [vmem:[%s7235_s20 + $0x28] sm:$0xff] %v5861_v61   ;;  %v4836_v29 = vadd.f32 %v4835_v10, %v4801_v36  ;;  %v3704_v5 = vadd.s32 %v3702_v43, %v3700_v4  ;;  %v2593_v1 = vadd.f32 %v2522_v41, %v2208_v18  ;;  %v2140_v8 = vpop.f32.mrf.mxu1  ;;  %v2410_v10 = vsel %vm1992_vm4, %v2407_v12, %v2409_v44 }
 0x289   : > { %v3680_v26 = vsub.s32 %v7452_v27, %v3679_v31  ;;  %v2791_v60 = vshrl.u32 %v7508_v17, 16  ;;  %v3063_v57 = vsel %vm3030_vm5, %v3060_v62, %v3062_v23  ;;  %v3715_v52 = vand.u32 65535, %v7520_v15 }
 0x28a   : > { %v3705_v13 = vadd.s32 %v3704_v5, %v3694_v54  ;;  %v2794_v27 = vshll.u32 %v7508_v17, 16  ;;  %v3716_v9 = vshrl.u32 %v7520_v15, 16  ;;  %v3245_v12 = vadd.f32 %v7495_v51, %v2985_v35 }
 0x28b   : > { %vm4362_vm1 = vcmp.ne.s32.totalorder %v3680_v26, 0  ;;  %vm4398_vm2 = vcmp.lt.s32.totalorder %v3680_v26, 0  ;;  %v4470_v20 = vadd.s32 18, %v3680_v26  ;;  %2179 = vmatmul.bf16.gmra.mxu1 %v2025_v48  ;;  %2564 = vmatmul.bf16.gmra.mxu2 %v2410_v10  ;;  %v3718_v34 = vmul.u32 14564, %v3715_v52  ;;  %v3178_v4 = vpop.f32.mrf.mxu0 }
 0x28c   : > { %vm4434_vm6 = vmand %vm4398_vm2, %vm4362_vm1  ;;  %v3706_v19 = vadd.s32 %v3705_v13, %v3696_v6  ;;  %v3719_v46 = vmul.u32 58254, %v3715_v52  ;;  %v3720_v62 = vmul.u32 14564, %v3716_v9  ;;  %v2793_v40 = vrot.slane %v2791_v60, 2 }
 0x28d   : > { %v4506_v59 = vsel %vm4434_vm6, %v4470_v20, %v3680_v26  ;;  %v2986_v49 = vadd.f32 %v2915_v39, %v2593_v1  ;;  %v3721_v63 = vmul.u32 58254, %v3716_v9  ;;  %v2796_v2 = vrot.slane %v2794_v27, 3  ;;  %v7982_v26 = vld [vmem:[#allocation11_spill] sm:$0xff]  ;;  %v7558_v27 = vld [vmem:[%s6057_s25 + $0x90] sm:$0xff] }
 0x28e   : > { %3217 = vmatmul.bf16.gmra.mxu0 %v3063_v57  ;;  %vm4542_vm7 = vcmp.lt.s32.totalorder %v4506_v59, 16  ;;  %v3707_v55 = vshrl.u32 %v3706_v19, 4  ;;  %v3722_v47 = vshll.u32 %v3719_v46, 16  ;;  %v2525_v56 = vpop.f32.mrf.mxu2  ;;  %v3724_v51 = vshll.u32 %v3720_v62, 16 }
 0x28f   : > { %v5663_v32 = vsel %vm4542_vm7, 1.0, %v7969_v16  ;;  %v2209_v58 = vadd.f32 %v2140_v8, %v6700_v3  ;;  %v7541_v22 = vor.u32 %v2796_v2, %v2793_v40  ;;  %v7544_v39 = vadd.s32 120, %v6882_v0 }
 0x290   : > { %v4650_v54 = vmul.f32 %v5663_v32, %v3245_v12  ;;  %v3708_v33 = vmul.u32 18, %v3707_v55  ;;  %vm3726_vm8 = vc.u32 %v3718_v34, %v3722_v47  ;;  %v3728_v42 = vadd.s32 %v3722_v47, %v3718_v34  ;;  %v2142_v35 = vpop.f32.mrf.mxu1 }
 0x291   : > { %v3727_v7 = vsel %vm3726_vm8, 1, %v7953_v50  ;;  %v3246_v28 = vadd.f32 %v3175_v45, %v2986_v49  ;;  %v3723_v61 = vshrl.u32 %v3719_v46, 16  ;;  %v2798_v3 = vsel %vm2637_vm3, %v7485_v14, %v7541_v22  ;;  %v2920_v14 = vpop.f32.mrf.mxu3 }
 0x292   : > { %v4757_v37 = vadd.f32 %v4756_v30, %v4650_v54  ;;  %v4802_v53 = vmul.f32 %v4650_v54, %v4650_v54  ;;  %v3709_v18 = vsub.s32 %v7477_v11, %v3708_v33  ;;  %v3729_v36 = vadd.s32 %v3727_v7, %v3721_v63  ;;  %2962 = vmatmul.bf16.gmra.mxu3 %v2798_v3 }
 0x293   : > { %vm3730_vm9 = vc.u32 %v3728_v42, %v3724_v51  ;;  %v3725_v6 = vshrl.u32 %v3720_v62, 16  ;;  %v3744_v11 = vand.u32 65535, %v7544_v39  ;;  %v3745_v43 = vshrl.u32 %v7544_v39, 16  ;;  %v3180_v63 = vpop.f32.mrf.mxu0 }
 0x294   : > { %v4837_v31 = vadd.f32 %v4836_v29, %v4802_v53  ;;  %vm4363_vm10 = vcmp.ne.s32.totalorder %v3709_v18, 0  ;;  %vm4399_vm11 = vcmp.lt.s32.totalorder %v3709_v18, 0  ;;  %v4471_v41 = vadd.s32 18, %v3709_v18 }
 0x295   : > { %vm4435_vm12 = vmand %vm4399_vm11, %vm4363_vm10  ;;  %v3731_v30 = vsel %vm3730_vm9, 1, %v7953_v50  ;;  %v2594_v5 = vadd.f32 %v2525_v56, %v2209_v58  ;;  %v2210_v1 = vadd.f32 %v2142_v35, %v7982_v26  ;;  %v3747_v8 = vmul.u32 14564, %v3744_v11  ;;  %v2616_v58 = vld [vmem:[%s6057_s25 + $0xa0] sm:$0x3] }
 0x296   : > { %v4507_v45 = vsel %vm4435_vm12, %v4471_v41, %v3709_v18  ;;  %v3733_v48 = vadd.s32 %v3731_v30, %v3729_v36  ;;  %v2527_v29 = vpop.f32.mrf.mxu2  ;;  %v3748_v10 = vmul.u32 58254, %v3744_v11  ;;  %v7554_v60 = vmul.u32 14564, %v3745_v43 }
 0x297   : > { %vm4543_vm13 = vcmp.lt.s32.totalorder %v4507_v45, 16  ;;  %v2595_v52 = vadd.f32 %v2527_v29, %v2210_v1  ;;  %v2026_v20 = vrot.slane %v7558_v27, 2  ;;  %v3750_v12 = vmul.u32 58254, %v3745_v43 }
 0x298   : > { %v5664_v13 = vsel %vm4543_vm13, 1.0, %v7969_v16  ;;  %v3734_v57 = vadd.s32 %v3733_v48, %v3723_v61  ;;  %v3751_v19 = vshll.u32 %v3748_v10, 16  ;;  %v2145_v34 = vpop.f32.mrf.mxu1  ;;  %v2411_v46 = vrot.slane %v7508_v17, 2 }
 0x299   : > { %v4651_v9 = vmul.f32 %v5664_v13, %v3246_v28  ;;  %v2987_v59 = vadd.f32 %v2918_v25, %v2594_v5  ;;  %v3752_v40 = vshrl.u32 %v3748_v10, 16  ;;  %v3753_v49 = vshll.u32 %v7554_v60, 16  ;;  %v2923_v30 = vpop.f32.mrf.mxu3  ;;  %v7984_v13 = vld [vmem:[#allocation14_spill] sm:$0xff] }
 0x29a   : > { %v3735_v62 = vadd.s32 %v3734_v57, %v3725_v6  ;;  %vm3755_vm14 = vc.u32 %v3747_v8, %v3751_v19  ;;  %v2988_v51 = vadd.f32 %v2920_v14, %v2595_v52  ;;  %v3757_v33 = vadd.s32 %v3751_v19, %v3747_v8 }
 0x29b   : > { %v5866_v55 = vpack.c.bf16 %v4651_v9, %v4650_v54  ;;  %v7563_v47 = vadd.f32 %v4757_v37, %v4651_v9  ;;  %v4803_v32 = vmul.f32 %v4651_v9, %v4651_v9  ;;  %v3756_v2 = vsel %vm3755_vm14, 1, %v7953_v50 }
 0x29c   : > { %v3736_v56 = vshrl.u32 %v3735_v62, 4  ;;  %v3758_v25 = vadd.s32 %v3756_v2, %v3750_v12  ;;  %v2027_v54 = vsel %vm1992_vm4, %v2024_v38, %v2026_v20  ;;  %v2412_v42 = vsel %vm1992_vm4, %v2409_v44, %v2411_v46  ;;  %v7605_v12 = vpop.f32.mrf.mxu0 }
 0x29d   : > { %5926 = vst [vmem:[%s7235_s20 + $0x30] sm:$0xff] %v5866_v55   ;;  %v7568_v7 = vadd.f32 %v4837_v31, %v4803_v32  ;;  %vm3759_vm15 = vc.u32 %v3757_v33, %v3753_v49  ;;  %2184 = vmatmul.bf16.gmra.mxu1 %v2027_v54  ;;  %2569 = vmatmul.bf16.gmra.mxu2 %v2412_v42  ;;  %v3064_v37 = vrot.slane %v7508_v17, 3  ;;  %v7582_v53 = vadd.s32 128, %v6882_v0 }
 0x29e   : > { %v3737_v35 = vmul.u32 18, %v3736_v56  ;;  %v3247_v28 = vadd.f32 %v3178_v4, %v2987_v59  ;;  %v3754_v24 = vshrl.u32 %v7554_v60, 16  ;;  %v3760_v38 = vsel %vm3759_vm15, 1, %v7953_v50  ;;  %v2530_v18 = vpop.f32.mrf.mxu2  ;;  %v7983_v4 = vld [vmem:[#allocation13_spill] sm:$0xff] }
 0x29f   : > { %v2635_v61 = vunpack.c.l.b16 %v2616_v58  ;;  %v3762_v3 = vadd.s32 %v3760_v38, %v3758_v25  ;;  %v3065_v44 = vsel %vm3030_vm5, %v3062_v23, %v3064_v37  ;;  %v7593_v31 = vadd.s32 136, %v6882_v0 }
 0x2a0   : > { %v3738_v36 = vsub.s32 %v7520_v15, %v3737_v35  ;;  %v7595_v41 = vadd.f32 %v3180_v63, %v2988_v51  ;;  %v2211_v6 = vadd.f32 %v2145_v34, %v7983_v4  ;;  %3222 = vmatmul.bf16.gmra.mxu0 %v3065_v44  ;;  %v3773_v11 = vand.u32 65535, %v7582_v53  ;;  %v2147_v43 = vpop.f32.mrf.mxu1 }
 0x2a1   : > { %v3774_v15 = vshrl.u32 %v7582_v53, 16  ;;  %v3763_v21 = vadd.s32 %v3762_v3, %v3752_v40  ;;  %v7600_v26 = vpack.c.b16 %v2635_v61, %v2635_v61  ;;  %v3802_v8 = vand.u32 65535, %v7593_v31 }
 0x2a2   : > { %vm4364_vm0 = vcmp.ne.s32.totalorder %v3738_v36, 0  ;;  %vm4400_vm1 = vcmp.lt.s32.totalorder %v3738_v36, 0  ;;  %v4472_v45 = vadd.s32 18, %v3738_v36  ;;  %v3776_v23 = vmul.u32 14564, %v3773_v11 }
 0x2a3   : > { %vm4436_vm2 = vmand %vm4400_vm1, %vm4364_vm0  ;;  %v3777_v5 = vmul.u32 58254, %v3773_v11  ;;  %v3778_v48 = vmul.u32 14564, %v3774_v15  ;;  %v3764_v14 = vadd.s32 %v3763_v21, %v3754_v24  ;;  %v2596_v29 = vadd.f32 %v2530_v18, %v2211_v6  ;;  %v2925_v18 = vpop.f32.mrf.mxu3 }
 0x2a4   : > { %v4508_v1 = vsel %vm4436_vm2, %v4472_v45, %v3738_v36  ;;  %v3779_v10 = vmul.u32 58254, %v3774_v15  ;;  %v2212_v57 = vadd.f32 %v2147_v43, %v7984_v13  ;;  %v2800_v40 = vshrl.u32 %v7600_v26, 16 }
 0x2a5   : > { %vm4544_vm6 = vcmp.lt.s32.totalorder %v4508_v1, 16  ;;  %v3780_v60 = vshll.u32 %v3777_v5, 16  ;;  %v3765_v9 = vshrl.u32 %v3764_v14, 4  ;;  %v3781_v19 = vshrl.u32 %v3777_v5, 16  ;;  %v3185_v1 = vpop.f32.mrf.mxu0 }
 0x2a6   : > { %v5665_v52 = vsel %vm4544_vm6, 1.0, %v7969_v16  ;;  %v3782_v34 = vshll.u32 %v3778_v48, 16  ;;  %v2532_v49 = vpop.f32.mrf.mxu2  ;;  %v3783_v32 = vshrl.u32 %v3778_v48, 16  ;;  %v2803_v63 = vshll.u32 %v7600_v26, 16 }
 0x2a7   : > { %v7607_v59 = vmul.f32 %v5665_v52, %v3247_v28  ;;  %vm3784_vm7 = vc.u32 %v3776_v23, %v3780_v60  ;;  %v3786_v62 = vadd.s32 %v3780_v60, %v3776_v23  ;;  %v3766_v55 = vmul.u32 18, %v3765_v9  ;;  %v2267_v28 = vld [vmem:[%s6057_s25 + $0xa0] sm:$0x1]  ;;  %s4962_s25 = sshll.u32 %s8010_s13, 1 }
 0x2a8   : > { %v3785_v56 = vsel %vm3784_vm7, 1, %v7953_v50  ;;  %v7616_v58 = vpop.f32.mrf.mxu1  ;;  %v2802_v42 = vrot.slane %v2800_v40, 2  ;;  %v2805_v35 = vrot.slane %v2803_v63, 3  ;;  %v2597_v61 = vadd.f32 %v2532_v49, %v2212_v57  ;;  %s181_s23 = scalar_lea.vmem %s7901_s3, %s4962_s25 }
 0x2a9   : > { %v4759_v51 = vadd.f32 %v7563_v47, %v7607_v59  ;;  %v4804_v2 = vmul.f32 %v7607_v59, %v7607_v59  ;;  %v3787_v33 = vadd.s32 %v3785_v56, %v3779_v10  ;;  %vm3788_vm8 = vc.u32 %v3786_v62, %v3782_v34 }
 0x2aa   : > { %v3767_v25 = vsub.s32 %v7544_v39, %v3766_v55  ;;  %v3789_v54 = vsel %vm3788_vm8, 1, %v7953_v50  ;;  %v3803_v47 = vshrl.u32 %v7593_v31, 16  ;;  %v2806_v3 = vor.u32 %v2805_v35, %v2802_v42 }
 0x2ab   : > { %v4839_v24 = vadd.f32 %v7568_v7, %v4804_v2  ;;  %v3791_v38 = vadd.s32 %v3789_v54, %v3787_v33  ;;  %v3805_v4 = vmul.u32 14564, %v3802_v8  ;;  %v3806_v39 = vmul.u32 58254, %v3802_v8 }
 0x2ac   : > { %vm4365_vm9 = vcmp.ne.s32.totalorder %v3767_v25, 0  ;;  %vm4401_vm10 = vcmp.lt.s32.totalorder %v3767_v25, 0  ;;  %v4473_v36 = vadd.s32 18, %v3767_v25  ;;  %v2358_v6 = vunpack.c.l.b16 %v2267_v28 }
 0x2ad   : > { %vm4437_vm11 = vmand %vm4401_vm10, %vm4365_vm9  ;;  %v3792_v44 = vadd.s32 %v3791_v38, %v3781_v19  ;;  %v2989_v15 = vadd.f32 %v2923_v30, %v2596_v29  ;;  %v2807_v43 = vsel %vm2637_vm3, %v7541_v22, %v2806_v3  ;;  %v3807_v7 = vmul.u32 14564, %v3803_v47  ;;  %v7985_v29 = vld [vmem:[#allocation12_spill] sm:$0xff] }
 0x2ae   : > { %v4509_v11 = vsel %vm4437_vm11, %v4473_v36, %v3767_v25  ;;  %2967 = vmatmul.bf16.gmra.mxu3 %v2807_v43  ;;  %v2990_v21 = vadd.f32 %v2925_v18, %v2597_v61  ;;  %v3809_v23 = vshll.u32 %v3806_v39, 16  ;;  %v2535_v5 = vpop.f32.mrf.mxu2  ;;  %v3808_v14 = vmul.u32 58254, %v3803_v47  ;;  %v7656_v18 = vpop.f32.mrf.mxu0  ;;  %v7987_v47 = vld [vmem:[#allocation16_spill] sm:$0xff] }
 0x2af   : > { %vm4545_vm12 = vcmp.lt.s32.totalorder %v4509_v11, 16  ;;  %v3793_v45 = vadd.s32 %v3792_v44, %v3783_v32  ;;  %v3810_v10 = vshrl.u32 %v3806_v39, 16  ;;  %v3811_v60 = vshll.u32 %v3807_v7, 16 }
 0x2b0   : > { %v5666_v48 = vsel %vm4545_vm12, 1.0, %v7969_v16  ;;  %vm3813_vm13 = vc.u32 %v3805_v4, %v3809_v23  ;;  %v3815_v30 = vadd.s32 %v3809_v23, %v3805_v4  ;;  %v2028_v57 = vrot.slane %v7985_v29, 2  ;;  %v2152_v19 = vpop.f32.mrf.mxu1 }
 0x2b1   : > { %v4653_v8 = vmul.f32 %v5666_v48, %v7595_v41  ;;  %v3794_v13 = vshrl.u32 %v3793_v45, 4  ;;  %v3814_v22 = vsel %vm3813_vm13, 1, %v7953_v50  ;;  %v2377_v52 = vpack.c.b16 %v2358_v6, %v2358_v6 }
 0x2b2   : > { %v3066_v9 = vrot.slane %v7600_v26, 3  ;;  %v3816_v55 = vadd.s32 %v3814_v22, %v3808_v14  ;;  %vm3817_vm3 = vc.u32 %v3815_v30, %v3811_v60  ;;  %v2029_v41 = vsel %vm1992_vm4, %v2026_v20, %v2028_v57  ;;  %v7637_v26 = vpop.f32.mrf.mxu3 }
 0x2b3   : > { %v5871_v34 = vpack.c.bf16 %v4653_v8, %v7607_v59  ;;  %v4760_v62 = vadd.f32 %v4759_v51, %v4653_v8  ;;  %v4805_v40 = vmul.f32 %v4653_v8, %v4653_v8  ;;  %v3795_v49 = vmul.u32 18, %v3794_v13  ;;  %2189 = vmatmul.bf16.gmra.mxu1 %v2029_v41 }
 0x2b4   : > { %v2413_v32 = vrot.slane %v2377_v52, 2  ;;  %v3818_v2 = vsel %vm3817_vm3, 1, %v7953_v50  ;;  %v3067_v59 = vsel %vm3030_vm5, %v3064_v37, %v3066_v9  ;;  %v3812_v51 = vshrl.u32 %v3807_v7, 16  ;;  %v7986_v37 = vld [vmem:[#allocation15_spill] sm:$0xff] }
 0x2b5   : > { %5927 = vst [vmem:[%s7235_s20 + $0x38] sm:$0xff] %v5871_v34   ;;  %v4840_v56 = vadd.f32 %v4839_v24, %v4805_v40  ;;  %v3796_v63 = vsub.s32 %v7582_v53, %v3795_v49  ;;  %v3820_v33 = vadd.s32 %v3818_v2, %v3816_v55  ;;  %3227 = vmatmul.bf16.gmra.mxu0 %v3067_v59  ;;  %v7646_v20 = vadd.s32 144, %v6882_v0 }
 0x2b6   : > { %v2414_v27 = vsel %vm1992_vm4, %v2411_v46, %v2413_v32  ;;  %v3249_v53 = vadd.f32 %v7605_v12, %v2989_v15  ;;  %v2537_v54 = vpop.f32.mrf.mxu2  ;;  %v2213_v35 = vadd.f32 %v7616_v58, %v7986_v37  ;;  %v3250_v24 = vadd.f32 %v3185_v1, %v2990_v21 }
 0x2b7   : > { %vm4366_vm14 = vcmp.ne.s32.totalorder %v3796_v63, 0  ;;  %vm4402_vm15 = vcmp.lt.s32.totalorder %v3796_v63, 0  ;;  %v4474_v25 = vadd.s32 18, %v3796_v63  ;;  %2574 = vmatmul.bf16.gmra.mxu2 %v2414_v27  ;;  %v3821_v42 = vadd.s32 %v3820_v33, %v3810_v10 }
 0x2b8   : > { %vm4438_vm0 = vmand %vm4402_vm15, %vm4366_vm14  ;;  %v3831_v17 = vand.u32 65535, %v7646_v20  ;;  %v3832_v46 = vshrl.u32 %v7646_v20, 16  ;;  %v7654_v38 = vadd.s32 152, %v6882_v0  ;;  %v2598_v61 = vadd.f32 %v2535_v5, %v2213_v35  ;;  %v2155_v43 = vpop.f32.mrf.mxu1 }
 0x2b9   : > { %v4510_v28 = vsel %vm4438_vm0, %v4474_v25, %v3796_v63  ;;  %v3822_v12 = vadd.s32 %v3821_v42, %v3812_v51  ;;  %v2214_v36 = vadd.f32 %v2152_v19, %v7987_v47  ;;  %v7664_v23 = vadd.s32 160, %v6882_v0  ;;  %v3190_v63 = vpop.f32.mrf.mxu0 }
 0x2ba   : > { %vm4546_vm5 = vcmp.lt.s32.totalorder %v4510_v28, 16  ;;  %v3834_v44 = vmul.u32 14564, %v3831_v17  ;;  %v3835_v58 = vmul.u32 58254, %v3831_v17  ;;  %v3836_v4 = vmul.u32 14564, %v3832_v46  ;;  %v2930_v8 = vpop.f32.mrf.mxu3 }
 0x2bb   : > { %v5667_v3 = vsel %vm4546_vm5, 1.0, %v7969_v16  ;;  %v3823_v6 = vshrl.u32 %v3822_v12, 4  ;;  %v2599_v11 = vadd.f32 %v2537_v54, %v2214_v36  ;;  %v3860_v15 = vand.u32 65535, %v7654_v38 }
 0x2bc   : > { %v7660_v39 = vmul.f32 %v5667_v3, %v3249_v53  ;;  %v3837_v7 = vmul.u32 58254, %v3832_v46  ;;  %v3838_v45 = vshll.u32 %v3835_v58, 16  ;;  %v3840_v21 = vshll.u32 %v3836_v4, 16  ;;  %v7988_v46 = vld [vmem:[#allocation17_spill] sm:$0xff] }
 0x2bd   : > { %v3824_v1 = vmul.u32 18, %v3823_v6  ;;  %v3839_v14 = vshrl.u32 %v3835_v58, 16  ;;  %v3841_v10 = vshrl.u32 %v3836_v4, 16  ;;  %v3861_v13 = vshrl.u32 %v7654_v38, 16 }
 0x2be   : > { %v4761_v5 = vadd.f32 %v4760_v62, %v7660_v39  ;;  %v4806_v48 = vmul.f32 %v7660_v39, %v7660_v39  ;;  %vm3842_vm1 = vc.u32 %v3834_v44, %v3838_v45  ;;  %v3844_v60 = vadd.s32 %v3838_v45, %v3834_v44  ;;  %v2540_v30 = vpop.f32.mrf.mxu2 }
 0x2bf   : > { %v3825_v29 = vsub.s32 %v7593_v31, %v3824_v1  ;;  %v3843_v57 = vsel %vm3842_vm1, 1, %v7953_v50  ;;  %v3864_v52 = vmul.u32 58254, %v3860_v15  ;;  %v3863_v19 = vmul.u32 14564, %v3860_v15 }
 0x2c0   : > { %v4841_v22 = vadd.f32 %v4840_v56, %v4806_v48  ;;  %v3845_v9 = vadd.s32 %v3843_v57, %v3837_v7  ;;  %vm3846_vm2 = vc.u32 %v3844_v60, %v3840_v21  ;;  %v3865_v34 = vmul.u32 14564, %v3861_v13  ;;  %v2157_v42 = vpop.f32.mrf.mxu1 }
 0x2c1   : > { %vm4367_vm6 = vcmp.ne.s32.totalorder %v3825_v29, 0  ;;  %vm4403_vm7 = vcmp.lt.s32.totalorder %v3825_v29, 0  ;;  %v4475_v62 = vadd.s32 18, %v3825_v29  ;;  %v3847_v40 = vsel %vm3846_vm2, 1, %v7953_v50 }
 0x2c2   : > { %vm4439_vm8 = vmand %vm4403_vm7, %vm4367_vm6  ;;  %v3849_v49 = vadd.s32 %v3847_v40, %v3845_v9  ;;  %v3866_v55 = vmul.u32 58254, %v3861_v13  ;;  %v3867_v41 = vshll.u32 %v3864_v52, 16  ;;  %v3869_v32 = vshll.u32 %v3865_v34, 16  ;;  %v2933_v58 = vpop.f32.mrf.mxu3  ;;  %v3193_v13 = vpop.f32.mrf.mxu0 }
 0x2c3   : > { %v4511_v56 = vsel %vm4439_vm8, %v4475_v62, %v3825_v29  ;;  %v2991_v31 = vadd.f32 %v7637_v26, %v2598_v61  ;;  %v2992_v2 = vadd.f32 %v2930_v8, %v2599_v11  ;;  %v3889_v59 = vand.u32 65535, %v7664_v23 }
 0x2c4   : > { %vm4547_vm9 = vcmp.lt.s32.totalorder %v4511_v56, 16  ;;  %v3850_v51 = vadd.s32 %v3849_v49, %v3839_v14  ;;  %vm3871_vm10 = vc.u32 %v3863_v19, %v3867_v41  ;;  %v3873_v33 = vadd.s32 %v3867_v41, %v3863_v19  ;;  %v7989_v41 = vld [vmem:[#allocation18_spill] sm:$0xff] }
 0x2c5   : > { %v5668_v27 = vsel %vm4547_vm9, 1.0, %v7969_v16  ;;  %v3868_v53 = vshrl.u32 %v3864_v52, 16  ;;  %v3872_v25 = vsel %vm3871_vm10, 1, %v7953_v50  ;;  %v3890_v54 = vshrl.u32 %v7664_v23, 16 }
 0x2c6   : > { %v4655_v37 = vmul.f32 %v5668_v27, %v3250_v24  ;;  %v3851_v35 = vadd.s32 %v3850_v51, %v3841_v10  ;;  %v3874_v17 = vadd.s32 %v3872_v25, %v3866_v55  ;;  %vm3875_vm11 = vc.u32 %v3873_v33, %v3869_v32  ;;  %v2542_v4 = vpop.f32.mrf.mxu2 }
 0x2c7   : > { %v3876_v26 = vsel %vm3875_vm11, 1, %v7953_v50  ;;  %v2215_v28 = vadd.f32 %v2155_v43, %v7988_v46  ;;  %v3892_v12 = vmul.u32 14564, %v3889_v59  ;;  %v3893_v61 = vmul.u32 58254, %v3889_v59 }
 0x2c8   : > { %v5876_v47 = vpack.c.bf16 %v4655_v37, %v7660_v39  ;;  %v4762_v36 = vadd.f32 %v4761_v5, %v4655_v37  ;;  %v4807_v3 = vmul.f32 %v4655_v37, %v4655_v37  ;;  %v3852_v44 = vshrl.u32 %v3851_v35, 4  ;;  %v2160_v9 = vpop.f32.mrf.mxu1 }
 0x2c9   : > { %v3870_v6 = vshrl.u32 %v3865_v34, 16  ;;  %v3878_v11 = vadd.s32 %v3876_v26, %v3874_v17  ;;  %v2600_v24 = vadd.f32 %v2540_v30, %v2215_v28  ;;  %v3894_v15 = vmul.u32 14564, %v3890_v54 }
 0x2ca   : > { %5928 = vst [vmem:[%s7235_s20 + $0x40] sm:$0xff] %v5876_v47   ;;  %v4842_v7 = vadd.f32 %v4841_v22, %v4807_v3  ;;  %v3853_v45 = vmul.u32 18, %v3852_v44  ;;  %v3895_v21 = vmul.u32 58254, %v3890_v54  ;;  %v3896_v48 = vshll.u32 %v3893_v61, 16  ;;  %v3195_v47 = vpop.f32.mrf.mxu0 }
 0x2cb   : > { %v3251_v43 = vadd.f32 %v7656_v18, %v2991_v31  ;;  %v3879_v1 = vadd.s32 %v3878_v11, %v3868_v53  ;;  %v3898_v14 = vshll.u32 %v3894_v15, 16  ;;  %v7685_v10 = vadd.s32 168, %v6882_v0  ;;  %v2935_v31 = vpop.f32.mrf.mxu3 }
 0x2cc   : > { %v3854_v39 = vsub.s32 %v7646_v20, %v3853_v45  ;;  %vm3900_vm12 = vc.u32 %v3892_v12, %v3896_v48  ;;  %v3902_v5 = vadd.s32 %v3896_v48, %v3892_v12  ;;  %v7687_v60 = vadd.f32 %v3190_v63, %v2992_v2 }
 0x2cd   : > { %v3880_v8 = vadd.s32 %v3879_v1, %v3870_v6  ;;  %v2993_v30 = vadd.f32 %v2933_v58, %v2600_v24  ;;  %v3901_v22 = vsel %vm3900_vm12, 1, %v7953_v50  ;;  %v3897_v52 = vshrl.u32 %v3893_v61, 16  ;;  %v7990_v1 = vld [vmem:[#allocation19_spill] sm:$0xff] }
 0x2ce   : > { %vm4368_vm13 = vcmp.ne.s32.totalorder %v3854_v39, 0  ;;  %vm4404_vm3 = vcmp.lt.s32.totalorder %v3854_v39, 0  ;;  %v4476_v29 = vadd.s32 18, %v3854_v39  ;;  %v3903_v18 = vadd.s32 %v3901_v22, %v3895_v21  ;;  %v2545_v51 = vpop.f32.mrf.mxu2 }
 0x2cf   : > { %vm4440_vm14 = vmand %vm4404_vm3, %vm4368_vm13  ;;  %v3881_v57 = vshrl.u32 %v3880_v8, 4  ;;  %vm3904_vm15 = vc.u32 %v3902_v5, %v3898_v14  ;;  %v3918_v20 = vand.u32 65535, %v7685_v10  ;;  %v3899_v34 = vshrl.u32 %v3894_v15, 16 }
 0x2d0   : > { %v4512_v19 = vsel %vm4440_vm14, %v4476_v29, %v3854_v39  ;;  %v3905_v62 = vsel %vm3904_vm15, 1, %v7953_v50  ;;  %v3919_v40 = vshrl.u32 %v7685_v10, 16  ;;  %v2216_v32 = vadd.f32 %v2157_v42, %v7989_v41  ;;  %v2162_v15 = vpop.f32.mrf.mxu1 }
 0x2d1   : > { %vm4548_vm0 = vcmp.lt.s32.totalorder %v4512_v19, 16  ;;  %v3882_v49 = vmul.u32 18, %v3881_v57  ;;  %v3907_v55 = vadd.s32 %v3905_v62, %v3903_v18  ;;  %v3921_v63 = vmul.u32 14564, %v3918_v20 }
 0x2d2   : > { %v5669_v56 = vsel %vm4548_vm0, 1.0, %v7969_v16  ;;  %v3922_v2 = vmul.u32 58254, %v3918_v20  ;;  %v3923_v59 = vmul.u32 14564, %v3919_v40  ;;  %v7696_v53 = vadd.f32 %v3193_v13, %v2993_v30 }
 0x2d3   : > { %v4656_v33 = vmul.f32 %v5669_v56, %v3251_v43  ;;  %v3883_v27 = vsub.s32 %v7654_v38, %v3882_v49  ;;  %v3908_v25 = vadd.s32 %v3907_v55, %v3897_v52  ;;  %v2601_v54 = vadd.f32 %v2542_v4, %v2216_v32  ;;  %v2938_v30 = vpop.f32.mrf.mxu3  ;;  %v7710_v32 = vpop.f32.mrf.mxu0 }
 0x2d4   : > { %v3924_v37 = vmul.u32 58254, %v3919_v40  ;;  %v3925_v35 = vshll.u32 %v3922_v2, 16  ;;  %v3927_v17 = vshll.u32 %v3923_v59, 16  ;;  %v3926_v3 = vshrl.u32 %v3922_v2, 16 }
 0x2d5   : > { %v4763_v26 = vadd.f32 %v4762_v36, %v4656_v33  ;;  %v4808_v46 = vmul.f32 %v4656_v33, %v4656_v33  ;;  %vm4369_vm5 = vcmp.ne.s32.totalorder %v3883_v27, 0  ;;  %vm4405_vm1 = vcmp.lt.s32.totalorder %v3883_v27, 0 }
 0x2d6   : > { %vm4441_vm2 = vmand %vm4405_vm1, %vm4369_vm5  ;;  %v4477_v42 = vadd.s32 18, %v3883_v27  ;;  %v3909_v28 = vadd.s32 %v3908_v25, %v3899_v34  ;;  %vm3929_vm6 = vc.u32 %v3921_v63, %v3925_v35  ;;  %v3931_v12 = vadd.s32 %v3925_v35, %v3921_v63  ;;  %v2547_v18 = vpop.f32.mrf.mxu2 }
 0x2d7   : > { %v4843_v61 = vadd.f32 %v4842_v7, %v4808_v46  ;;  %v3930_v38 = vsel %vm3929_vm6, 1, %v7953_v50  ;;  %v7700_v44 = vadd.s32 176, %v6882_v0  ;;  %v3928_v36 = vshrl.u32 %v3923_v59, 16 }
 0x2d8   : > { %v4513_v58 = vsel %vm4441_vm2, %v4477_v42, %v3883_v27  ;;  %v3910_v4 = vshrl.u32 %v3909_v28, 4  ;;  %v3932_v6 = vadd.s32 %v3930_v38, %v3924_v37  ;;  %vm3933_vm7 = vc.u32 %v3931_v12, %v3927_v17  ;;  %v2165_v37 = vpop.f32.mrf.mxu1 }
 0x2d9   : > { %vm4549_vm8 = vcmp.lt.s32.totalorder %v4513_v58, 16  ;;  %v3934_v11 = vsel %vm3933_vm7, 1, %v7953_v50  ;;  %v3947_v24 = vand.u32 65535, %v7700_v44  ;;  %v3948_v48 = vshrl.u32 %v7700_v44, 16 }
 0x2da   : > { %v5670_v7 = vsel %vm4549_vm8, 1.0, %v7969_v16  ;;  %v3911_v45 = vmul.u32 18, %v3910_v4  ;;  %v3936_v21 = vadd.s32 %v3934_v11, %v3932_v6  ;;  %v2217_v14 = vadd.f32 %v2160_v9, %v7990_v1 }
 0x2db   : > { %v4657_v43 = vmul.f32 %v5670_v7, %v7687_v60  ;;  %v3950_v39 = vmul.u32 14564, %v3947_v24  ;;  %v3951_v5 = vmul.u32 58254, %v3947_v24  ;;  %v3952_v22 = vmul.u32 14564, %v3948_v48  ;;  %v2940_v38 = vpop.f32.mrf.mxu3  ;;  %v7992_v7 = vld [vmem:[#allocation21_spill] sm:$0xff] }
 0x2dc   : > { %v3912_v8 = vsub.s32 %v7664_v23, %v3911_v45  ;;  %v3937_v13 = vadd.s32 %v3936_v21, %v3926_v3  ;;  %v3953_v29 = vmul.u32 58254, %v3948_v48  ;;  %v2994_v62 = vadd.f32 %v2935_v31, %v2601_v54 }
 0x2dd   : > { %v5881_v57 = vpack.c.bf16 %v4657_v43, %v4656_v33  ;;  %v4764_v52 = vadd.f32 %v4763_v26, %v4657_v43  ;;  %v4809_v20 = vmul.f32 %v4657_v43, %v4657_v43  ;;  %v3954_v19 = vshll.u32 %v3951_v5, 16 }
 0x2de   : > { %vm4370_vm9 = vcmp.ne.s32.totalorder %v3912_v8, 0  ;;  %vm4406_vm10 = vcmp.lt.s32.totalorder %v3912_v8, 0  ;;  %v4478_v34 = vadd.s32 18, %v3912_v8  ;;  %v3938_v60 = vadd.s32 %v3937_v13, %v3928_v36  ;;  %v2550_v58 = vpop.f32.mrf.mxu2  ;;  %v3200_v13 = vpop.f32.mrf.mxu0 }
 0x2df   : > { %5929 = vst [vmem:[%s7235_s20 + $0x48] sm:$0xff] %v5881_v57   ;;  %v4844_v9 = vadd.f32 %v4843_v61, %v4809_v20  ;;  %vm4442_vm11 = vmand %vm4406_vm10, %vm4370_vm9  ;;  %v2602_v40 = vadd.f32 %v2545_v51, %v2217_v14  ;;  %v3956_v49 = vshll.u32 %v3952_v22, 16  ;;  %vm3958_vm12 = vc.u32 %v3950_v39, %v3954_v19  ;;  %v7991_v61 = vld [vmem:[#allocation20_spill] sm:$0xff] }
 0x2e0   : > { %v4514_v23 = vsel %vm4442_vm11, %v4478_v34, %v3912_v8  ;;  %v3939_v55 = vshrl.u32 %v3938_v60, 4  ;;  %v3960_v41 = vadd.s32 %v3954_v19, %v3950_v39  ;;  %v3955_v56 = vshrl.u32 %v3951_v5, 16 }
 0x2e1   : > { %vm4550_vm13 = vcmp.lt.s32.totalorder %v4514_v23, 16  ;;  %v3959_v63 = vsel %vm3958_vm12, 1, %v7953_v50  ;;  %v7714_v2 = vadd.s32 184, %v6882_v0  ;;  %v3254_v51 = vadd.f32 %v3195_v47, %v2994_v62 }
 0x2e2   : > { %v5671_v59 = vsel %vm4550_vm13, 1.0, %v7969_v16  ;;  %v3940_v33 = vmul.u32 18, %v3939_v55  ;;  %v3961_v27 = vadd.s32 %v3959_v63, %v3953_v29  ;;  %vm3962_vm3 = vc.u32 %v3960_v41, %v3956_v49 }
 0x2e3   : > { %v4658_v31 = vmul.f32 %v5671_v59, %v7696_v53  ;;  %v3963_v25 = vsel %vm3962_vm3, 1, %v7953_v50  ;;  %v3976_v54 = vand.u32 65535, %v7714_v2  ;;  %v3957_v17 = vshrl.u32 %v3952_v22, 16 }
 0x2e4   : > { %v3941_v35 = vsub.s32 %v7685_v10, %v3940_v33  ;;  %v3965_v26 = vadd.s32 %v3963_v25, %v3961_v27  ;;  %v3977_v46 = vshrl.u32 %v7714_v2, 16  ;;  %v2995_v12 = vadd.f32 %v2938_v30, %v2602_v40  ;;  %v2943_v33 = vpop.f32.mrf.mxu3 }
 0x2e5   : > { %v4765_v42 = vadd.f32 %v4764_v52, %v4658_v31  ;;  %v4810_v28 = vmul.f32 %v4658_v31, %v4658_v31  ;;  %v2218_v3 = vadd.f32 %v2162_v15, %v7991_v61  ;;  %v3979_v6 = vmul.u32 14564, %v3976_v54 }
 0x2e6   : > { %vm4371_vm14 = vcmp.ne.s32.totalorder %v3941_v35, 0  ;;  %vm4407_vm15 = vcmp.lt.s32.totalorder %v3941_v35, 0  ;;  %v4479_v53 = vadd.s32 18, %v3941_v35  ;;  %v3966_v47 = vadd.s32 %v3965_v26, %v3955_v56  ;;  %v2552_v27 = vpop.f32.mrf.mxu2 }
 0x2e7   : > { %v4845_v4 = vadd.f32 %v4844_v9, %v4810_v28  ;;  %vm4443_vm0 = vmand %vm4407_vm15, %vm4371_vm14  ;;  %v3980_v36 = vmul.u32 58254, %v3976_v54  ;;  %v3981_v10 = vmul.u32 14564, %v3977_v46  ;;  %v2219_v45 = vadd.f32 %v2165_v37, %v7992_v7  ;;  %v2167_v9 = vpop.f32.mrf.mxu1 }
 0x2e8   : > { %v4515_v11 = vsel %vm4443_vm0, %v4479_v53, %v3941_v35  ;;  %v3967_v24 = vadd.s32 %v3966_v47, %v3957_v17  ;;  %v7725_v21 = vadd.s32 192, %v6882_v0  ;;  %v2603_v15 = vadd.f32 %v2547_v18, %v2218_v3  ;;  %v3203_v3 = vpop.f32.mrf.mxu0 }
 0x2e9   : > { %vm4551_vm5 = vcmp.lt.s32.totalorder %v4515_v11, 16  ;;  %v3982_v48 = vmul.u32 58254, %v3977_v46  ;;  %v3983_v43 = vshll.u32 %v3980_v36, 16  ;;  %v3985_v39 = vshll.u32 %v3981_v10, 16 }
 0x2ea   : > { %v5672_v1 = vsel %vm4551_vm5, 1.0, %v7969_v16  ;;  %v3968_v14 = vshrl.u32 %v3967_v24, 4  ;;  %v2604_v5 = vadd.f32 %v2550_v58, %v2219_v45  ;;  %v4005_v22 = vand.u32 65535, %v7725_v21 }
 0x2eb   : > { %v4659_v8 = vmul.f32 %v5672_v1, %v3254_v51  ;;  %vm3987_vm1 = vc.u32 %v3979_v6, %v3983_v43  ;;  %v3989_v30 = vadd.s32 %v3983_v43, %v3979_v6  ;;  %v3984_v57 = vshrl.u32 %v3980_v36, 16 }
 0x2ec   : > { %v3969_v29 = vmul.u32 18, %v3968_v14  ;;  %v3988_v52 = vsel %vm3987_vm1, 1, %v7953_v50  ;;  %v4006_v18 = vshrl.u32 %v7725_v21, 16  ;;  %v3986_v40 = vshrl.u32 %v3981_v10, 16 }
 0x2ed   : > { %v5886_v20 = vpack.c.bf16 %v4659_v8, %v4658_v31  ;;  %v4766_v19 = vadd.f32 %v4765_v42, %v4659_v8  ;;  %v4811_v34 = vmul.f32 %v4659_v8, %v4659_v8  ;;  %v3990_v60 = vadd.s32 %v3988_v52, %v3982_v48 }
 0x2ee   : > { %v3970_v62 = vsub.s32 %v7700_v44, %v3969_v29  ;;  %vm3991_vm2 = vc.u32 %v3989_v30, %v3985_v39  ;;  %v4009_v49 = vmul.u32 58254, %v4005_v22  ;;  %v4008_v41 = vmul.u32 14564, %v4005_v22  ;;  %v2945_v30 = vpop.f32.mrf.mxu3 }
 0x2ef   : > { %5930 = vst [vmem:[%s7235_s20 + $0x50] sm:$0xff] %v5886_v20   ;;  %v4846_v23 = vadd.f32 %v4845_v4, %v4811_v34  ;;  %v3992_v55 = vsel %vm3991_vm2, 1, %v7953_v50  ;;  %v4010_v56 = vmul.u32 14564, %v4006_v18  ;;  %v3255_v31 = vadd.f32 %v7710_v32, %v2995_v12  ;;  %v2170_v7 = vpop.f32.mrf.mxu1 }
 0x2f0   : > { %vm4372_vm6 = vcmp.ne.s32.totalorder %v3970_v62, 0  ;;  %vm4408_vm7 = vcmp.lt.s32.totalorder %v3970_v62, 0  ;;  %v4480_v63 = vadd.s32 18, %v3970_v62  ;;  %v3994_v59 = vadd.s32 %v3992_v55, %v3990_v60 }
 0x2f1   : > { %vm4444_vm8 = vmand %vm4408_vm7, %vm4372_vm6  ;;  %v4011_v51 = vmul.u32 58254, %v4006_v18  ;;  %v4012_v44 = vshll.u32 %v4009_v49, 16  ;;  %v4014_v25 = vshll.u32 %v4010_v56, 16  ;;  %v2996_v37 = vadd.f32 %v2940_v38, %v2603_v15  ;;  %v2555_v18 = vpop.f32.mrf.mxu2 }
 0x2f2   : > { %v4516_v54 = vsel %vm4444_vm8, %v4480_v63, %v3970_v62  ;;  %v3995_v35 = vadd.s32 %v3994_v59, %v3984_v57  ;;  %v7736_v17 = vadd.s32 200, %v6882_v0  ;;  %v2997_v26 = vadd.f32 %v2943_v33, %v2604_v5  ;;  %v7993_v5 = vld [vmem:[#allocation22_spill] sm:$0xff]  ;;  %v7994_v57 = vld [vmem:[#allocation23_spill] sm:$0xff]  ;;  %v3205_v59 = vpop.f32.mrf.mxu0 }
 0x2f3   : > { %vm4552_vm9 = vcmp.lt.s32.totalorder %v4516_v54, 16  ;;  %vm4016_vm10 = vc.u32 %v4008_v41, %v4012_v44  ;;  %v4018_v46 = vadd.s32 %v4012_v44, %v4008_v41  ;;  %v4013_v61 = vshrl.u32 %v4009_v49, 16 }
 0x2f4   : > { %v5673_v42 = vsel %vm4552_vm9, 1.0, %v7969_v16  ;;  %v3996_v28 = vadd.s32 %v3995_v35, %v3986_v40  ;;  %v4017_v32 = vsel %vm4016_vm10, 1, %v7953_v50  ;;  %v4034_v47 = vand.u32 65535, %v7736_v17 }
 0x2f5   : > { %v7740_v12 = vmul.f32 %v5673_v42, %v3255_v31  ;;  %v4019_v53 = vadd.s32 %v4017_v32, %v4011_v51  ;;  %vm4020_vm11 = vc.u32 %v4018_v46, %v4014_v25  ;;  %v3256_v38 = vadd.f32 %v3200_v13, %v2996_v37 }
 0x2f6   : > { %v3997_v58 = vshrl.u32 %v3996_v28, 4  ;;  %v4021_v4 = vsel %vm4020_vm11, 1, %v7953_v50  ;;  %v4035_v6 = vshrl.u32 %v7736_v17, 16  ;;  %v4015_v11 = vshrl.u32 %v4010_v56, 16 }
 0x2f7   : > { %v4767_v36 = vadd.f32 %v4766_v19, %v7740_v12  ;;  %v4812_v10 = vmul.f32 %v7740_v12, %v7740_v12  ;;  %v4023_v24 = vadd.s32 %v4021_v4, %v4019_v53  ;;  %v4037_v15 = vmul.u32 14564, %v4034_v47 }
 0x2f8   : > { %v3998_v45 = vmul.u32 18, %v3997_v58  ;;  %v4038_v48 = vmul.u32 58254, %v4034_v47  ;;  %v4039_v43 = vmul.u32 14564, %v4035_v6  ;;  %v7748_v14 = vadd.f32 %v3203_v3, %v2997_v26  ;;  %v2948_v58 = vpop.f32.mrf.mxu3 }
 0x2f9   : > { %v4847_v1 = vadd.f32 %v4846_v23, %v4812_v10  ;;  %v4024_v39 = vadd.s32 %v4023_v24, %v4013_v61  ;;  %v2220_v8 = vadd.f32 %v2167_v9, %v7993_v5  ;;  %v4040_v22 = vmul.u32 58254, %v4035_v6 }
 0x2fa   : > { %v3999_v13 = vsub.s32 %v7714_v2, %v3998_v45  ;;  %v4041_v29 = vshll.u32 %v4038_v48, 16  ;;  %v2221_v52 = vadd.f32 %v2170_v7, %v7994_v57  ;;  %v4043_v34 = vshll.u32 %v4039_v43, 16  ;;  %v3208_v5 = vpop.f32.mrf.mxu0 }
 0x2fb   : > { %v4025_v20 = vadd.s32 %v4024_v39, %v4015_v11  ;;  %v2605_v19 = vadd.f32 %v2552_v27, %v2220_v8  ;;  %v7754_v60 = vadd.s32 208, %v6882_v0  ;;  %v4042_v33 = vshrl.u32 %v4038_v48, 16 }
 0x2fc   : > { %vm4373_vm12 = vcmp.ne.s32.totalorder %v3999_v13, 0  ;;  %vm4409_vm13 = vcmp.lt.s32.totalorder %v3999_v13, 0  ;;  %v4481_v62 = vadd.s32 18, %v3999_v13  ;;  %vm4045_vm3 = vc.u32 %v4037_v15, %v4041_v29 }
 0x2fd   : > { %vm4445_vm14 = vmand %vm4409_vm13, %vm4373_vm12  ;;  %v4026_v9 = vshrl.u32 %v4025_v20, 4  ;;  %v4046_v2 = vsel %vm4045_vm3, 1, %v7953_v50  ;;  %v4047_v40 = vadd.s32 %v4041_v29, %v4037_v15  ;;  %v2606_v49 = vadd.f32 %v2555_v18, %v2221_v52  ;;  %v2557_v52 = vpop.f32.mrf.mxu2 }
 0x2fe   : > { %v4517_v23 = vsel %vm4445_vm14, %v4481_v62, %v3999_v13  ;;  %v4048_v55 = vadd.s32 %v4046_v2, %v4040_v22  ;;  %v4063_v41 = vand.u32 65535, %v7754_v60  ;;  %v4064_v56 = vshrl.u32 %v7754_v60, 16 }
 0x2ff   : > { %vm4553_vm15 = vcmp.lt.s32.totalorder %v4517_v23, 16  ;;  %v4027_v63 = vmul.u32 18, %v4026_v9  ;;  %vm4049_vm0 = vc.u32 %v4047_v40, %v4043_v34  ;;  %v2998_v26 = vadd.f32 %v2945_v30, %v2605_v19  ;;  %v7995_v23 = vld [vmem:[#allocation8_spill] sm:$0xff] }
 0x300   : > { %v5674_v27 = vsel %vm4553_vm15, 1.0, %v7969_v16  ;;  %v4050_v31 = vsel %vm4049_vm0, 1, %v7953_v50  ;;  %v4066_v51 = vmul.u32 14564, %v4063_v41  ;;  %v4067_v44 = vmul.u32 58254, %v4063_v41 }
 0x301   : > { %v4661_v25 = vmul.f32 %v5674_v27, %v3256_v38  ;;  %v4028_v54 = vsub.s32 %v7725_v21, %v4027_v63  ;;  %v4052_v37 = vadd.s32 %v4050_v31, %v4048_v55  ;;  %v4068_v35 = vmul.u32 14564, %v4064_v56 }
 0x302   : > { %v4044_v46 = vshrl.u32 %v4039_v43, 16  ;;  %v4069_v42 = vmul.u32 58254, %v4064_v56  ;;  %v4070_v28 = vshll.u32 %v4067_v44, 16  ;;  %v2999_v21 = vadd.f32 %v2948_v58, %v2606_v49 }
 0x303   : > { %v5891_v61 = vpack.c.bf16 %v4661_v25, %v7740_v12  ;;  %v4768_v32 = vadd.f32 %v4767_v36, %v4661_v25  ;;  %v4813_v3 = vmul.f32 %v4661_v25, %v4661_v25  ;;  %vm4374_vm5 = vcmp.ne.s32.totalorder %v4028_v54, 0  ;;  %v2172_v12 = vpop.f32.mrf.mxu1 }
 0x304   : > { %vm4410_vm1 = vcmp.lt.s32.totalorder %v4028_v54, 0  ;;  %v4482_v53 = vadd.s32 18, %v4028_v54  ;;  %v4053_v47 = vadd.s32 %v4052_v37, %v4042_v33  ;;  %v4072_v4 = vshll.u32 %v4068_v35, 16 }
 0x305   : > { %5931 = vst [vmem:[%s7235_s20 + $0x58] sm:$0xff] %v5891_v61   ;;  %v4848_v38 = vadd.f32 %v4847_v1, %v4813_v3  ;;  %vm4446_vm2 = vmand %vm4410_vm1, %vm4374_vm5  ;;  %vm4074_vm6 = vc.u32 %v4066_v51, %v4070_v28  ;;  %v4076_v6 = vadd.s32 %v4070_v28, %v4066_v51  ;;  %v4071_v24 = vshrl.u32 %v4067_v44, 16  ;;  %v2560_v58 = vpop.f32.mrf.mxu2 }
 0x306   : > { %v4518_v10 = vsel %vm4446_vm2, %v4482_v53, %v4028_v54  ;;  %v4054_v11 = vadd.s32 %v4053_v47, %v4044_v46  ;;  %v4075_v7 = vsel %vm4074_vm6, 1, %v7953_v50  ;;  %v7766_v45 = vadd.s32 216, %v6882_v0  ;;  %v2950_v53 = vpop.f32.mrf.mxu3 }
 0x307   : > { %vm4554_vm7 = vcmp.lt.s32.totalorder %v4518_v10, 16  ;;  %v4077_v36 = vadd.s32 %v4075_v7, %v4069_v42  ;;  %vm4078_vm8 = vc.u32 %v4076_v6, %v4072_v4  ;;  %v4073_v43 = vshrl.u32 %v4068_v35, 16 }
 0x308   : > { %v5675_v15 = vsel %vm4554_vm7, 1.0, %v7969_v16  ;;  %v4055_v48 = vshrl.u32 %v4054_v11, 4  ;;  %v4079_v1 = vsel %vm4078_vm8, 1, %v7953_v50  ;;  %v4092_v13 = vand.u32 65535, %v7766_v45 }
 0x309   : > { %v4662_v39 = vmul.f32 %v5675_v15, %v7748_v14  ;;  %v4081_v8 = vadd.s32 %v4079_v1, %v4077_v36  ;;  %v4093_v30 = vshrl.u32 %v7766_v45, 16  ;;  %v3258_v22 = vadd.f32 %v3205_v59, %v2998_v26  ;;  %v7996_v15 = vld [vmem:[#allocation9_spill] sm:$0xff] }
 0x30a   : > { %v4056_v29 = vmul.u32 18, %v4055_v48  ;;  %v7773_v57 = vadd.f32 %v3208_v5, %v2999_v21  ;;  %v7776_v34 = vadd.s32 224, %v6882_v0  ;;  %v4095_v14 = vmul.u32 14564, %v4092_v13 }
 0x30b   : > { %v4769_v18 = vadd.f32 %v4768_v32, %v4662_v39  ;;  %v4814_v20 = vmul.f32 %v4662_v39, %v4662_v39  ;;  %v4082_v19 = vadd.s32 %v4081_v8, %v4071_v24  ;;  %v4096_v9 = vmul.u32 58254, %v4092_v13  ;;  %v2175_v25 = vpop.f32.mrf.mxu1 }
 0x30c   : > { %v4057_v62 = vsub.s32 %v7736_v17, %v4056_v29  ;;  %v4097_v2 = vmul.u32 14564, %v4093_v30  ;;  %v2222_v55 = vadd.f32 %v2172_v12, %v7995_v23  ;;  %v4098_v41 = vmul.u32 58254, %v4093_v30 }
 0x30d   : > { %v4849_v40 = vadd.f32 %v4848_v38, %v4814_v20  ;;  %v4083_v49 = vadd.s32 %v4082_v19, %v4073_v43  ;;  %v4099_v63 = vshll.u32 %v4096_v9, 16  ;;  %v4121_v31 = vand.u32 65535, %v7776_v34  ;;  %v3210_v19 = vpop.f32.mrf.mxu0 }
 0x30e   : > { %vm4375_vm9 = vcmp.ne.s32.totalorder %v4057_v62, 0  ;;  %vm4411_vm10 = vcmp.lt.s32.totalorder %v4057_v62, 0  ;;  %v4483_v56 = vadd.s32 18, %v4057_v62  ;;  %v2607_v33 = vadd.f32 %v2557_v52, %v2222_v55 }
 0x30f   : > { %vm4447_vm11 = vmand %vm4411_vm10, %vm4375_vm9  ;;  %v4084_v59 = vshrl.u32 %v4083_v49, 4  ;;  %v4101_v27 = vshll.u32 %v4097_v2, 16  ;;  %v4100_v17 = vshrl.u32 %v4096_v9, 16  ;;  %vm4103_vm12 = vc.u32 %v4095_v14, %v4099_v63 }
 0x310   : > { %v4519_v51 = vsel %vm4447_vm11, %v4483_v56, %v4057_v62  ;;  %v4105_v44 = vadd.s32 %v4099_v63, %v4095_v14  ;;  %v4104_v37 = vsel %vm4103_vm12, 1, %v7953_v50  ;;  %v4122_v35 = vshrl.u32 %v7776_v34, 16  ;;  %v7997_v63 = vld [vmem:[#allocation24_spill] sm:$0xff] }
 0x311   : > { %vm4555_vm13 = vcmp.lt.s32.totalorder %v4519_v51, 16  ;;  %v4085_v54 = vmul.u32 18, %v4084_v59  ;;  %v4102_v46 = vshrl.u32 %v4097_v2, 16  ;;  %v4106_v42 = vadd.s32 %v4104_v37, %v4098_v41 }
 0x312   : > { %v5676_v26 = vsel %vm4555_vm13, 1.0, %v7969_v16  ;;  %vm4107_vm3 = vc.u32 %v4105_v44, %v4101_v27  ;;  %v4124_v3 = vmul.u32 14564, %v4121_v31  ;;  %v4125_v4 = vmul.u32 58254, %v4121_v31  ;;  %v2953_v27 = vpop.f32.mrf.mxu3  ;;  %v2562_v31 = vpop.f32.mrf.mxu2 }
 0x313   : > { %v4663_v28 = vmul.f32 %v5676_v26, %v3258_v22  ;;  %v4086_v61 = vsub.s32 %v7754_v60, %v4085_v54  ;;  %v4108_v32 = vsel %vm4107_vm3, 1, %v7953_v50  ;;  %v4126_v38 = vmul.u32 14564, %v4122_v35 }
 0x314   : > { %v4110_v47 = vadd.s32 %v4108_v32, %v4106_v42  ;;  %v4127_v21 = vmul.u32 58254, %v4122_v35  ;;  %v4128_v12 = vshll.u32 %v4125_v4, 16  ;;  %v3000_v36 = vadd.f32 %v2950_v53, %v2607_v33 }
 0x315   : > { %v5896_v6 = vpack.c.bf16 %v4663_v28, %v4662_v39  ;;  %v4770_v10 = vadd.f32 %v4769_v18, %v4663_v28  ;;  %v4815_v11 = vmul.f32 %v4663_v28, %v4663_v28  ;;  %vm4376_vm14 = vcmp.ne.s32.totalorder %v4086_v61, 0  ;;  %v2177_v18 = vpop.f32.mrf.mxu1 }
 0x316   : > { %vm4412_vm15 = vcmp.lt.s32.totalorder %v4086_v61, 0  ;;  %v4484_v24 = vadd.s32 18, %v4086_v61  ;;  %v4111_v7 = vadd.s32 %v4110_v47, %v4100_v17  ;;  %v2223_v48 = vadd.f32 %v2175_v25, %v7996_v15 }
 0x317   : > { %5932 = vst [vmem:[%s7235_s20 + $0x60] sm:$0xff] %v5896_v6   ;;  %v4850_v60 = vadd.f32 %v4849_v40, %v4815_v11  ;;  %vm4448_vm0 = vmand %vm4412_vm15, %vm4376_vm14  ;;  %v4130_v43 = vshll.u32 %v4126_v38, 16  ;;  %vm4132_vm5 = vc.u32 %v4124_v3, %v4128_v12  ;;  %v4134_v8 = vadd.s32 %v4128_v12, %v4124_v3  ;;  %v3213_v11 = vpop.f32.mrf.mxu0 }
 0x318   : > { %v4520_v1 = vsel %vm4448_vm0, %v4484_v24, %v4086_v61  ;;  %v4112_v5 = vadd.s32 %v4111_v7, %v4102_v46  ;;  %v4129_v39 = vshrl.u32 %v4125_v4, 16  ;;  %v4133_v13 = vsel %vm4132_vm5, 1, %v7953_v50 }
 0x319   : > { %vm4556_vm1 = vcmp.lt.s32.totalorder %v4520_v1, 16  ;;  %v7790_v30 = vadd.s32 232, %v6882_v0  ;;  %v4135_v52 = vadd.s32 %v4133_v13, %v4127_v21  ;;  %vm4136_vm2 = vc.u32 %v4134_v8, %v4130_v43 }
 0x31a   : > { %v5677_v22 = vsel %vm4556_vm1, 1.0, %v7969_v16  ;;  %v4113_v29 = vshrl.u32 %v4112_v5, 4  ;;  %v2608_v62 = vadd.f32 %v2560_v58, %v2223_v48  ;;  %v4137_v14 = vsel %vm4136_vm2, 1, %v7953_v50 }
 0x31b   : > { %v4664_v20 = vmul.f32 %v5677_v22, %v7773_v57  ;;  %v4150_v9 = vand.u32 65535, %v7790_v30  ;;  %v4131_v40 = vshrl.u32 %v4126_v38, 16  ;;  %v4139_v49 = vadd.s32 %v4137_v14, %v4135_v52  ;;  %v7998_v14 = vld [vmem:[#allocation6_spill] sm:$0xff] }
 0x31c   : > { %v4114_v2 = vmul.u32 18, %v4113_v29  ;;  %v4151_v23 = vshrl.u32 %v7790_v30, 16  ;;  %v3260_v56 = vadd.f32 %v3210_v19, %v3000_v36  ;;  %v2224_v59 = vadd.f32 %v2177_v18, %v7997_v63  ;;  %v2955_v29 = vpop.f32.mrf.mxu3 }
 0x31d   : > { %v4771_v55 = vadd.f32 %v4770_v10, %v4664_v20  ;;  %v4816_v41 = vmul.f32 %v4664_v20, %v4664_v20  ;;  %v4140_v57 = vadd.s32 %v4139_v49, %v4129_v39  ;;  %v4154_v51 = vmul.u32 58254, %v4150_v9  ;;  %v2180_v8 = vpop.f32.mrf.mxu1 }
 0x31e   : > { %v4115_v33 = vsub.s32 %v7766_v45, %v4114_v2  ;;  %v4155_v17 = vmul.u32 14564, %v4151_v23  ;;  %v3001_v25 = vadd.f32 %v2953_v27, %v2608_v62  ;;  %v4153_v54 = vmul.u32 14564, %v4150_v9 }
 0x31f   : > { %v4851_v44 = vadd.f32 %v4850_v60, %v4816_v41  ;;  %v7800_v37 = vadd.s32 240, %v6882_v0  ;;  %v4141_v26 = vadd.s32 %v4140_v57, %v4131_v40  ;;  %v2609_v46 = vadd.f32 %v2562_v31, %v2224_v59 }
 0x320   : > { %vm4377_vm6 = vcmp.ne.s32.totalorder %v4115_v33, 0  ;;  %vm4413_vm7 = vcmp.lt.s32.totalorder %v4115_v33, 0  ;;  %v4485_v35 = vadd.s32 18, %v4115_v33  ;;  %v4156_v42 = vmul.u32 58254, %v4151_v23  ;;  %v2565_v23 = vpop.f32.mrf.mxu2 }
 0x321   : > { %vm4449_vm8 = vmand %vm4413_vm7, %vm4377_vm6  ;;  %v4157_v28 = vshll.u32 %v4154_v51, 16  ;;  %v4159_v45 = vshll.u32 %v4155_v17, 16  ;;  %v4142_v32 = vshrl.u32 %v4141_v26, 4  ;;  %v4158_v3 = vshrl.u32 %v4154_v51, 16 }
 0x322   : > { %v4521_v61 = vsel %vm4449_vm8, %v4485_v35, %v4115_v33  ;;  %v4179_v53 = vand.u32 65535, %v7800_v37  ;;  %v4180_v58 = vshrl.u32 %v7800_v37, 16  ;;  %v4160_v21 = vshrl.u32 %v4155_v17, 16 }
 0x323   : > { %vm4557_vm9 = vcmp.lt.s32.totalorder %v4521_v61, 16  ;;  %vm4161_vm10 = vc.u32 %v4153_v54, %v4157_v28  ;;  %v4163_v47 = vadd.s32 %v4157_v28, %v4153_v54  ;;  %v4143_v38 = vmul.u32 18, %v4142_v32 }
 0x324   : > { %v5678_v4 = vsel %vm4557_vm9, 1.0, %v7969_v16  ;;  %v4162_v6 = vsel %vm4161_vm10, 1, %v7953_v50  ;;  %v4182_v7 = vmul.u32 14564, %v4179_v53  ;;  %v4183_v36 = vmul.u32 58254, %v4179_v53 }
 0x325   : > { %v4665_v10 = vmul.f32 %v5678_v4, %v3260_v56  ;;  %v4164_v24 = vadd.s32 %v4162_v6, %v4156_v42  ;;  %vm4165_vm11 = vc.u32 %v4163_v47, %v4159_v45  ;;  %v4144_v12 = vsub.s32 %v7776_v34, %v4143_v38  ;;  %v2182_v53 = vpop.f32.mrf.mxu1  ;;  %v7999_v47 = vld [vmem:[#allocation3_spill] sm:$0xff] }
 0x326   : > { %v4166_v60 = vsel %vm4165_vm11, 1, %v7953_v50  ;;  %v4184_v15 = vmul.u32 14564, %v4180_v58  ;;  %v3261_v39 = vadd.f32 %v3213_v11, %v3001_v25  ;;  %v4185_v18 = vmul.u32 58254, %v4180_v58  ;;  %v3215_v25 = vpop.f32.mrf.mxu0  ;;  %v8000_v58 = vld [vmem:[#allocation2_spill] sm:$0xff]  ;;  %v2958_v11 = vpop.f32.mrf.mxu3 }
 0x327   : > { %v5901_v48 = vpack.c.bf16 %v4665_v10, %v4664_v20  ;;  %v4772_v43 = vadd.f32 %v4771_v55, %v4665_v10  ;;  %v4817_v1 = vmul.f32 %v4665_v10, %v4665_v10  ;;  %v4168_v5 = vadd.s32 %v4166_v60, %v4164_v24 }
 0x328   : > { %vm4378_vm12 = vcmp.ne.s32.totalorder %v4144_v12, 0  ;;  %vm4414_vm13 = vcmp.lt.s32.totalorder %v4144_v12, 0  ;;  %v4486_v13 = vadd.s32 18, %v4144_v12  ;;  %v4186_v34 = vshll.u32 %v4183_v36, 16 }
 0x329   : > { %5933 = vst [vmem:[%s7235_s20 + $0x68] sm:$0xff] %v5901_v48   ;;  %v4852_v22 = vadd.f32 %v4851_v44, %v4817_v1  ;;  %vm4450_vm3 = vmand %vm4414_vm13, %vm4378_vm12  ;;  %v4169_v52 = vadd.s32 %v4168_v5, %v4158_v3  ;;  %v3002_v62 = vadd.f32 %v2955_v29, %v2609_v46  ;;  %v2225_v9 = vadd.f32 %v2180_v8, %v7998_v14 }
 0x32a   : > { %v4522_v19 = vsel %vm4450_vm3, %v4486_v13, %v4144_v12  ;;  %v4188_v20 = vshll.u32 %v4184_v15, 16  ;;  %vm4190_vm15 = vc.u32 %v4182_v7, %v4186_v34  ;;  %v4192_v40 = vadd.s32 %v4186_v34, %v4182_v7 }
 0x32b   : > { %vm4558_vm14 = vcmp.lt.s32.totalorder %v4522_v19, 16  ;;  %v4170_v2 = vadd.s32 %v4169_v52, %v4160_v21  ;;  %v4187_v55 = vshrl.u32 %v4183_v36, 16  ;;  %v4191_v41 = vsel %vm4190_vm15, 1, %v7953_v50 }
 0x32c   : > { %v5679_v49 = vsel %vm4558_vm14, 1.0, %v7969_v16  ;;  %v7813_v56 = vadd.s32 248, %v6882_v0  ;;  %v4193_v33 = vadd.s32 %v4191_v41, %v4185_v18  ;;  %vm4194_vm0 = vc.u32 %v4192_v40, %v4188_v20 }
 0x32d   : > { %v7815_v63 = vmul.f32 %v5679_v49, %v3261_v39  ;;  %v4171_v59 = vshrl.u32 %v4170_v2, 4  ;;  %v4189_v27 = vshrl.u32 %v4184_v15, 16  ;;  %v4195_v57 = vsel %vm4194_vm0, 1, %v7953_v50 }
 0x32e   : > { %v4208_v31 = vand.u32 65535, %v7813_v56  ;;  %v4209_v51 = vshrl.u32 %v7813_v56, 16  ;;  %v4197_v35 = vadd.s32 %v4195_v57, %v4193_v33  ;;  %v2610_v26 = vadd.f32 %v2565_v23, %v2225_v9  ;;  %v3218_v19 = vpop.f32.mrf.mxu0 }
 0x32f   : > { %v4773_v17 = vadd.f32 %v4772_v43, %v7815_v63  ;;  %v4818_v44 = vmul.f32 %v7815_v63, %v7815_v63  ;;  %v4172_v54 = vmul.u32 18, %v4171_v59  ;;  %v3262_v61 = vadd.f32 %v3215_v25, %v3002_v62  ;;  %v2567_v43 = vpop.f32.mrf.mxu2 }
 0x330   : > { %v4211_v46 = vmul.u32 14564, %v4208_v31  ;;  %v4212_v42 = vmul.u32 58254, %v4208_v31  ;;  %v4213_v28 = vmul.u32 14564, %v4209_v51  ;;  %v4198_v3 = vadd.s32 %v4197_v35, %v4187_v55  ;;  %v2960_v31 = vpop.f32.mrf.mxu3  ;;  %v8001_v35 = vld [vmem:[#allocation4_spill] sm:$0xff] }
 0x331   : > { %v4853_v45 = vadd.f32 %v4852_v22, %v4818_v44  ;;  %v4173_v32 = vsub.s32 %v7790_v30, %v4172_v54  ;;  %v1966_v4 = vadd.f32 %v8000_v58, %v7999_v47  ;;  %v4214_v38 = vmul.u32 58254, %v4209_v51 }
 0x332   : > { %v4215_v21 = vshll.u32 %v4212_v42, 16  ;;  %v4217_v6 = vshll.u32 %v4213_v28, 16  ;;  %v4199_v24 = vadd.s32 %v4198_v3, %v4189_v27  ;;  %v3003_v7 = vadd.f32 %v2958_v11, %v2610_v26  ;;  %v8002_v26 = vld [vmem:[#allocation25_spill] sm:$0xff] }
 0x333   : > { %vm4379_vm5 = vcmp.ne.s32.totalorder %v4173_v32, 0  ;;  %vm4415_vm1 = vcmp.lt.s32.totalorder %v4173_v32, 0  ;;  %v4487_v10 = vadd.s32 18, %v4173_v32  ;;  %v2226_v12 = vadd.f32 %v2182_v53, %v1966_v4 }
 0x334   : > { %vm4451_vm2 = vmand %vm4415_vm1, %vm4379_vm5  ;;  %vm4219_vm6 = vc.u32 %v4211_v46, %v4215_v21  ;;  %v4221_v60 = vadd.s32 %v4215_v21, %v4211_v46  ;;  %v4200_v30 = vshrl.u32 %v4199_v24, 4  ;;  %v7828_v48 = vadd.s32 256, %v6882_v0 }
 0x335   : > { %v4523_v36 = vsel %vm4451_vm2, %v4487_v10, %v4173_v32  ;;  %v4220_v15 = vsel %vm4219_vm6, 1, %v7953_v50  ;;  %v4216_v1 = vshrl.u32 %v4212_v42, 16  ;;  %v4218_v52 = vshrl.u32 %v4213_v28, 16 }
 0x336   : > { %vm4559_vm7 = vcmp.lt.s32.totalorder %v4523_v36, 16  ;;  %v4222_v5 = vadd.s32 %v4220_v15, %v4214_v38  ;;  %vm4223_vm8 = vc.u32 %v4221_v60, %v4217_v6  ;;  %v4201_v39 = vmul.u32 18, %v4200_v30  ;;  %v3220_v6 = vpop.f32.mrf.mxu0 }
 0x337   : > { %v5680_v8 = vsel %vm4559_vm7, 1.0, %v7969_v16  ;;  %v4224_v13 = vsel %vm4223_vm8, 1, %v7953_v50  ;;  %v4237_v22 = vand.u32 65535, %v7828_v48  ;;  %v4238_v34 = vshrl.u32 %v7828_v48, 16  ;;  %v2570_v10 = vpop.f32.mrf.mxu2 }
 0x338   : > { %v4667_v29 = vmul.f32 %v5680_v8, %v3262_v61  ;;  %v4226_v18 = vadd.s32 %v4224_v13, %v4222_v5  ;;  %v4202_v62 = vsub.s32 %v7800_v37, %v4201_v39  ;;  %v2611_v14 = vadd.f32 %v2567_v43, %v2226_v12  ;;  %v2185_v37 = vpop.f32.mrf.mxu1 }
 0x339   : > { %v4241_v9 = vmul.u32 58254, %v4237_v22  ;;  %v4240_v55 = vmul.u32 14564, %v4237_v22  ;;  %v3263_v59 = vadd.f32 %v3218_v19, %v3003_v7  ;;  %v4242_v27 = vmul.u32 14564, %v4238_v34 }
 0x33a   : > { %v5906_v20 = vpack.c.bf16 %v4667_v29, %v7815_v63  ;;  %v4774_v2 = vadd.f32 %v4773_v17, %v4667_v29  ;;  %v4819_v40 = vmul.f32 %v4667_v29, %v4667_v29  ;;  %v4227_v49 = vadd.s32 %v4226_v18, %v4216_v1  ;;  %v8004_v18 = vld [vmem:[#allocation26_spill] sm:$0xff] }
 0x33b   : > { %vm4380_vm9 = vcmp.ne.s32.totalorder %v4202_v62, 0  ;;  %vm4416_vm10 = vcmp.lt.s32.totalorder %v4202_v62, 0  ;;  %v4488_v23 = vadd.s32 18, %v4202_v62  ;;  %v4243_v51 = vmul.u32 58254, %v4238_v34 }
 0x33c   : > { %5934 = vst [vmem:[%s7235_s20 + $0x70] sm:$0xff] %v5906_v20   ;;  %v4854_v41 = vadd.f32 %v4853_v45, %v4819_v40  ;;  %vm4452_vm11 = vmand %vm4416_vm10, %vm4380_vm9  ;;  %v4228_v33 = vadd.s32 %v4227_v49, %v4218_v52  ;;  %v4244_v44 = vshll.u32 %v4241_v9, 16  ;;  %v3004_v63 = vadd.f32 %v2960_v31, %v2611_v14  ;;  %v8003_v52 = vld [vmem:[#allocation5_spill] sm:$0xff] }
 0x33d   : > { %v4524_v57 = vsel %vm4452_vm11, %v4488_v23, %v4202_v62  ;;  %v4246_v25 = vshll.u32 %v4242_v27, 16  ;;  %v1967_v46 = vadd.f32 %v8002_v26, %v8001_v35  ;;  %v7842_v32 = vadd.s32 264, %v6882_v0 }
 0x33e   : > { %vm4560_vm12 = vcmp.lt.s32.totalorder %v4524_v57, 16  ;;  %v4229_v17 = vshrl.u32 %v4228_v33, 4  ;;  %vm4248_vm13 = vc.u32 %v4240_v55, %v4244_v44  ;;  %v4250_v42 = vadd.s32 %v4244_v44, %v4240_v55  ;;  %v3223_v44 = vpop.f32.mrf.mxu0 }
 0x33f   : > { %v5681_v54 = vsel %vm4560_vm12, 1.0, %v7969_v16  ;;  %v4249_v61 = vsel %vm4248_vm13, 1, %v7953_v50  ;;  %v2227_v3 = vadd.f32 %v2185_v37, %v1967_v46  ;;  %v4245_v53 = vshrl.u32 %v4241_v9, 16  ;;  %v2963_v9 = vpop.f32.mrf.mxu3 }
 0x340   : > { %v4668_v28 = vmul.f32 %v5681_v54, %v3263_v59  ;;  %v4230_v45 = vmul.u32 18, %v4229_v17  ;;  %v4251_v47 = vadd.s32 %v4249_v61, %v4243_v51  ;;  %vm4252_vm3 = vc.u32 %v4250_v42, %v4246_v25  ;;  %v2187_v13 = vpop.f32.mrf.mxu1  ;;  %v2572_v17 = vpop.f32.mrf.mxu2 }
 0x341   : > { %v4253_v21 = vsel %vm4252_vm3, 1, %v7953_v50  ;;  %v4247_v11 = vshrl.u32 %v4242_v27, 16  ;;  %v4266_v7 = vand.u32 65535, %v7842_v32  ;;  %v4267_v12 = vshrl.u32 %v7842_v32, 16 }
 0x342   : > { %v4775_v58 = vadd.f32 %v4774_v2, %v4668_v28  ;;  %v4820_v4 = vmul.f32 %v4668_v28, %v4668_v28  ;;  %v4231_v38 = vsub.s32 %v7813_v56, %v4230_v45  ;;  %v4255_v24 = vadd.s32 %v4253_v21, %v4251_v47 }
 0x343   : > { %v3264_v30 = vadd.f32 %v3220_v6, %v3004_v63  ;;  %v4269_v43 = vmul.u32 14564, %v4266_v7  ;;  %v4270_v1 = vmul.u32 58254, %v4266_v7  ;;  %v2612_v5 = vadd.f32 %v2570_v10, %v2227_v3 }
 0x344   : > { %v4855_v60 = vadd.f32 %v4854_v41, %v4820_v4  ;;  %vm4381_vm14 = vcmp.ne.s32.totalorder %v4231_v38, 0  ;;  %vm4417_vm15 = vcmp.lt.s32.totalorder %v4231_v38, 0  ;;  %v4489_v36 = vadd.s32 18, %v4231_v38  ;;  %v8005_v4 = vld [vmem:[#allocation28_spill] sm:$0xff] }
 0x345   : > { %vm4453_vm0 = vmand %vm4417_vm15, %vm4381_vm14  ;;  %v4256_v15 = vadd.s32 %v4255_v24, %v4245_v53  ;;  %v4271_v8 = vmul.u32 14564, %v4267_v12  ;;  %v4273_v22 = vshll.u32 %v4270_v1, 16  ;;  %v1968_v34 = vadd.f32 %v8004_v18, %v8003_v52 }
 0x346   : > { %v4525_v56 = vsel %vm4453_vm0, %v4489_v36, %v4231_v38  ;;  %v4272_v19 = vmul.u32 58254, %v4267_v12  ;;  %v3005_v40 = vadd.f32 %v2963_v9, %v2612_v5  ;;  %v7853_v55 = vadd.s32 272, %v6882_v0  ;;  %v8006_v38 = vld [vmem:[#allocation27_spill] sm:$0xff]  ;;  %v3225_v52 = vpop.f32.mrf.mxu0 }
 0x347   : > { %vm4561_vm5 = vcmp.lt.s32.totalorder %v4525_v56, 16  ;;  %v4257_v39 = vadd.s32 %v4256_v15, %v4247_v11  ;;  %v4275_v62 = vshll.u32 %v4271_v8, 16  ;;  %vm4277_vm1 = vc.u32 %v4269_v43, %v4273_v22  ;;  %v2965_v7 = vpop.f32.mrf.mxu3 }
 0x348   : > { %v5682_v29 = vsel %vm4561_vm5, 1.0, %v7969_v16  ;;  %v4279_v2 = vadd.s32 %v4273_v22, %v4269_v43  ;;  %v2228_v49 = vadd.f32 %v2187_v13, %v1968_v34  ;;  %v4278_v23 = vsel %vm4277_vm1, 1, %v7953_v50  ;;  %v2575_v34 = vpop.f32.mrf.mxu2 }
 0x349   : > { %v4669_v14 = vmul.f32 %v5682_v29, %v3264_v30  ;;  %v4258_v20 = vshrl.u32 %v4257_v39, 4  ;;  %v4274_v57 = vshrl.u32 %v4270_v1, 16  ;;  %v4280_v31 = vadd.s32 %v4278_v23, %v4272_v19  ;;  %v2190_v1 = vpop.f32.mrf.mxu1 }
 0x34a   : > { %vm4281_vm2 = vc.u32 %v4279_v2, %v4275_v62  ;;  %v4295_v37 = vand.u32 65535, %v7853_v55  ;;  %v4296_v54 = vshrl.u32 %v7853_v55, 16  ;;  %v4276_v35 = vshrl.u32 %v4271_v8, 16 }
 0x34b   : > { %v5911_v41 = vpack.c.bf16 %v4669_v14, %v4668_v28  ;;  %v4776_v59 = vadd.f32 %v4775_v58, %v4669_v14  ;;  %v4821_v33 = vmul.f32 %v4669_v14, %v4669_v14  ;;  %v4259_v27 = vmul.u32 18, %v4258_v20 }
 0x34c   : > { %v4282_v25 = vsel %vm4281_vm2, 1, %v7953_v50  ;;  %v4298_v46 = vmul.u32 14564, %v4295_v37  ;;  %v4299_v42 = vmul.u32 58254, %v4295_v37  ;;  %v4300_v45 = vmul.u32 14564, %v4296_v54 }
 0x34d   : > { %5935 = vst [vmem:[%s7235_s20 + $0x78] sm:$0xff] %v5911_v41   ;;  %v4856_v51 = vadd.f32 %v4855_v60, %v4821_v33  ;;  %v4260_v63 = vsub.s32 %v7828_v48, %v4259_v27  ;;  %v4284_v26 = vadd.s32 %v4282_v25, %v4280_v31  ;;  %v3265_v61 = vadd.f32 %v3223_v44, %v3005_v40 }
 0x34e   : > { %v4301_v53 = vmul.u32 58254, %v4296_v54  ;;  %v4302_v47 = vshll.u32 %v4299_v42, 16  ;;  %v2613_v48 = vadd.f32 %v2572_v17, %v2228_v49  ;;  %v1969_v21 = vadd.f32 %v8006_v38, %v8005_v4  ;;  %v3228_v38 = vpop.f32.mrf.mxu0 }
 0x34f   : > { %vm4382_vm6 = vcmp.ne.s32.totalorder %v4260_v63, 0  ;;  %vm4418_vm7 = vcmp.lt.s32.totalorder %v4260_v63, 0  ;;  %v4490_v28 = vadd.s32 18, %v4260_v63  ;;  %v4285_v3 = vadd.s32 %v4284_v26, %v4274_v57 }
 0x350   : > { %vm4454_vm8 = vmand %vm4418_vm7, %vm4382_vm6  ;;  %v4304_v6 = vshll.u32 %v4300_v45, 16  ;;  %vm4306_vm10 = vc.u32 %v4298_v46, %v4302_v47  ;;  %v4308_v11 = vadd.s32 %v4302_v47, %v4298_v46  ;;  %v4303_v12 = vshrl.u32 %v4299_v42, 16 }
 0x351   : > { %v4526_v58 = vsel %vm4454_vm8, %v4490_v28, %v4260_v63  ;;  %v4286_v10 = vadd.s32 %v4285_v3, %v4276_v35  ;;  %v4307_v60 = vsel %vm4306_vm10, 1, %v7953_v50  ;;  %v7865_v36 = vadd.s32 280, %v6882_v0  ;;  %v2192_v42 = vpop.f32.mrf.mxu1  ;;  %v8007_v3 = vld [vmem:[#allocation29_spill] sm:$0xff] }
 0x352   : > { %vm4562_vm9 = vcmp.lt.s32.totalorder %v4526_v58, 16  ;;  %v4309_v43 = vadd.s32 %v4307_v60, %v4301_v53  ;;  %vm4310_vm11 = vc.u32 %v4308_v11, %v4304_v6  ;;  %v4305_v56 = vshrl.u32 %v4300_v45, 16  ;;  %v8008_v53 = vld [vmem:[#allocation7_spill] sm:$0xff] }
 0x353   : > { %v5683_v24 = vsel %vm4562_vm9, 1.0, %v7969_v16  ;;  %v4287_v15 = vshrl.u32 %v4286_v10, 4  ;;  %v4311_v5 = vsel %vm4310_vm11, 1, %v7953_v50  ;;  %v4324_v8 = vand.u32 65535, %v7865_v36 }
 0x354   : > { %v7867_v30 = vmul.f32 %v5683_v24, %v3265_v61  ;;  %v4325_v39 = vshrl.u32 %v7865_v36, 16  ;;  %v4313_v29 = vadd.s32 %v4311_v5, %v4309_v43  ;;  %v3006_v18 = vadd.f32 %v2965_v7, %v2613_v48 }
 0x355   : > { %v4288_v0 = vmul.u32 18, %v4287_v15  ;;  %v4327_v19 = vmul.u32 14564, %v4324_v8  ;;  %v4328_v62 = vmul.u32 58254, %v4324_v8  ;;  %v2229_v40 = vadd.f32 %v2190_v1, %v1969_v21  ;;  %v2577_v21 = vpop.f32.mrf.mxu2 }
 0x356   : > { %v4777_v13 = vadd.f32 %v4776_v59, %v7867_v30  ;;  %v4822_v22 = vmul.f32 %v7867_v30, %v7867_v30  ;;  %v4329_v14 = vmul.u32 14564, %v4325_v39  ;;  %v4314_v2 = vadd.s32 %v4313_v29, %v4303_v12 }
 0x357   : > { %v4289_v20 = vsub.s32 %v7842_v32, %v4288_v0  ;;  %v4330_v49 = vmul.u32 58254, %v4325_v39  ;;  %v4331_v23 = vshll.u32 %v4328_v62, 16  ;;  %v3266_v27 = vadd.f32 %v3225_v52, %v3006_v18  ;;  %v2968_v32 = vpop.f32.mrf.mxu3  ;;  %v3230_v0 = vpop.f32.mrf.mxu0 }
 0x358   : > { %v4857_v9 = vadd.f32 %v4856_v51, %v4822_v22  ;;  %v4333_v41 = vshll.u32 %v4329_v14, 16  ;;  %v4315_v33 = vadd.s32 %v4314_v2, %v4305_v56  ;;  %v2614_v57 = vadd.f32 %v2575_v34, %v2229_v40 }
 0x359   : > { %vm4383_vm12 = vcmp.ne.s32.totalorder %v4289_v20, 0  ;;  %vm4419_vm13 = vcmp.lt.s32.totalorder %v4289_v20, 0  ;;  %v4491_v59 = vadd.s32 18, %v4289_v20  ;;  %vm4335_vm14 = vc.u32 %v4327_v19, %v4331_v23 }
 0x35a   : > { %vm4455_vm3 = vmand %vm4419_vm13, %vm4383_vm12  ;;  %v4337_v31 = vadd.s32 %v4331_v23, %v4327_v19  ;;  %v4316_v44 = vshrl.u32 %v4315_v33, 4  ;;  %v4336_v51 = vsel %vm4335_vm14, 1, %v7953_v50  ;;  %v4332_v63 = vshrl.u32 %v4328_v62, 16 }
 0x35b   : > { %v4527_v37 = vsel %vm4455_vm3, %v4491_v59, %v4289_v20  ;;  %v4338_v17 = vadd.s32 %v4336_v51, %v4330_v49  ;;  %v3007_v46 = vadd.f32 %v2968_v32, %v2614_v57  ;;  %v4334_v28 = vshrl.u32 %v4329_v14, 16 }
 0x35c   : > { %vm4563_vm15 = vcmp.lt.s32.totalorder %v4527_v37, 16  ;;  %vm4339_vm0 = vc.u32 %v4337_v31, %v4333_v41  ;;  %v4317_v54 = vmul.u32 18, %v4316_v44  ;;  %v1970_v47 = vadd.f32 %v8008_v53, %v8007_v3 }
 0x35d   : > { %v5684_v25 = vsel %vm4563_vm15, 1.0, %v7969_v16  ;;  %v4340_v35 = vsel %vm4339_vm0, 1, %v7953_v50  ;;  %v3267_v24 = vadd.f32 %v3228_v38, %v3007_v46 }
 0x35e   : > { %v4671_v26 = vmul.f32 %v5684_v25, %v3266_v27  ;;  %v4342_v45 = vadd.s32 %v4340_v35, %v4338_v17  ;;  %v4318_v61 = vsub.s32 %v7853_v55, %v4317_v54  ;;  %v2230_v10 = vadd.f32 %v2192_v42, %v1970_v47 }
 0x35f   : > { %v2970_v43 = vpop.f32.mrf.mxu3 }
 0x360   : > { %v5916_v58 = vpack.c.bf16 %v4671_v26, %v7867_v30  ;;  %v4778_v48 = vadd.f32 %v4777_v13, %v4671_v26  ;;  %v4823_v4 = vmul.f32 %v4671_v26, %v4671_v26  ;;  %v4343_v6 = vadd.s32 %v4342_v45, %v4332_v63 }
 0x361   : > { %vm4384_vm5 = vcmp.ne.s32.totalorder %v4318_v61, 0  ;;  %vm4420_vm1 = vcmp.lt.s32.totalorder %v4318_v61, 0  ;;  %v4492_v50 = vadd.s32 18, %v4318_v61  ;;  %v2615_v12 = vadd.f32 %v2577_v21, %v2230_v10 }
 0x362   : > { %5936 = vst [vmem:[%s7235_s20 + $0x80] sm:$0xff] %v5916_v58   ;;  %v4858_v11 = vadd.f32 %v4857_v9, %v4823_v4  ;;  %vm4456_vm2 = vmand %vm4420_vm1, %vm4384_vm5  ;;  %v4344_v55 = vadd.s32 %v4343_v6, %v4334_v28 }
 0x363   : > { %v4528_v7 = vsel %vm4456_vm2, %v4492_v50, %v4318_v61  ;;  %v3008_v56 = vadd.f32 %v2970_v43, %v2615_v12 }
 0x364   : > { %vm4564_vm6 = vcmp.lt.s32.totalorder %v4528_v7, 16  ;;  %v4345_v60 = vshrl.u32 %v4344_v55, 4 }
 0x365   : > { %v5685_v30 = vsel %vm4564_vm6, 1.0, %v7969_v16  ;;  %v3268_v52 = vadd.f32 %v3230_v0, %v3008_v56 }
 0x366   : > { %v4672_v15 = vmul.f32 %v5685_v30, %v3267_v24  ;;  %v4346_v1 = vmul.u32 18, %v4345_v60 }
 0x368   : > { %v4708_v5 = vpack.c.bf16 %v4672_v15, %v4672_v15  ;;  %v4779_v8 = vadd.f32 %v4778_v48, %v4672_v15  ;;  %v4824_v39 = vmul.f32 %v4672_v15, %v4672_v15  ;;  %v4347_v13 = vsub.s32 %v7865_v36, %v4346_v1 }
 0x36a   : > { %4744 = vst [vmem:[%s7235_s20 + $0x88] sm:$0xf] %v4708_v5  ;;  %v4859_v22 = vadd.f32 %v4858_v11, %v4824_v39  ;;  %vm4385_vm7 = vcmp.ne.s32.totalorder %v4347_v13, 0  ;;  %vm4421_vm8 = vcmp.lt.s32.totalorder %v4347_v13, 0  ;;  %v4493_v29 = vadd.s32 18, %v4347_v13 }
 0x36b   : > { %vm4457_vm9 = vmand %vm4421_vm8, %vm4385_vm7 }
 0x36c   : > { %v4529_v18 = vsel %vm4457_vm9, %v4493_v29, %v4347_v13 }
 0x36d   : > { %vm4565_vm10 = vcmp.lt.s32.totalorder %v4529_v18, 16 }
 0x36e   : > { %v5686_v34 = vsel %vm4565_vm10, 1.0, %v7969_v16 }
 0x36f   : > { %v4673_v19 = vmul.f32 %v5686_v34, %v3268_v52 }
 0x371   : > { %v4709_v62 = vpack.c.bf16 %v4673_v19, %v4673_v19  ;;  %v4781_v14 = vsel %vm1992_vm4, %v4673_v19, 0.0  ;;  %v4825_v9 = vmul.f32 %v4673_v19, %v4673_v19 }
 0x372   : > { %v4782_v36 = vadd.f32 %v4781_v14, %v4779_v8 }
 0x373   : > { %4745 = vst [vmem:[%s7235_s20 + $0x8c] sm:$0x7] %v4709_v62  ;;  %v4860_v20 = vsel %vm1992_vm4, %v4825_v9, 0.0 }
 0x374   : > { %v4783_v2 = vrot.slane %v4782_v36, 4  ;;  %v4861_v40 = vadd.f32 %v4860_v20, %v4859_v22 }
 0x376   : > { %v4784_v49 = vadd.f32 %v4783_v2, %v4782_v36  ;;  %v4862_v23 = vrot.slane %v4861_v40, 4 }
 0x378   : > { %v4785_v41 = vrot.slane %v4784_v49, 2  ;;  %v4863_v59 = vadd.f32 %v4862_v23, %v4861_v40 }
 0x37a   : > { %v4786_v33 = vadd.f32 %v4785_v41, %v4784_v49  ;;  %v4864_v27 = vrot.slane %v4863_v59, 2 }
 0x37c   : > { %v4787_v57 = vrot.slane %v4786_v33, 1  ;;  %v4865_v16 = vadd.f32 %v4864_v27, %v4863_v59 }
 0x37e   : > { %v4788_v31 = vadd.f32 %v4787_v57, %v4786_v33  ;;  %v4866_v37 = vrot.slane %v4865_v16, 1 }
 0x380   : > { %4789 = vst [vmem:[%s181_s23] sm:$0x1] %v4788_v31  ;;  %v4867_v44 = vadd.f32 %v4866_v37, %v4865_v16 }
 0x382   : > { %4868 = vst [vmem:[%s181_s23 + $0x1] sm:$0x1] %v4867_v44 }
 0x383 PF: > { %s14_s12 = sadd.s32 1, %s6007_s12  }
 0x384   : > { %p11_p4 = scmp.ge.s32.totalorder %s14_s12, 4  }
 0x386   :  { %13 = sbr.rel (!%p11_p4) target bundleno = 1 (0x1), region = 78 }

</bundles_post_ra>
